<compile_context>
chip_gen: v7x
topology: tpu7x:2x2x1
jax: 0.10.0
libtpu: 0.0.40
codegen_flags: <defaults>
</compile_context>

<pallas_src>
import jax
import jax.numpy as jnp
from jax.experimental import pallas as pl
from jax.experimental.pallas import tpu as pltpu

C_IN = 12
C_MID = 256
C_OUT = 768
K1, S1 = 5, 5
K2 = 5
BN_EPS = 1e-5


def _round_up(x, m):
    return (x + m - 1) // m * m


def _patch_embed_kernel(x_ref, w1_ref, b1_ref, w2_ref, p2_ref, out_ref,
                        a1_ref, lhs_ref):
    # x_ref  : (Bt, L1p, C_IN*K1)      bf16 im2col patches (L1p zero-padded)
    # w1_ref : (C_IN*K1, C_MID)        bf16
    # b1_ref : (1, C_MID)              f32 conv1 bias
    # w2_ref : (K2*C_MID, C_OUT)       bf16 fused-tap weights (BN1 folded in)
    # p2_ref : (3, C_OUT)              f32 rows = [conv2 bias (+BN1 shift
    #                                   folded), BN2 scale, BN2 shift]
    # out_ref: (Bt, L2p, C_OUT)        bf16 (tail rows >= L2 are garbage,
    #                                   cropped host-side)
    # a1_ref : (Bt, L1p, C_MID)        bf16 scratch (conv1 activations)
    # lhs_ref: (Bt, L2p, K2*C_MID)     bf16 scratch (conv2 im2col LHS)
    Bt, L1p, _ = x_ref.shape
    L2p = out_ref.shape[1]

    # ---- conv1: one (Bt*L1p, 60) @ (60, 256) matmul + bias + ReLU --------
    x2 = x_ref[...].reshape(Bt * L1p, C_IN * K1)
    z1 = jnp.dot(x2, w1_ref[...], preferred_element_type=jnp.float32)
    z1 = z1 + b1_ref[...]
    a1_ref[...] = (jnp.maximum(z1, 0.0)
                   .astype(jnp.bfloat16)
                   .reshape(Bt, L1p, C_MID))

    # ---- conv2 im2col: gather the K2 taps into the fused-K LHS -----------
    for k in range(K2):                         # static unroll, K2 == 5
        lhs_ref[:, :, k * C_MID:(k + 1) * C_MID] = a1_ref[:, k:k + L2p, :]

    # ---- conv2: ONE (Bt*L2p, 1280) @ (1280, 768) matmul + epilogue -------
    lhs = lhs_ref[...].reshape(Bt * L2p, K2 * C_MID)
    acc = jnp.dot(lhs, w2_ref[...], preferred_element_type=jnp.float32)

    b2 = p2_ref[0:1, :]
    s2 = p2_ref[1:2, :]
    t2 = p2_ref[2:3, :]
    y = jnp.maximum(acc + b2, 0.0) * s2 + t2    # ReLU + BN2 affine
    out_ref[...] = y.astype(out_ref.dtype).reshape(Bt, L2p, C_OUT)


def patch_embed(x, params, block_batch=None):
    """x: (B, C_IN, L) float32 (NCW, like PyTorch). Returns (B, L2, 768) bf16."""
    (w1, b1, g1, be1, m1, v1,
     w2, b2, g2, be2, m2, v2) = params
    B, Cin, L = x.shape
    assert Cin == C_IN
    L1 = (L - K1) // S1 + 1
    L2 = L1 - K2 + 1
    # Pad so all in-kernel reshapes / stores are bf16 tile-aligned (16, 128).
    L2p = _round_up(L2, 16)
    L1p = _round_up(L2p + K2 - 1, 16)

    # Fold eval-mode BatchNorm into per-channel scale/shift (parameter glue).
    s1 = g1 * jax.lax.rsqrt(v1 + BN_EPS)
    t1 = be1 - m1 * s1
    s2 = g2 * jax.lax.rsqrt(v2 + BN_EPS)
    t2 = be2 - m2 * s2

    # im2col for the stride==kernel conv1: (B, L1p, Cin*K1), zero-padded rows.
    xp = x[:, :, :L1 * S1].reshape(B, Cin, L1, K1)
    xp = xp.transpose(0, 2, 1, 3).reshape(B, L1, Cin * K1)
    xp = jnp.pad(xp, ((0, 0), (0, L1p - L1), (0, 0))).astype(jnp.bfloat16)

    # conv1 weight (Cout, Cin, K) -> (Cin*K, Cout).
    w1m = w1.reshape(C_MID, Cin * K1).T.astype(jnp.bfloat16)

    # conv2 weight (Cout, Cin, K) -> (K, Cin, Cout); fold BN1 (post-ReLU
    # affine) into it:  y1 = ReLU(z1)*s1 + t1, so
    #   sum_k y1 @ w2[k] + b2 = sum_k ReLU(z1) @ (s1[:,None]*w2[k])
    #                           + (b2 + t1 @ sum_k w2[k])
    # then flatten (K, Cin) -> K*Cin to match the in-kernel im2col lane order.
    w2m = jnp.transpose(w2, (2, 1, 0))                       # (K2, 256, 768)
    w2f = (s1[None, :, None] * w2m).reshape(K2 * C_MID, C_OUT)
    w2f = w2f.astype(jnp.bfloat16)
    b2f = b2 + jnp.dot(t1, w2m.sum(axis=0),
                       preferred_element_type=jnp.float32,
                       precision=jax.lax.Precision.HIGHEST)

    # Packed per-channel params: [folded conv2 bias, BN2 scale, BN2 shift].
    p2 = jnp.stack([b2f, s2, t2], axis=0).astype(jnp.float32)   # (3, 768)

    if block_batch is None:
        # Cap Bt at B//2 so the grid has >= 2 steps (keeps both v7x TCs busy).
        target = max(1, B // 2)
        block_batch = next(bt for bt in (8, 4, 2, 1)
                           if bt <= target and B % bt == 0)
    Bt = block_batch
    assert B % Bt == 0

    flops = 2 * B * (L1p * (C_IN * K1) * C_MID + L2p * (K2 * C_MID) * C_OUT)
    bytes_accessed = (xp.size * 2 + w1m.size * 2 + w2f.size * 2
                      + (C_MID + 3 * C_OUT) * 4 + B * L2p * C_OUT * 2)

    out = pl.pallas_call(
        _patch_embed_kernel,
        out_shape=jax.ShapeDtypeStruct((B, L2p, C_OUT), jnp.bfloat16),
        grid=(B // Bt,),
        in_specs=[
            pl.BlockSpec((Bt, L1p, C_IN * K1), lambda b: (b, 0, 0)),
            pl.BlockSpec((C_IN * K1, C_MID), lambda b: (0, 0)),
            pl.BlockSpec((1, C_MID), lambda b: (0, 0)),
            pl.BlockSpec((K2 * C_MID, C_OUT), lambda b: (0, 0)),
            pl.BlockSpec((3, C_OUT), lambda b: (0, 0)),
        ],
        out_specs=pl.BlockSpec((Bt, L2p, C_OUT), lambda b: (b, 0, 0)),
        scratch_shapes=[
            pltpu.VMEM((Bt, L1p, C_MID), jnp.bfloat16),
            pltpu.VMEM((Bt, L2p, K2 * C_MID), jnp.bfloat16),
        ],
        compiler_params=pltpu.CompilerParams(
            dimension_semantics=("parallel",),
            vmem_limit_bytes=48 * 1024 * 1024),
        cost_estimate=pl.CostEstimate(flops=flops, transcendentals=0,
                                      bytes_accessed=bytes_accessed),
    )(xp, w1m, b1.reshape(1, C_MID).astype(jnp.float32), w2f, p2)

    # Crop the tile-alignment padding; output is already the permuted
    # (B, L2, 768) slab the ViT blocks consume.
    return out[:, :L2, :]


def patch_embed_reference(x, params):
    """Pure-JAX reference (eval-mode BN), mirrors the PyTorch forward."""
    (w1, b1, g1, be1, m1, v1,
     w2, b2, g2, be2, m2, v2) = params

    def bn(y, g, be, m, v):
        return ((y - m[None, :, None]) / jnp.sqrt(v + BN_EPS)[None, :, None]
                * g[None, :, None] + be[None, :, None])

    y = jax.lax.conv_general_dilated(
        x, w1, window_strides=(S1,), padding="VALID",
        dimension_numbers=("NCH", "OIH", "NCH"),
        precision=jax.lax.Precision.HIGHEST)
    y = jnp.maximum(y + b1[None, :, None], 0.0)
    y = bn(y, g1, be1, m1, v1)

    y = jax.lax.conv_general_dilated(
        y, w2, window_strides=(1,), padding="VALID",
        dimension_numbers=("NCH", "OIH", "NCH"),
        precision=jax.lax.Precision.HIGHEST)
    y = jnp.maximum(y + b2[None, :, None], 0.0)
    y = bn(y, g2, be2, m2, v2)
    return jnp.transpose(y, (0, 2, 1))


def init_params(key):
    ks = jax.random.split(key, 12)
    w1 = 0.05 * jax.random.normal(ks[0], (C_MID, C_IN, K1), jnp.float32)
    b1 = 0.05 * jax.random.normal(ks[1], (C_MID,), jnp.float32)
    g1 = 1.0 + 0.1 * jax.random.normal(ks[2], (C_MID,), jnp.float32)
    be1 = 0.1 * jax.random.normal(ks[3], (C_MID,), jnp.float32)
    m1 = 0.1 * jax.random.normal(ks[4], (C_MID,), jnp.float32)
    v1 = 0.5 + jnp.abs(jax.random.normal(ks[5], (C_MID,), jnp.float32))
    w2 = 0.05 * jax.random.normal(ks[6], (C_OUT, C_MID, K2), jnp.float32)
    b2 = 0.05 * jax.random.normal(ks[7], (C_OUT,), jnp.float32)
    g2 = 1.0 + 0.1 * jax.random.normal(ks[8], (C_OUT,), jnp.float32)
    be2 = 0.1 * jax.random.normal(ks[9], (C_OUT,), jnp.float32)
    m2 = 0.1 * jax.random.normal(ks[10], (C_OUT,), jnp.float32)
    v2 = 0.5 + jnp.abs(jax.random.normal(ks[11], (C_OUT,), jnp.float32))
    return (w1, b1, g1, be1, m1, v1, w2, b2, g2, be2, m2, v2)


if __name__ == "__main__":
    key = jax.random.PRNGKey(0)
    kx, kp = jax.random.split(key)

    # Small shapes consistent with the module: channels fixed at 12 by the
    # conv weights; short ECG length (full-size would be L=1000 -> 196
    # patches, here L=200 -> 36 patches).
    B, L = 2, 200
    L1 = (L - K1) // S1 + 1
    L2 = L1 - K2 + 1
    x = jax.random.normal(kx, (B, C_IN, L), jnp.float32)
    params = init_params(kp)

    out = jax.block_until_ready(patch_embed(x, params))
    ref = jax.block_until_ready(patch_embed_reference(x, params))

    assert out.shape == ref.shape == (B, L2, C_OUT), out.shape
    # Kernel feeds the MXU bf16 operands and emits a bf16 output (f32
    # accumulation in-kernel); the reference runs f32 HIGHEST-precision
    # convs. Tolerance sized for that gap.
    out_f32 = out.astype(jnp.float32)
    max_err = float(jnp.max(jnp.abs(out_f32 - ref)))
    assert jnp.allclose(out_f32, ref, rtol=2e-2, atol=3e-2), max_err

    print("KERNEL_OK")
</pallas_src>

<mosaic_0001>
module attributes {stable_mosaic.version = 11 : i64} {
  func.func @_patch_embed_kernel(%arg0: i32, %arg1: memref<1x64x60xbf16, #tpu.memory_space<vmem>>, %arg2: memref<60x256xbf16, #tpu.memory_space<vmem>>, %arg3: memref<1x256xf32, #tpu.memory_space<vmem>>, %arg4: memref<1280x768xbf16, #tpu.memory_space<vmem>>, %arg5: memref<3x768xf32, #tpu.memory_space<vmem>>, %arg6: memref<1x48x768xbf16, #tpu.memory_space<vmem>>, %arg7: memref<1x64x256xbf16, #tpu.memory_space<vmem>>, %arg8: memref<1x48x1280xbf16, #tpu.memory_space<vmem>>) attributes {dimension_semantics = [#tpu.dimension_semantics<parallel>], iteration_bounds = array<i64: 2>, scalar_prefetch = 0 : i64, scratch_operands = 2 : i64, tpu.core_type = #tpu.core_type<tc>, window_params = [{transform_indices = @transform_0, window_bounds = array<i64: 1, 64, 60>}, {pipeline_mode = #tpu.pipeline_mode<synchronous>, transform_indices = @transform_1, window_bounds = array<i64: 60, 256>}, {pipeline_mode = #tpu.pipeline_mode<synchronous>, transform_indices = @transform_2, window_bounds = array<i64: 1, 256>}, {pipeline_mode = #tpu.pipeline_mode<synchronous>, transform_indices = @transform_3, window_bounds = array<i64: 1280, 768>}, {pipeline_mode = #tpu.pipeline_mode<synchronous>, transform_indices = @transform_4, window_bounds = array<i64: 3, 768>}, {transform_indices = @transform_5, window_bounds = array<i64: 1, 48, 768>}]} {
    %c0 = arith.constant 0 : index
    %c0_0 = arith.constant 0 : index
    %c0_1 = arith.constant 0 : index
    %0 = vector.load %arg1[%c0, %c0_0, %c0_1] : memref<1x64x60xbf16, #tpu.memory_space<vmem>>, vector<1x64x60xbf16>
    %1 = vector.shape_cast %0 : vector<1x64x60xbf16> to vector<64x60xbf16>
    %c0_2 = arith.constant 0 : index
    %c0_3 = arith.constant 0 : index
    %2 = vector.load %arg2[%c0_2, %c0_3] : memref<60x256xbf16, #tpu.memory_space<vmem>>, vector<60x256xbf16>
    %cst = arith.constant dense<0.000000e+00> : vector<64x256xf32>
    %3 = tpu.matmul %1, %2, %cst {dimension_numbers = #tpu.dot_dimension_numbers<[1], [0], [0], [1], [0, 0, 1, 1], [], []>} : vector<64x60xbf16>, vector<60x256xbf16>, vector<64x256xf32> -> vector<64x256xf32>
    %c0_4 = arith.constant 0 : index
    %c0_5 = arith.constant 0 : index
    %4 = vector.load %arg3[%c0_4, %c0_5] : memref<1x256xf32, #tpu.memory_space<vmem>>, vector<1x256xf32>
    %5 = vector.broadcast %4 : vector<1x256xf32> to vector<64x256xf32>
    %6 = arith.addf %3, %5 : vector<64x256xf32>
    %cst_6 = arith.constant 0.000000e+00 : f32
    %7 = vector.broadcast %cst_6 : f32 to vector<64x256xf32>
    %8 = arith.maximumf %6, %7 : vector<64x256xf32>
    %9 = arith.truncf %8 : vector<64x256xf32> to vector<64x256xbf16>
    %10 = vector.shape_cast %9 : vector<64x256xbf16> to vector<1x64x256xbf16>
    %c0_7 = arith.constant 0 : index
    %c0_8 = arith.constant 0 : index
    %c0_9 = arith.constant 0 : index
    %11 = vector.load %arg7[%c0_7, %c0_8, %c0_9] : memref<1x64x256xbf16, #tpu.memory_space<vmem>>, vector<1x64x256xbf16>
    tpu.vector_store %arg7[%c0_7, %c0_8, %c0_9], %10 {strides = array<i32>} : memref<1x64x256xbf16, #tpu.memory_space<vmem>>, vector<1x64x256xbf16>,
    %c0_10 = arith.constant 0 : index
    %c0_11 = arith.constant 0 : index
    %c0_12 = arith.constant 0 : index
    %12 = vector.load %arg7[%c0_10, %c0_11, %c0_12] : memref<1x64x256xbf16, #tpu.memory_space<vmem>>, vector<1x48x256xbf16>
    %c0_13 = arith.constant 0 : index
    %c0_14 = arith.constant 0 : index
    %c0_15 = arith.constant 0 : index
    %13 = vector.load %arg8[%c0_13, %c0_14, %c0_15] : memref<1x48x1280xbf16, #tpu.memory_space<vmem>>, vector<1x48x256xbf16>
    tpu.vector_store %arg8[%c0_13, %c0_14, %c0_15], %12 {strides = array<i32>} : memref<1x48x1280xbf16, #tpu.memory_space<vmem>>, vector<1x48x256xbf16>,
    %c0_16 = arith.constant 0 : index
    %c1 = arith.constant 1 : index
    %c0_17 = arith.constant 0 : index
    %14 = vector.load %arg7[%c0_16, %c1, %c0_17] : memref<1x64x256xbf16, #tpu.memory_space<vmem>>, vector<1x48x256xbf16>
    %c0_18 = arith.constant 0 : index
    %c0_19 = arith.constant 0 : index
    %c256 = arith.constant 256 : index
    %15 = vector.load %arg8[%c0_18, %c0_19, %c256] : memref<1x48x1280xbf16, #tpu.memory_space<vmem>>, vector<1x48x256xbf16>
    tpu.vector_store %arg8[%c0_18, %c0_19, %c256], %14 {strides = array<i32>} : memref<1x48x1280xbf16, #tpu.memory_space<vmem>>, vector<1x48x256xbf16>,
    %c0_20 = arith.constant 0 : index
    %c2 = arith.constant 2 : index
    %c0_21 = arith.constant 0 : index
    %16 = vector.load %arg7[%c0_20, %c2, %c0_21] : memref<1x64x256xbf16, #tpu.memory_space<vmem>>, vector<1x48x256xbf16>
    %c0_22 = arith.constant 0 : index
    %c0_23 = arith.constant 0 : index
    %c512 = arith.constant 512 : index
    %17 = vector.load %arg8[%c0_22, %c0_23, %c512] : memref<1x48x1280xbf16, #tpu.memory_space<vmem>>, vector<1x48x256xbf16>
    tpu.vector_store %arg8[%c0_22, %c0_23, %c512], %16 {strides = array<i32>} : memref<1x48x1280xbf16, #tpu.memory_space<vmem>>, vector<1x48x256xbf16>,
    %c0_24 = arith.constant 0 : index
    %c3 = arith.constant 3 : index
    %c0_25 = arith.constant 0 : index
    %18 = vector.load %arg7[%c0_24, %c3, %c0_25] : memref<1x64x256xbf16, #tpu.memory_space<vmem>>, vector<1x48x256xbf16>
    %c0_26 = arith.constant 0 : index
    %c0_27 = arith.constant 0 : index
    %c768 = arith.constant 768 : index
    %19 = vector.load %arg8[%c0_26, %c0_27, %c768] : memref<1x48x1280xbf16, #tpu.memory_space<vmem>>, vector<1x48x256xbf16>
    tpu.vector_store %arg8[%c0_26, %c0_27, %c768], %18 {strides = array<i32>} : memref<1x48x1280xbf16, #tpu.memory_space<vmem>>, vector<1x48x256xbf16>,
    %c0_28 = arith.constant 0 : index
    %c4 = arith.constant 4 : index
    %c0_29 = arith.constant 0 : index
    %20 = vector.load %arg7[%c0_28, %c4, %c0_29] : memref<1x64x256xbf16, #tpu.memory_space<vmem>>, vector<1x48x256xbf16>
    %c0_30 = arith.constant 0 : index
    %c0_31 = arith.constant 0 : index
    %c1024 = arith.constant 1024 : index
    %21 = vector.load %arg8[%c0_30, %c0_31, %c1024] : memref<1x48x1280xbf16, #tpu.memory_space<vmem>>, vector<1x48x256xbf16>
    tpu.vector_store %arg8[%c0_30, %c0_31, %c1024], %20 {strides = array<i32>} : memref<1x48x1280xbf16, #tpu.memory_space<vmem>>, vector<1x48x256xbf16>,
    %c0_32 = arith.constant 0 : index
    %c0_33 = arith.constant 0 : index
    %c0_34 = arith.constant 0 : index
    %22 = vector.load %arg8[%c0_32, %c0_33, %c0_34] : memref<1x48x1280xbf16, #tpu.memory_space<vmem>>, vector<1x48x1280xbf16>
    %23 = vector.shape_cast %22 : vector<1x48x1280xbf16> to vector<48x1280xbf16>
    %c0_35 = arith.constant 0 : index
    %c0_36 = arith.constant 0 : index
    %24 = vector.load %arg4[%c0_35, %c0_36] : memref<1280x768xbf16, #tpu.memory_space<vmem>>, vector<1280x768xbf16>
    %cst_37 = arith.constant dense<0.000000e+00> : vector<48x768xf32>
    %25 = tpu.matmul %23, %24, %cst_37 {dimension_numbers = #tpu.dot_dimension_numbers<[1], [0], [0], [1], [0, 0, 1, 1], [], []>} : vector<48x1280xbf16>, vector<1280x768xbf16>, vector<48x768xf32> -> vector<48x768xf32>
    %c0_38 = arith.constant 0 : index
    %c0_39 = arith.constant 0 : index
    %26 = vector.load %arg5[%c0_38, %c0_39] : memref<3x768xf32, #tpu.memory_space<vmem>>, vector<1x768xf32>
    %c1_40 = arith.constant 1 : index
    %c0_41 = arith.constant 0 : index
    %27 = vector.load %arg5[%c1_40, %c0_41] : memref<3x768xf32, #tpu.memory_space<vmem>>, vector<1x768xf32>
    %c2_42 = arith.constant 2 : index
    %c0_43 = arith.constant 0 : index
    %28 = vector.load %arg5[%c2_42, %c0_43] : memref<3x768xf32, #tpu.memory_space<vmem>>, vector<1x768xf32>
    %29 = vector.broadcast %26 : vector<1x768xf32> to vector<48x768xf32>
    %30 = arith.addf %25, %29 : vector<48x768xf32>
    %cst_44 = arith.constant 0.000000e+00 : f32
    %31 = vector.broadcast %cst_44 : f32 to vector<48x768xf32>
    %32 = arith.maximumf %30, %31 : vector<48x768xf32>
    %33 = vector.broadcast %27 : vector<1x768xf32> to vector<48x768xf32>
    %34 = arith.mulf %32, %33 : vector<48x768xf32>
    %35 = vector.broadcast %28 : vector<1x768xf32> to vector<48x768xf32>
    %36 = arith.addf %34, %35 : vector<48x768xf32>
    %37 = arith.truncf %36 : vector<48x768xf32> to vector<48x768xbf16>
    %38 = vector.shape_cast %37 : vector<48x768xbf16> to vector<1x48x768xbf16>
    %c0_45 = arith.constant 0 : index
    %c0_46 = arith.constant 0 : index
    %c0_47 = arith.constant 0 : index
    %39 = vector.load %arg6[%c0_45, %c0_46, %c0_47] : memref<1x48x768xbf16, #tpu.memory_space<vmem>>, vector<1x48x768xbf16>
    tpu.vector_store %arg6[%c0_45, %c0_46, %c0_47], %38 {strides = array<i32>} : memref<1x48x768xbf16, #tpu.memory_space<vmem>>, vector<1x48x768xbf16>,
    return
  }
  func.func @transform_0(%arg0: i32) -> (i32, i32, i32) {
    %c0_i32 = arith.constant 0 : i32
    %c0_i32_0 = arith.constant 0 : i32
    %c0_i32_1 = arith.constant 0 : i32
    return %arg0, %c0_i32, %c0_i32_0 : i32, i32, i32
  }
  func.func @transform_1(%arg0: i32) -> (i32, i32) {
    %c0_i32 = arith.constant 0 : i32
    %c0_i32_0 = arith.constant 0 : i32
    %c0_i32_1 = arith.constant 0 : i32
    return %c0_i32, %c0_i32_0 : i32, i32
  }
  func.func @transform_2(%arg0: i32) -> (i32, i32) {
    %c0_i32 = arith.constant 0 : i32
    %c0_i32_0 = arith.constant 0 : i32
    %c0_i32_1 = arith.constant 0 : i32
    return %c0_i32, %c0_i32_0 : i32, i32
  }
  func.func @transform_3(%arg0: i32) -> (i32, i32) {
    %c0_i32 = arith.constant 0 : i32
    %c0_i32_0 = arith.constant 0 : i32
    %c0_i32_1 = arith.constant 0 : i32
    return %c0_i32, %c0_i32_0 : i32, i32
  }
  func.func @transform_4(%arg0: i32) -> (i32, i32) {
    %c0_i32 = arith.constant 0 : i32
    %c0_i32_0 = arith.constant 0 : i32
    %c0_i32_1 = arith.constant 0 : i32
    return %c0_i32, %c0_i32_0 : i32, i32
  }
  func.func @transform_5(%arg0: i32) -> (i32, i32, i32) {
    %c0_i32 = arith.constant 0 : i32
    %c0_i32_0 = arith.constant 0 : i32
    %c0_i32_1 = arith.constant 0 : i32
    return %arg0, %c0_i32, %c0_i32_0 : i32, i32, i32
  }
}

</mosaic_0001>

<bundles_post_ra>
// kernel: tpu_custom_call.1
= control target key start
LH: loop header
LB: loop body
LE: loop exit
PB: predicated region body
PF: predicated region fallthrough
CT: control target
= control target key end

     0   :  { %s7525_s0 = inlined_call_operand.vmem [shape: bf16[2,64,60], index: 0, kind: input, shape index: {}]   ;;  %s7526_s1 = inlined_call_operand.hbm [shape: bf16[60,256], index: 1, kind: input, shape index: {}]   ;;  %s7527_s2 = inlined_call_operand.hbm [shape: f32[1,256], index: 2, kind: input, shape index: {}]   ;;  %s7528_s3 = inlined_call_operand.hbm [shape: bf16[1280,768], index: 3, kind: input, shape index: {}]   ;;  %s7529_s4 = inlined_call_operand.hbm [shape: f32[3,768], index: 4, kind: input, shape index: {}]   ;;  %s7530_s5 = inlined_call_operand.hbm [shape: bf16[2,48,768], index: 5, kind: output, shape index: {}]  }
   0x1   :  { %7534 = sst [smem:[#allocation17_spill]] %s7526_s1 }
   0x2   :  { %10 = vsyncpa [#allocation5], 0 }
   0x3   :  { %11 = vsyncpa [#allocation8], 0 }
   0x4   :  { %12 = vsyncpa [#allocation11], 0 }
   0x5   :  { %13 = vsyncpa [#allocation6], 0 }
   0x6   :  { %15 = vsyncpa [#allocation6 + $0x1], 0  ;;  %s6851_s18 = smov 0   ;;  %s6853_s19 = smov 0  }
   0x7   :  { %s6855_s20 = smov 0   ;;  %s6857_s21 = smov 0  }
   0x8 LB: > { %s6872_s22 = sadd.s32 4294967295, %s6807_s21   ;;  %s5060_s23 = sadd.s32 4294967294, %s6807_s21   ;;  %s6807_s21 = sphi %s6857_s21, %s7553_s21   ;;  %s6803_s20 = sphi %s6855_s20, %s7552_s20   ;;  %s6799_s19 = sphi %s6853_s19, %s7551_s19   ;;  %s6795_s18 = sphi %s6851_s18, %s7550_s18  }
   0x9   : > { %s6876_s24 = sadd.s32 1, %s6807_s21   ;;  %s138_s25 = sadd.s32 1, %s6803_s20 }
   0xa   : > { %s135_s26 = ssub.s32 %s6807_s21, %s6876_s24  ;;  %p148_p0 = scmp.ne.s32.totalorder %s6803_s20, %s6799_s19 }
   0xb   : > { %p136_p1 = scmp.eq.s32.totalorder %s135_s26, 0  ;;  %p149_p2 = scmp.eq.s32.totalorder %s6872_s22, 1 }
   0xc   : > { %p154_p3 = scmp.ne.s32.totalorder %s6799_s19, %s6795_s18  ;;  %p155_p4 = scmp.eq.s32.totalorder %s5060_s23, 1 }
   0xd   : > { %s6887_s27 = scalar_select %p136_p1, %s6803_s20, %s138_s25  }
   0xe   : > { %p6889_p5 = por %p149_p2, %p148_p0  ;;  %p6893_p6 = por %p155_p4, %p154_p3 }
   0xf   : > { %p5061_p7 = scmp.ge.s32.totalorder %s6807_s21, 1  ;;  %p162_p8 = scmp.lt.s32.totalorder %s6807_s21, 3 }
  0x10   : > { %s7535_s28 = scalar_select %p6889_p5, 1, 0 }
  0x11   : > { %s7536_s29 = scalar_select %p6893_p6, 1, 0 }
  0x12   : > { %p7531_p9 = scmp.eq.s32.totalorder %s6872_s22, 0  ;;  %p6900_p10 = pnand %p5061_p7, %p162_p8 }
  0x13   : > { %s6809_s6 = smov [#allocation7]   ;;  %s6810_s8 = smov [#allocation4]  }
  0x14   : > { %s7537_s30 = scalar_select %p6900_p10, 1, 0 }
  0x15   : > { %s188_s7 = sshll.u32 %s6809_s6, 4  ;;  %p5811_p11 = pneg %p6900_p10  ;;  %s189_s7 = int_to_ptr.vmem [resolvable:$true] %s188_s7 }
  0x16   : > { %s174_s9 = sshll.u32 %s6810_s8, 4  ;;  %s6811_s11 = smov [#allocation9]   ;;  %s6912_s9 = int_to_ptr.vmem [resolvable:$true] %s174_s9 }
  0x17   : > { %p6908_p12 = pnand %p7531_p9, %p5811_p11  ;;  %s6914_s12 = sshll.u32 %s6811_s11, 4  ;;  %s199_s12 = int_to_ptr.vmem [resolvable:$true] %s6914_s12 }
  0x18   : > { %s6621_s15 = scalar_lea.hbm %s7527_s2, 32 }
  0x19   : > { %p6622_p13 = scmp.ne.s32.totalorder %s7527_s2, %s6621_s15  ;;  %p6924_p0 = pneg %p6908_p12 }
  0x1a   : > { %p6628_p3 = scmp.lt.u32.totalorder %s6621_s15, %s7527_s2 }
  0x1b   : > { %p6624_p1 = pnand %p6924_p0, %p6622_p13 }
  0x1d   : > { %p6625_p2 = pneg %p6624_p1 }
  0x1f   : > { %p6630_p4 = pnand %p6628_p3, %p6625_p2 }
  0x21   : > { %6633 = shalt.err (!%p6630_p4)
}
  0x22   : > { %s6634_s6 = scalar_lea.vmem %s189_s7, 32  ;;  %p6642_p9 = scmp.lt.s32.totalorder %s189_s7, %s189_s7 }
  0x23   : > { %p6635_p7 = scmp.ne.s32.totalorder %s189_s7, %s6634_s6  ;;  %p6643_p6 = scmp.lt.s32.totalorder %s6634_s6, %s6634_s6 }
  0x25   : > { %p6637_p8 = pnand %p6635_p7, %p6924_p0  ;;  %p6644_p5 = por %p6643_p6, %p6642_p9 }
  0x27   : > { %p6638_p11 = pneg %p6637_p8 }
  0x29   : > { %p6645_p10 = pnand %p6644_p5, %p6638_p11 }
  0x2b   : > { %6648 = shalt.err (!%p6645_p10)
}
  0x2c   : > { %5817 = dma.hbm_to_vmem [thread:$0]  (!%p6908_p12), %s7527_s2, 32, %s189_s7, [#allocation8]  }
  0x2d   : > { %s7540_s1 = sld [smem:[#allocation17_spill]] }
  0x33   : > { %s6649_s15 = scalar_lea.hbm %s7540_s1, 1024 }
  0x34   : > { %p6650_p13 = scmp.ne.s32.totalorder %s7540_s1, %s6649_s15  ;;  %p6656_p5 = scmp.lt.u32.totalorder %s6649_s15, %s7540_s1 }
  0x36   : > { %p6652_p1 = pnand %p6650_p13, %p6924_p0 }
  0x38   : > { %p6653_p6 = pneg %p6652_p1 }
  0x3a   : > { %p6658_p9 = pnand %p6656_p5, %p6653_p6 }
  0x3c   : > { %6661 = shalt.err (!%p6658_p9)
}
  0x3d   : > { %s6662_s7 = scalar_lea.vmem %s6912_s9, 1024  ;;  %p6670_p4 = scmp.lt.s32.totalorder %s6912_s9, %s6912_s9 }
  0x3e   : > { %p6663_p10 = scmp.ne.s32.totalorder %s6912_s9, %s6662_s7  ;;  %p6671_p7 = scmp.lt.s32.totalorder %s6662_s7, %s6662_s7 }
  0x40   : > { %p6665_p2 = pnand %p6663_p10, %p6924_p0  ;;  %p6672_p8 = por %p6671_p7, %p6670_p4 }
  0x42   : > { %p6666_p3 = pneg %p6665_p2 }
  0x44   : > { %p6673_p11 = pnand %p6672_p8, %p6666_p3 }
  0x46   : > { %6676 = shalt.err (!%p6673_p11)
}
  0x47   : > { %s6812_s6 = smov 128   ;;  %s6813_s8 = smov 8  }
  0x48   : > { %5814 = dma.hbm_to_vmem [thread:$0]  (!%p6908_p12), %s7540_s1, 1024, %s6912_s9, [#allocation5], %s6812_s6, %s6812_s6, %s6813_s8  }
  0x49   : > { %s6677_s16 = scalar_lea.hbm %s7528_s3, 61440 }
  0x4a   : > { %p6678_p13 = scmp.ne.s32.totalorder %s7528_s3, %s6677_s16  ;;  %p6684_p5 = scmp.lt.u32.totalorder %s6677_s16, %s7528_s3 }
  0x4c   : > { %p6680_p1 = pnand %p6678_p13, %p6924_p0 }
  0x4e   : > { %p6681_p6 = pneg %p6680_p1 }
  0x50   : > { %p6686_p9 = pnand %p6684_p5, %p6681_p6 }
  0x52   : > { %6689 = shalt.err (!%p6686_p9)
}
  0x53   : > { %s6690_s11 = scalar_lea.vmem %s199_s12, 61440  ;;  %p6698_p4 = scmp.lt.s32.totalorder %s199_s12, %s199_s12 }
  0x54   : > { %p6691_p10 = scmp.ne.s32.totalorder %s199_s12, %s6690_s11  ;;  %p6699_p7 = scmp.lt.s32.totalorder %s6690_s11, %s6690_s11 }
  0x56   : > { %p6693_p2 = pnand %p6691_p10, %p6924_p0  ;;  %p6700_p8 = por %p6699_p7, %p6698_p4 }
  0x58   : > { %p6694_p3 = pneg %p6693_p2 }
  0x5a   : > { %p6701_p11 = pnand %p6700_p8, %p6694_p3 }
  0x5c   : > { %6704 = shalt.err (!%p6701_p11)
}
  0x5d   : > { %s6814_s9 = smov 384   ;;  %s6815_s6 = smov 24  }
  0x5e   : > { %5820 = dma.hbm_to_vmem [thread:$0]  (!%p6908_p12), %s7528_s3, 61440, %s199_s12, [#allocation8], %s6814_s9, %s6814_s9, %s6815_s6  }
  0x5f   : > { %s6816_s14 = smov [#allocation10]   ;;  %s6705_s25 = scalar_lea.hbm %s7529_s4, 384 }
  0x60   : > { %s212_s15 = sshll.u32 %s6816_s14, 4  ;;  %p6706_p13 = scmp.ne.s32.totalorder %s7529_s4, %s6705_s25  ;;  %s213_s15 = int_to_ptr.vmem [resolvable:$true] %s212_s15 }
  0x61   : > { %p6712_p5 = scmp.lt.u32.totalorder %s6705_s25, %s7529_s4 }
  0x62   : > { %p6708_p1 = pnand %p6706_p13, %p6924_p0 }
  0x64   : > { %p6709_p6 = pneg %p6708_p1 }
  0x66   : > { %p6714_p9 = pnand %p6712_p5, %p6709_p6 }
  0x68   : > { %6717 = shalt.err (!%p6714_p9)
}
  0x69   : > { %s6718_s12 = scalar_lea.vmem %s213_s15, 384  ;;  %p6726_p4 = scmp.lt.s32.totalorder %s213_s15, %s213_s15 }
  0x6a   : > { %p6719_p10 = scmp.ne.s32.totalorder %s213_s15, %s6718_s12  ;;  %p6727_p7 = scmp.lt.s32.totalorder %s6718_s12, %s6718_s12 }
  0x6c   : > { %p6721_p2 = pnand %p6719_p10, %p6924_p0  ;;  %p6728_p8 = por %p6727_p7, %p6726_p4 }
  0x6e   : > { %p6722_p3 = pneg %p6721_p2 }
  0x70   : > { %p6729_p11 = pnand %p6728_p8, %p6722_p3 }
  0x72   : > { %6732 = shalt.err (!%p6729_p11)
}
  0x73   : > { %5823 = dma.hbm_to_vmem [thread:$0]  (!%p6908_p12), %s7529_s4, 384, %s213_s15, [#allocation11]  }
  0x74   : > { %p7541_p13 = scmp.ne.s32.totalorder %s7537_s30, 0 }
  0x75   : > { %p7542_p1 = scmp.eq.s32.totalorder (!%p7541_p13), %s6872_s22, 0 }
  0x76   : > { %233 = sbr.rel (%p7541_p13) target bundleno = 1087 (0x43f), region = 40 }
  0x7d   : > { %6778 = dma.done.wait (%p7542_p1), [#allocation5], 1024   ;;  %p7543_p0 = pmov %p7542_p1 }
  0x7f   : > { %6780 = vsyncadd (%p7543_p0), [#allocation5], 4294966272  ;;  %p7544_p6 = pmov %p7543_p0 }
  0x80   : > { %p7545_p5 = pmov %p7543_p0 }
  0x81   : > { %6782 = dma.done.wait (%p7544_p6), [#allocation8], 61472  }
  0x82   : > { %6784 = vsyncadd (%p7545_p5), [#allocation8], 4294905824  ;;  %p7546_p9 = pmov %p7543_p0 }
  0x83   : > { %p7547_p12 = pmov %p7543_p0 }
  0x84   : > { %6786 = dma.done.wait (%p7546_p9), [#allocation11], 384  }
  0x85   : > { %6788 = vsyncadd (%p7547_p12), [#allocation11], 4294966912  ;;  %p273_p10 = scmp.lt.s32.totalorder %s6872_s22, 1  ;;  %v6817_v0 = vmov 0   ;;  %v5880_v1 = vld [vmem:[#allocation4 + $0x4] ss:$8 sps:$4 sm:$0xff]  }
  0x86   : > { %417 = vmatprep.mubr.bf16.mxu0 %v6817_v0  ;;  %v5882_v2 = vld [vmem:[#allocation4] ss:$8 sps:$4 sm:$0xff]   ;;  %385 = vmatprep.subr.bf16.mxu0 %v5880_v1  ;;  %v5883_v3 = vld [vmem:[#allocation4 + $0x14] ss:$8 sps:$4 sm:$0xff]   ;;  %v5885_v4 = vld [vmem:[#allocation4 + $0x10] ss:$8 sps:$4 sm:$0xff]  }
  0x87   : > { %s274_s1 = scalar_select %p273_p10, %s6872_s22, 1  ;;  %386 = vmatpush1.bf16.msra.mxu0 %v5882_v2  ;;  %v5886_v5 = vld [vmem:[#allocation4 + $0x24] ss:$8 sps:$4 sm:$0xff]   ;;  %v5889_v6 = vld [vmem:[#allocation4 + $0x34] ss:$8 sps:$4 sm:$0x3f]  }
  0x88   : > { %387 = vmatprep.subr.bf16.mxu0 %v5883_v3  ;;  %v5891_v7 = vld [vmem:[#allocation4 + $0x30] ss:$8 sps:$4 sm:$0x3f]   ;;  %v5888_v8 = vld [vmem:[#allocation4 + $0x20] ss:$8 sps:$4 sm:$0xff]   ;;  %vm378_vm0 = vcmask 1045504  }
  0x89   : > { %s5592_s30 = sshll.u32 %s274_s1, 5  ;;  %v380_v9 = vsel %vm378_vm0, %v5891_v7, 0  ;;  %v5898_v10 = vld [vmem:[#allocation9 + $0x4] ss:$24 sps:$4 sm:$0xff]   ;;  %vm365_vm1 = vcmask 490496   ;;  %vm595_vm2 = vcmask 1046528  }
  0x8a   : > { %s7020_s8 = scalar_lea.vmem %s7525_s0, %s5592_s30  ;;  %v5905_v12 = vld [vmem:[#allocation9 + $0x604] ss:$24 sps:$4 sm:$0xff]   ;;  %v5896_v13 = vld [vmem:[#allocation9] ss:$24 sps:$4 sm:$0xff]   ;;  %v5901_v14 = vld [vmem:[#allocation9 + $0x34] ss:$24 sps:$4 sm:$0xff]  }
  0x8b   : > { %388 = vmatpush1.bf16.msra.mxu0 %v5885_v4  ;;  %v5892_v11 = vld [vmem:[%s7020_s8] sm:$0xff]   ;;  %3828 = vmatprep.subr.bf16.mxu1 %v5905_v12  ;;  %v5911_v16 = vld [vmem:[#allocation9 + $0x634] ss:$24 sps:$4 sm:$0xff]   ;;  %v5899_v17 = vld [vmem:[#allocation9 + $0x30] ss:$24 sps:$4 sm:$0xff]   ;;  %s270_s13 = sand.u32 1, %s6799_s19  }
  0x8c   : > { %389 = vmatprep.subr.bf16.mxu0 %v5886_v5  ;;  %v5910_v15 = vld [vmem:[#allocation9 + $0x600] ss:$24 sps:$4 sm:$0xff]   ;;  %v5916_v18 = vld [vmem:[#allocation9 + $0x630] ss:$24 sps:$4 sm:$0xff]   ;;  %v5917_v19 = vld [vmem:[#allocation9 + $0x664] ss:$24 sps:$4 sm:$0xff]  }
  0x8d   : > { %3829 = vmatpush1.bf16.msra.mxu1 %v5910_v15  ;;  %v5893_v20 = vld [vmem:[%s7020_s8 + $0x8] sm:$0xff]   ;;  %v5922_v22 = vld [vmem:[#allocation9 + $0x660] ss:$24 sps:$4 sm:$0xff]   ;;  %v5894_v29 = vld [vmem:[%s7020_s8 + $0x10] sm:$0xff]   ;;  %vm510_vm3 = vsmask.f32 7424 }
  0x8e   : > { %3830 = vmatprep.subr.bf16.mxu1 %v5911_v16  ;;  %v5904_v21 = vld [vmem:[#allocation9 + $0x64] ss:$24 sps:$4 sm:$0xff]   ;;  %v5923_v23 = vld [vmem:[#allocation9 + $0x694] ss:$24 sps:$4 sm:$0xff]   ;;  %v5902_v24 = vld [vmem:[#allocation9 + $0x60] ss:$24 sps:$4 sm:$0xff]   ;;  %v297_v16 = vlaneseq }
  0x8f   : > { %390 = vmatpush1.bf16.msra.mxu0 %v5888_v8  ;;  %v5909_v25 = vld [vmem:[#allocation9 + $0x94] ss:$24 sps:$4 sm:$0xff]   ;;  %v5928_v26 = vld [vmem:[#allocation9 + $0x690] ss:$24 sps:$4 sm:$0xff]   ;;  %v5929_v27 = vld [vmem:[#allocation9 + $0x6c4] ss:$24 sps:$4 sm:$0xff]  }
  0x90   : > { %5086 = vmatprep.subr.msk.bf16.mxu0 %vm378_vm0, %v5889_v6  ;;  %v5907_v28 = vld [vmem:[#allocation9 + $0x90] ss:$24 sps:$4 sm:$0xff]   ;;  %v5915_v30 = vld [vmem:[#allocation9 + $0xc4] ss:$24 sps:$4 sm:$0xff]   ;;  %v5934_v31 = vld [vmem:[#allocation9 + $0x6c0] ss:$24 sps:$4 sm:$0xff]  }
  0x91   : > { %3831 = vmatpush1.bf16.msra.mxu1 %v5916_v18  ;;  %v5935_v32 = vld [vmem:[#allocation9 + $0x6f4] ss:$24 sps:$4 sm:$0xff]   ;;  %v5913_v33 = vld [vmem:[#allocation9 + $0xc0] ss:$24 sps:$4 sm:$0xff]   ;;  %v5940_v35 = vld [vmem:[#allocation9 + $0x6f0] ss:$24 sps:$4 sm:$0xff]  }
  0x92   : > { %3832 = vmatprep.subr.bf16.mxu1 %v5917_v19  ;;  %v5921_v34 = vld [vmem:[#allocation9 + $0xf4] ss:$24 sps:$4 sm:$0xff]   ;;  %v5941_v36 = vld [vmem:[#allocation9 + $0x724] ss:$24 sps:$4 sm:$0xff]   ;;  %v5919_v37 = vld [vmem:[#allocation9 + $0xf0] ss:$24 sps:$4 sm:$0xff]  }
  0x93   : > { %392 = vmatpush1.bf16.msra.mxu0 %v380_v9  ;;  %v5895_v38 = vld [vmem:[%s7020_s8 + $0x18] sm:$0xff]   ;;  %v5952_v44 = vld [vmem:[#allocation9 + $0x750] ss:$24 sps:$4 sm:$0xff]   ;;  %v295_v18 = vld [vmem:[#allocation7] sm:$0x3]  ;;  %s7339_s14 = smul.u32 144, %s270_s13 }
  0x94   : > { %3702 = vmatprep.subr.bf16.mxu0 %v5898_v10  ;;  %v5927_v39 = vld [vmem:[#allocation9 + $0x124] ss:$24 sps:$4 sm:$0xff]   ;;  %v5925_v40 = vld [vmem:[#allocation9 + $0x120] ss:$24 sps:$4 sm:$0xff]   ;;  %v5947_v42 = vld [vmem:[#allocation9 + $0x754] ss:$24 sps:$4 sm:$0xff]  }
  0x95   : > { %3833 = vmatpush1.bf16.msra.mxu1 %v5922_v22  ;;  %v5946_v41 = vld [vmem:[#allocation9 + $0x720] ss:$24 sps:$4 sm:$0xff]   ;;  %v5933_v43 = vld [vmem:[#allocation9 + $0x154] ss:$24 sps:$4 sm:$0xff]   ;;  %v5953_v45 = vld [vmem:[#allocation9 + $0x784] ss:$24 sps:$4 sm:$0xff]  }
  0x96   : > { %5087 = vmatmul.mubr.msk.bf16.vlgmr.msra.gmra.mrb[0].mxu0 %vm365_vm1, %v5892_v11  ;;  %3834 = vmatprep.subr.bf16.mxu1 %v5923_v23  ;;  %v5931_v46 = vld [vmem:[#allocation9 + $0x150] ss:$24 sps:$4 sm:$0xff]   ;;  %v5939_v47 = vld [vmem:[#allocation9 + $0x184] ss:$24 sps:$4 sm:$0xff]   ;;  %v5958_v48 = vld [vmem:[#allocation9 + $0x780] ss:$24 sps:$4 sm:$0xff]  }
  0x97   : > { %427 = vmatprep.mubr.bf16.mxu0 %v6817_v0  ;;  %3703 = vmatpush1.bf16.msra.mxu0 %v5896_v13  ;;  %v5937_v49 = vld [vmem:[#allocation9 + $0x180] ss:$24 sps:$4 sm:$0xff]   ;;  %v5945_v50 = vld [vmem:[#allocation9 + $0x1b4] ss:$24 sps:$4 sm:$0xff]   ;;  %v5943_v51 = vld [vmem:[#allocation9 + $0x1b0] ss:$24 sps:$4 sm:$0xff]  }
  0x98   : > { %3704 = vmatprep.subr.bf16.mxu0 %v5901_v14  ;;  %v5951_v52 = vld [vmem:[#allocation9 + $0x1e4] ss:$24 sps:$4 sm:$0xff]   ;;  %v5949_v53 = vld [vmem:[#allocation9 + $0x1e0] ss:$24 sps:$4 sm:$0xff]   ;;  %v5957_v54 = vld [vmem:[#allocation9 + $0x214] ss:$24 sps:$4 sm:$0xff]  }
  0x99   : > { %3835 = vmatpush1.bf16.msra.mxu1 %v5928_v26  ;;  %v5955_v55 = vld [vmem:[#allocation9 + $0x210] ss:$24 sps:$4 sm:$0xff]   ;;  %v5959_v56 = vld [vmem:[#allocation9 + $0x7b4] ss:$24 sps:$4 sm:$0xff]   ;;  %v5963_v57 = vld [vmem:[#allocation9 + $0x244] ss:$24 sps:$4 sm:$0xff]  }
  0x9a   : > { %3836 = vmatprep.subr.bf16.mxu1 %v5929_v27  ;;  %v5964_v58 = vld [vmem:[#allocation9 + $0x7b0] ss:$24 sps:$4 sm:$0xff]   ;;  %v5961_v59 = vld [vmem:[#allocation9 + $0x240] ss:$24 sps:$4 sm:$0xff]   ;;  %v5965_v60 = vld [vmem:[#allocation9 + $0x7e4] ss:$24 sps:$4 sm:$0xff]  }
  0x9b   : > { %3705 = vmatpush1.bf16.msra.mxu0 %v5899_v17  ;;  %v5969_v61 = vld [vmem:[#allocation9 + $0x274] ss:$24 sps:$4 sm:$0xff]   ;;  %v5970_v62 = vld [vmem:[#allocation9 + $0x7e0] ss:$24 sps:$4 sm:$0xff]   ;;  %v5967_v63 = vld [vmem:[#allocation9 + $0x270] ss:$24 sps:$4 sm:$0xff]  }
  0x9c   : > { %3706 = vmatprep.subr.bf16.mxu0 %v5904_v21  ;;  %v5975_v1 = vld [vmem:[#allocation9 + $0x2a4] ss:$24 sps:$4 sm:$0xff]   ;;  %v5976_v2 = vld [vmem:[#allocation9 + $0x810] ss:$24 sps:$4 sm:$0xff]   ;;  %v5973_v3 = vld [vmem:[#allocation9 + $0x2a0] ss:$24 sps:$4 sm:$0xff]  }
  0x9d   : > { %3837 = vmatpush1.bf16.msra.mxu1 %v5934_v31  ;;  %v5977_v4 = vld [vmem:[#allocation9 + $0x844] ss:$24 sps:$4 sm:$0xff]   ;;  %v5981_v5 = vld [vmem:[#allocation9 + $0x2d4] ss:$24 sps:$4 sm:$0xff]   ;;  %v5982_v6 = vld [vmem:[#allocation9 + $0x840] ss:$24 sps:$4 sm:$0xff]  }
  0x9e   : > { %5088 = vmatmul.mubr.msk.bf16.gmra.mrb[4].mxu0 %vm365_vm1, %v5893_v20  ;;  %3838 = vmatprep.subr.bf16.mxu1 %v5935_v32  ;;  %v5979_v7 = vld [vmem:[#allocation9 + $0x2d0] ss:$24 sps:$4 sm:$0xff]   ;;  %v5983_v8 = vld [vmem:[#allocation9 + $0x874] ss:$24 sps:$4 sm:$0xff]   ;;  %v5987_v9 = vld [vmem:[#allocation9 + $0x304] ss:$24 sps:$4 sm:$0xff]  }
  0x9f   : > { %437 = vmatprep.mubr.bf16.mxu0 %v6817_v0  ;;  %3707 = vmatpush1.bf16.msra.mxu0 %v5902_v24  ;;  %v5988_v10 = vld [vmem:[#allocation9 + $0x870] ss:$24 sps:$4 sm:$0xff]   ;;  %v5989_v11 = vld [vmem:[#allocation9 + $0x8a4] ss:$24 sps:$4 sm:$0xff]   ;;  %v5994_v12 = vld [vmem:[#allocation9 + $0x8a0] ss:$24 sps:$4 sm:$0xff]  }
  0xa0   : > { %3708 = vmatprep.subr.bf16.mxu0 %v5909_v25  ;;  %v5995_v13 = vld [vmem:[#allocation9 + $0x8d4] ss:$24 sps:$4 sm:$0xff]   ;;  %v6000_v14 = vld [vmem:[#allocation9 + $0x8d0] ss:$24 sps:$4 sm:$0xff]   ;;  %v6003_v15 = vld [vmem:[#allocation9 + $0x904] ss:$24 sps:$4 sm:$0xff]  }
  0xa1   : > { %3839 = vmatpush1.bf16.msra.mxu1 %v5940_v35  ;;  %v7035_v17 = vshrl.u32 %v297_v16, 7  ;;  %vm630_vm4 = vsmask.f32 6400  ;;  %s7357_s15 = scalar_lea.vmem [#allocation12], %s7339_s14  ;;  %s5792_s16 = smul.u32 2304, %s6872_s22 }
  0xa2   : > { %3840 = vmatprep.subr.bf16.mxu1 %v5941_v36  ;;  %s4957_s17 = sshll.u32 %s7357_s15, 4  ;;  %s7484_s22 = scalar_lea.sflag [#allocation6], %s270_s13  ;;  %s7473_s17 = int_to_ptr.vmem [resolvable:$true] %s4957_s17 }
  0xa3   : > { %3709 = vmatpush1.bf16.msra.mxu0 %v5907_v28  ;;  %v7038_v19 = vsub.s32 0, %v7035_v17  ;;  %v7041_v20 = vsub.s32 1, %v7035_v17  ;;  %s7479_s7 = scalar_lea.hbm %s7530_s5, %s5792_s16  ;;  %s6733_s11 = scalar_lea.vmem %s7473_s17, 2304 }
  0xa4   : > { %3710 = vmatprep.subr.bf16.mxu0 %v5915_v30  ;;  %p6734_p2 = scmp.ne.s32.totalorder %s7473_s17, %s6733_s11  ;;  %p7548_p3 = scmp.ne.s32.totalorder %s7535_s28, 0 }
  0xa5   : > { %3841 = vmatpush1.bf16.msra.mxu1 %v5946_v41  ;;  %v7044_v21 = vrot.slane %v295_v18, %v7038_v19  ;;  %v7047_v22 = vrot.slane %v295_v18, %v7041_v20  ;;  %v5993_v41 = vld [vmem:[#allocation9 + $0x334] ss:$24 sps:$4 sm:$0xff]   ;;  %v6012_v18 = vld [vmem:[#allocation9 + $0x3c4] ss:$24 sps:$4 sm:$0xff]   ;;  %s6818_s12 = smov [#allocation12]  }
  0xa6   : > { %5089 = vmatmul.mubr.msk.bf16.gmra.mrb[8].mxu0 %vm365_vm1, %v5894_v29  ;;  %3842 = vmatprep.subr.bf16.mxu1 %v5947_v42  ;;  %p6735_p4 = pnand %p6734_p2, %p7548_p3  ;;  %s6737_s9 = sshll.u32 %s6818_s12, 4  ;;  %s6738_s9 = int_to_ptr.vmem [resolvable:$false] %s6737_s9 }
  0xa7   : > { %447 = vmatprep.mubr.bf16.mxu0 %v6817_v0  ;;  %3711 = vmatpush1.bf16.msra.mxu0 %v5913_v33  ;;  %v5971_v0 = vld [vmem:[#allocation9 + $0x814] ss:$24 sps:$4 sm:$0xff]   ;;  %s6739_s6 = scalar_lea.vmem %s6738_s9, 4608  ;;  %p6740_p8 = scmp.lt.s32.totalorder %s7473_s17, %s6738_s9 }
  0xa8   : > { %3712 = vmatprep.subr.bf16.mxu0 %v5921_v34  ;;  %p6736_p7 = pneg %p6735_p4  ;;  %p6741_p11 = scmp.lt.s32.totalorder %s6739_s6, %s6733_s11 }
  0xa9   : > { %3843 = vmatpush1.bf16.msra.mxu1 %v5952_v44 }
  0xaa   : > { %3844 = vmatprep.subr.bf16.mxu1 %v5953_v45  ;;  %p6742_p13 = por %p6741_p11, %p6740_p8 }
  0xab   : > { %3713 = vmatpush1.bf16.msra.mxu0 %v5919_v37 }
  0xac   : > { %3714 = vmatprep.subr.bf16.mxu0 %v5927_v39  ;;  %p6743_p1 = pnand %p6742_p13, %p6736_p7 }
  0xad   : > { %3845 = vmatpush1.bf16.msra.mxu1 %v5958_v48 }
  0xae   : > { %5090 = vmatmul.mubr.msk.bf16.gmra.mrb[12].mxu0 %vm365_vm1, %v5895_v38  ;;  %3846 = vmatprep.subr.bf16.mxu1 %v5959_v56  ;;  %v5985_v38 = vld [vmem:[#allocation9 + $0x300] ss:$24 sps:$4 sm:$0xff]  }
  0xaf   : > { %3715 = vmatpush1.bf16.msra.mxu0 %v5925_v40 }
  0xb0   : > { %3716 = vmatprep.subr.bf16.mxu0 %v5933_v43 }
  0xb1   : > { %3847 = vmatpush1.bf16.msra.mxu1 %v5964_v58 }
  0xb2   : > { %3848 = vmatprep.subr.bf16.mxu1 %v5965_v60 }
  0xb3   : > { %3717 = vmatpush1.bf16.msra.mxu0 %v5931_v46 }
  0xb4   : > { %3718 = vmatprep.subr.bf16.mxu0 %v5939_v47  ;;  %v5991_v47 = vld [vmem:[#allocation9 + $0x330] ss:$24 sps:$4 sm:$0xff]  }
  0xb5   : > { %3849 = vmatpush1.bf16.msra.mxu1 %v5970_v62 }
  0xb6   : > { %3850 = vmatprep.subr.bf16.mxu1 %v5971_v0 }
  0xb7   : > { %3719 = vmatpush1.bf16.msra.mxu0 %v5937_v49 }
  0xb8   : > { %3720 = vmatprep.subr.bf16.mxu0 %v5945_v50  ;;  %v5999_v50 = vld [vmem:[#allocation9 + $0x364] ss:$24 sps:$4 sm:$0xff]  }
  0xb9   : > { %3851 = vmatpush1.bf16.msra.mxu1 %v5976_v2 }
  0xba   : > { %3852 = vmatprep.subr.bf16.mxu1 %v5977_v4 }
  0xbb   : > { %3721 = vmatpush1.bf16.msra.mxu0 %v5943_v51 }
  0xbc   : > { %3722 = vmatprep.subr.bf16.mxu0 %v5951_v52 }
  0xbd   : > { %3853 = vmatpush1.bf16.msra.mxu1 %v5982_v6 }
  0xbe   : > { %3854 = vmatprep.subr.bf16.mxu1 %v5983_v8  ;;  %v6001_v8 = vld [vmem:[#allocation9 + $0x900] ss:$24 sps:$4 sm:$0xff]  }
  0xbf   : > { %3723 = vmatpush1.bf16.msra.mxu0 %v5949_v53 }
  0xc0   : > { %3724 = vmatprep.subr.bf16.mxu0 %v5957_v54  ;;  %v5997_v54 = vld [vmem:[#allocation9 + $0x360] ss:$24 sps:$4 sm:$0xff]  }
  0xc1   : > { %3855 = vmatpush1.bf16.msra.mxu1 %v5988_v10 }
  0xc2   : > { %3856 = vmatprep.subr.bf16.mxu1 %v5989_v11 }
  0xc3   : > { %3725 = vmatpush1.bf16.msra.mxu0 %v5955_v55 }
  0xc4   : > { %3726 = vmatprep.subr.bf16.mxu0 %v5963_v57  ;;  %v6006_v57 = vld [vmem:[#allocation9 + $0x394] ss:$24 sps:$4 sm:$0xff]  }
  0xc5   : > { %3857 = vmatpush1.bf16.msra.mxu1 %v5994_v12 }
  0xc6   : > { %3858 = vmatprep.subr.bf16.mxu1 %v5995_v13  ;;  %v6004_v13 = vld [vmem:[#allocation9 + $0x390] ss:$24 sps:$4 sm:$0xff]  }
  0xc7   : > { %3727 = vmatpush1.bf16.msra.mxu0 %v5961_v59 }
  0xc8   : > { %3728 = vmatprep.subr.bf16.mxu0 %v5969_v61 }
  0xc9   : > { %3859 = vmatpush1.bf16.msra.mxu1 %v6000_v14  ;;  %v6009_v14 = vld [vmem:[#allocation9 + $0x934] ss:$24 sps:$4 sm:$0xff]  }
  0xca   : > { %3891 = vmatprep.subr.bf16.mxu1 %v6003_v15 }
  0xcb   : > { %3729 = vmatpush1.bf16.msra.mxu0 %v5967_v63 }
  0xcc   : > { %3730 = vmatprep.subr.bf16.mxu0 %v5975_v1 }
  0xcf   : > { %3731 = vmatpush1.bf16.msra.mxu0 %v5973_v3 }
  0xd0   : > { %3732 = vmatprep.subr.bf16.mxu0 %v5981_v5 }
  0xd3   : > { %3733 = vmatpush1.bf16.msra.mxu0 %v5979_v7 }
  0xd4   : > { %3765 = vmatprep.subr.bf16.mxu0 %v5987_v9 }
 0x169   : > { %v419_v23 = vpop.f32.mrb[0].mxu0 }
 0x16a   : > { %v420_v24 = vadd.f32 %v419_v23, %v7044_v21  ;;  %v421_v25 = vpop.f32.mrb[1].mxu0 }
 0x16b   : > { %v422_v26 = vadd.f32 %v421_v25, %v7047_v22  ;;  %v423_v27 = vpop.f32.mrb[2].mxu0 }
 0x16c   : > { %v424_v28 = vadd.f32 %v423_v27, %v7044_v21  ;;  %v425_v29 = vpop.f32.mrb[3].mxu0  ;;  %v458_v31 = vmax.f32 %v420_v24, 0.0 }
 0x16d   : > { %v426_v30 = vadd.f32 %v425_v29, %v7047_v22  ;;  %v459_v33 = vmax.f32 %v422_v26, 0.0  ;;  %v6007_v26 = vld [vmem:[#allocation9 + $0x930] ss:$24 sps:$4 sm:$0xff]  }
 0x16e   : > { %v460_v32 = vmax.f32 %v424_v28, 0.0 }
 0x16f   : > { %v461_v34 = vmax.f32 %v426_v30, 0.0 }
 0x170   : > { %v7053_v35 = vpack.c.bf16 %v460_v32, %v458_v31  ;;  %v6010_v31 = vld [vmem:[#allocation9 + $0x3c0] ss:$24 sps:$4 sm:$0xff]  }
 0x171   : > { %v7055_v36 = vpack.c.bf16 %v461_v34, %v459_v33  ;;  %v429_v37 = vpop.f32.mrb[4].mxu0 }
 0x172   : > { %482 = vst [vmem:[#allocation2] sm:$0xff] %v7053_v35  ;;  %v430_v39 = vadd.f32 %v429_v37, %v7044_v21  ;;  %v431_v40 = vpop.f32.mrb[5].mxu0  ;;  %v6015_v37 = vld [vmem:[#allocation9 + $0x964] ss:$24 sps:$4 sm:$0xff]  }
 0x173   : > { %483 = vst [vmem:[#allocation2 + $0x8] sm:$0xff] %v7055_v36  ;;  %v432_v42 = vadd.f32 %v431_v40, %v7047_v22  ;;  %v433_v43 = vpop.f32.mrb[6].mxu0  ;;  %3734 = vmatprep.mubr.bf16.mxu0 %v7055_v36  ;;  %v526_v0 = vshll.u32 %v7055_v36, 16  ;;  %v524_v27 = vshrl.u32 %v7055_v36, 16 }
 0x174   : > { %v434_v44 = vadd.f32 %v433_v43, %v7044_v21  ;;  %v435_v45 = vpop.f32.mrb[7].mxu0  ;;  %3735 = vmatmul.mubr.bf16.vlgmr.msra.gmra.mrb[16].mxu0 %v7053_v35  ;;  %v462_v48 = vmax.f32 %v430_v39, 0.0 }
 0x175   : > { %v436_v46 = vadd.f32 %v435_v45, %v7047_v22  ;;  %3766 = vmatpush1.bf16.msra.mxu0 %v5985_v38  ;;  %v463_v51 = vmax.f32 %v432_v42, 0.0  ;;  %v528_v23 = vrot.slane %v526_v0, 1  ;;  %v6018_v42 = vld [vmem:[#allocation9 + $0x3f4] ss:$24 sps:$4 sm:$0xff]  }
 0x176   : > { %v464_v49 = vmax.f32 %v434_v44, 0.0  ;;  %3767 = vmatprep.subr.bf16.mxu0 %v5993_v41  ;;  %v6030_v0 = vld [vmem:[#allocation9 + $0x454] ss:$24 sps:$4 sm:$0xff]  }
 0x177   : > { %v465_v52 = vmax.f32 %v436_v46, 0.0  ;;  %v529_v34 = vor.u32 %v528_v23, %v524_v27 }
 0x178   : > { %v7065_v53 = vpack.c.bf16 %v464_v49, %v462_v48 }
 0x179   : > { %v7067_v55 = vpack.c.bf16 %v465_v52, %v463_v51  ;;  %v439_v56 = vpop.f32.mrb[8].mxu0  ;;  %3768 = vmatpush1.bf16.msra.mxu0 %v5991_v47  ;;  %v579_v58 = vld [vmem:[#allocation2] sm:$0xfe]  ;;  %v6021_v51 = vld [vmem:[#allocation9 + $0x994] ss:$24 sps:$4 sm:$0xff]  }
 0x17a   : > { %484 = vst [vmem:[#allocation2 + $0x10] sm:$0xff] %v7065_v53  ;;  %v440_v59 = vadd.f32 %v439_v56, %v7044_v21  ;;  %v441_v60 = vpop.f32.mrb[9].mxu0  ;;  %3769 = vmatprep.subr.bf16.mxu0 %v5999_v50  ;;  %v580_v61 = vld [vmem:[#allocation2 + $0x8] sm:$0xfe]  ;;  %v596_v62 = vrot.slane %v579_v58, 1  ;;  %v597_v63 = vrot.slane %v7065_v53, 1 }
 0x17b   : > { %485 = vst [vmem:[#allocation2 + $0x18] sm:$0xff] %v7067_v55  ;;  %v442_v1 = vadd.f32 %v441_v60, %v7047_v22  ;;  %v443_v2 = vpop.f32.mrb[10].mxu0  ;;  %3744 = vmatprep.mubr.bf16.mxu0 %v7067_v55  ;;  %v599_v3 = vrot.slane %v580_v61, 1  ;;  %v600_v4 = vrot.slane %v7067_v55, 1  ;;  %v531_v9 = vshll.u32 %v7067_v55, 16 }
 0x17c   : > { %v466_v5 = vmax.f32 %v440_v59, 0.0  ;;  %v444_v6 = vadd.f32 %v443_v2, %v7044_v21  ;;  %v445_v7 = vpop.f32.mrb[11].mxu0  ;;  %3745 = vmatmul.mubr.bf16.gmra.mrb[20].mxu0 %v7065_v53  ;;  %v7088_v16 = vsel %vm595_vm2, %v596_v62, %v597_v63  ;;  %v6013_v47 = vld [vmem:[#allocation9 + $0x960] ss:$24 sps:$4 sm:$0xff]   ;;  %v6019_v58 = vld [vmem:[#allocation9 + $0x990] ss:$24 sps:$4 sm:$0xff]  }
 0x17d   : > { %v467_v10 = vmax.f32 %v442_v1, 0.0  ;;  %v446_v11 = vadd.f32 %v445_v7, %v7047_v22  ;;  %3770 = vmatpush1.bf16.msra.mxu0 %v5997_v54  ;;  %v7082_v12 = vsel %vm595_vm2, %v599_v3, %v600_v4  ;;  %v7096_v28 = vrot.slane %v531_v9, 1  ;;  %v6024_v54 = vld [vmem:[#allocation9 + $0x424] ss:$24 sps:$4 sm:$0xff]   ;;  %v6022_v61 = vld [vmem:[#allocation9 + $0x420] ss:$24 sps:$4 sm:$0xff]  }
 0x17e   : > { %v468_v15 = vmax.f32 %v444_v6, 0.0  ;;  %3860 = vmatprep.mubr.bf16.mxu1 %v7082_v12  ;;  %3771 = vmatprep.subr.bf16.mxu0 %v6006_v57  ;;  %v623_v59 = vld [vmem:[#allocation2 + $0x8] sm:$0xfe]  ;;  %v657_v2 = vshrl.u32 %v7067_v55, 16  ;;  %v6025_v3 = vld [vmem:[#allocation9 + $0x9c0] ss:$24 sps:$4 sm:$0xff]  }
 0x17f   : > { %v469_v24 = vmax.f32 %v446_v11, 0.0  ;;  %3861 = vmatmul.mubr.bf16.vlgmr.msra.gmra.mrb[0].mxu1 %v7088_v16  ;;  %v7111_v46 = vsel %vm510_vm3, %v529_v34, %v7096_v28  ;;  %v6027_v62 = vld [vmem:[#allocation9 + $0x9c4] ss:$24 sps:$4 sm:$0xff]   ;;  %v652_v1 = vshll.u32 %v623_v59, 16  ;;  %v662_v11 = vrot.slane %v531_v9, 2 }
 0x180   : > { %v7091_v25 = vpack.c.bf16 %v468_v15, %v466_v5  ;;  %3892 = vmatpush1.bf16.msra.mxu1 %v6001_v8  ;;  %v6033_v5 = vld [vmem:[#allocation9 + $0x9f4] ss:$24 sps:$4 sm:$0xff]   ;;  %v6036_v6 = vld [vmem:[#allocation9 + $0x484] ss:$24 sps:$4 sm:$0xff]   ;;  %v6034_v15 = vld [vmem:[#allocation9 + $0x480] ss:$24 sps:$4 sm:$0xff]  }
 0x181   : > { %v7098_v29 = vpack.c.bf16 %v469_v24, %v467_v10  ;;  %v449_v30 = vpop.f32.mrb[12].mxu0  ;;  %3772 = vmatpush1.bf16.msra.mxu0 %v6004_v13  ;;  %3893 = vmatprep.subr.bf16.mxu1 %v6009_v14  ;;  %v654_v8 = vrot.slane %v652_v1, 2  ;;  %v659_v10 = vrot.slane %v657_v2, 1  ;;  %v6031_v13 = vld [vmem:[#allocation9 + $0x9f0] ss:$24 sps:$4 sm:$0xff]  }
 0x182   : > { %486 = vst [vmem:[#allocation2 + $0x20] sm:$0xff] %v7091_v25  ;;  %v450_v32 = vadd.f32 %v449_v30, %v7044_v21  ;;  %v451_v33 = vpop.f32.mrb[13].mxu0  ;;  %3773 = vmatprep.subr.bf16.mxu0 %v6012_v18  ;;  %v602_v38 = vrot.slane %v7091_v25, 1  ;;  %v6039_v18 = vld [vmem:[#allocation9 + $0xa24] ss:$24 sps:$4 sm:$0xff]  }
 0x183   : > { %487 = vst [vmem:[#allocation2 + $0x28] sm:$0xff] %v7098_v29  ;;  %v452_v39 = vadd.f32 %v451_v33, %v7047_v22  ;;  %v453_v40 = vpop.f32.mrb[14].mxu0  ;;  %3754 = vmatprep.mubr.bf16.mxu0 %v7098_v29  ;;  %v604_v41 = vrot.slane %v7098_v29, 1  ;;  %v6037_v9 = vld [vmem:[#allocation9 + $0xa20] ss:$24 sps:$4 sm:$0xff]  }
 0x184   : > { %v470_v43 = vmax.f32 %v450_v32, 0.0  ;;  %v454_v44 = vadd.f32 %v453_v40, %v7044_v21  ;;  %v455_v45 = vpop.f32.mrb[15].mxu0  ;;  %3894 = vmatpush1.bf16.msra.mxu1 %v6007_v26  ;;  %3755 = vmatmul.mubr.bf16.gmra.mrb[24].mxu0 %v7091_v25  ;;  %v6016_v21 = vld [vmem:[#allocation9 + $0x3f0] ss:$24 sps:$4 sm:$0xff]   ;;  %v6042_v26 = vld [vmem:[#allocation9 + $0x4b4] ss:$24 sps:$4 sm:$0xff]  }
 0x185   : > { %v471_v48 = vmax.f32 %v452_v39, 0.0  ;;  %v456_v49 = vadd.f32 %v455_v45, %v7047_v22  ;;  %3774 = vmatpush1.bf16.msra.mxu0 %v6010_v31  ;;  %3797 = vmatprep.mubr.bf16.mxu0 %v7111_v46  ;;  %v7118_v50 = vsel %vm595_vm2, %v600_v4, %v604_v41  ;;  %v7126_v22 = vsel %vm595_vm2, %v597_v63, %v602_v38  ;;  %v6028_v4 = vld [vmem:[#allocation9 + $0x450] ss:$24 sps:$4 sm:$0xff]   ;;  %v6048_v39 = vld [vmem:[#allocation9 + $0x4e4] ss:$24 sps:$4 sm:$0xff]  }
 0x186   : > { %v472_v52 = vmax.f32 %v454_v44, 0.0  ;;  %3870 = vmatprep.mubr.bf16.mxu1 %v7118_v50  ;;  %3895 = vmatprep.subr.bf16.mxu1 %v6015_v37  ;;  %v649_v63 = vshrl.u32 %v623_v59, 16  ;;  %v7134_v31 = vor.u32 %v662_v11, %v659_v10  ;;  %v6040_v34 = vld [vmem:[#allocation9 + $0x4b0] ss:$24 sps:$4 sm:$0xff]   ;;  %v6045_v37 = vld [vmem:[#allocation9 + $0xa54] ss:$24 sps:$4 sm:$0xff]  }
 0x187   : > { %v473_v56 = vmax.f32 %v456_v49, 0.0  ;;  %3775 = vmatprep.subr.bf16.mxu0 %v6018_v42  ;;  %3871 = vmatmul.mubr.bf16.gmra.mrb[4].mxu1 %v7126_v22  ;;  %v6043_v40 = vld [vmem:[#allocation9 + $0xa50] ss:$24 sps:$4 sm:$0xff]   ;;  %v6051_v42 = vld [vmem:[#allocation9 + $0xa84] ss:$24 sps:$4 sm:$0xff]   ;;  %v512_v10 = vshrl.u32 %v7053_v35, 16 }
 0x188   : > { %v480_v57 = vpack.c.bf16 %v472_v52, %v470_v43  ;;  %3896 = vmatpush1.bf16.msra.mxu1 %v6013_v47  ;;  %v651_v7 = vrot.slane %v649_v63, 1  ;;  %v6054_v43 = vld [vmem:[#allocation9 + $0x514] ss:$24 sps:$4 sm:$0xff]   ;;  %v6049_v44 = vld [vmem:[#allocation9 + $0xa80] ss:$24 sps:$4 sm:$0xff]   ;;  %v519_v63 = vshll.u32 %v7065_v53, 16 }
 0x189   : > { %v481_v60 = vpack.c.bf16 %v473_v56, %v471_v48  ;;  %3776 = vmatpush1.bf16.msra.mxu0 %v6016_v21  ;;  %3897 = vmatprep.subr.bf16.mxu1 %v6021_v51  ;;  %v6052_v45 = vld [vmem:[#allocation9 + $0x510] ss:$24 sps:$4 sm:$0xff]   ;;  %v6057_v47 = vld [vmem:[#allocation9 + $0xab4] ss:$24 sps:$4 sm:$0xff]   ;;  %v6060_v48 = vld [vmem:[#allocation9 + $0x544] ss:$24 sps:$4 sm:$0xff]  }
 0x18a   : > { %488 = vst [vmem:[#allocation2 + $0x30] sm:$0xff] %v480_v57  ;;  %3777 = vmatprep.subr.bf16.mxu0 %v6024_v54  ;;  %v655_v30 = vor.u32 %v654_v8, %v651_v7  ;;  %v6055_v49 = vld [vmem:[#allocation9 + $0xab0] ss:$24 sps:$4 sm:$0xff]   ;;  %v6058_v21 = vld [vmem:[#allocation9 + $0x540] ss:$24 sps:$4 sm:$0xff]   ;;  %v521_v11 = vrot.slane %v519_v63, 1 }
 0x18b   : > { %489 = vst [vmem:[#allocation2 + $0x38] sm:$0xff] %v481_v60  ;;  %v6063_v51 = vld [vmem:[#allocation9 + $0xae4] ss:$24 sps:$4 sm:$0xff]   ;;  %v6066_v52 = vld [vmem:[#allocation9 + $0x574] ss:$24 sps:$4 sm:$0xff]  }
 0x18c   : > { %3898 = vmatpush1.bf16.msra.mxu1 %v6019_v58  ;;  %v6061_v54 = vld [vmem:[#allocation9 + $0xae0] ss:$24 sps:$4 sm:$0xff]   ;;  %v6064_v56 = vld [vmem:[#allocation9 + $0x570] ss:$24 sps:$4 sm:$0xff]   ;;  %v6069_v57 = vld [vmem:[#allocation9 + $0xb14] ss:$24 sps:$4 sm:$0xff]  }
 0x18d   : > { %3778 = vmatpush1.bf16.msra.mxu0 %v6022_v61  ;;  %3899 = vmatprep.subr.bf16.mxu1 %v6027_v62  ;;  %v6072_v58 = vld [vmem:[#allocation9 + $0x5a4] ss:$24 sps:$4 sm:$0xff]   ;;  %v6067_v59 = vld [vmem:[#allocation9 + $0xb10] ss:$24 sps:$4 sm:$0xff]   ;;  %v6070_v60 = vld [vmem:[#allocation9 + $0x5a0] ss:$24 sps:$4 sm:$0xff]  }
 0x18e   : > { %3779 = vmatprep.subr.bf16.mxu0 %v6030_v0  ;;  %v6075_v61 = vld [vmem:[#allocation9 + $0xb44] ss:$24 sps:$4 sm:$0xff]   ;;  %v514_v62 = vshll.u32 %v7053_v35, 16  ;;  %v6078_v0 = vld [vmem:[#allocation9 + $0x5d4] ss:$24 sps:$4 sm:$0xff]  }
 0x18f   : > { %v6073_v1 = vld [vmem:[#allocation9 + $0xb40] ss:$24 sps:$4 sm:$0xff]   ;;  %v6084_v7 = vld [vmem:[#allocation9 + $0xc] ss:$24 sps:$4 sm:$0xff]  }
 0x190   : > { %3900 = vmatpush1.bf16.msra.mxu1 %v6025_v3  ;;  %v547_v3 = vshll.u32 %v7098_v29, 16  ;;  %v622_v8 = vld [vmem:[#allocation2] sm:$0xfe] }
 0x191   : > { %v585_v14 = vld [vmem:[#allocation2 + $0x30] sm:$0x1]  ;;  %3780 = vmatpush1.bf16.msra.mxu0 %v6028_v4  ;;  %3901 = vmatprep.subr.bf16.mxu1 %v6033_v5  ;;  %v6076_v4 = vld [vmem:[#allocation9 + $0x5d0] ss:$24 sps:$4 sm:$0xff]  }
 0x192   : > { %v586_v23 = vld [vmem:[#allocation2 + $0x38] sm:$0x1]  ;;  %v606_v24 = vrot.slane %v585_v14, 1  ;;  %3781 = vmatprep.subr.bf16.mxu0 %v6036_v6  ;;  %v516_v6 = vrot.slane %v514_v62, 1  ;;  %v6082_v14 = vld [vmem:[#allocation9 + $0x8] ss:$24 sps:$4 sm:$0xff]  }
 0x193   : > { %v608_v27 = vrot.slane %v586_v23, 1  ;;  %v6081_v5 = vld [vmem:[#allocation9 + $0xb74] ss:$24 sps:$4 sm:$0xff]   ;;  %v6087_v23 = vld [vmem:[#allocation9 + $0xba4] ss:$24 sps:$4 sm:$0xff]  }
 0x194   : > { %v7139_v32 = vsel %vm595_vm2, %v602_v38, %v606_v24  ;;  %3902 = vmatpush1.bf16.msra.mxu1 %v6031_v13  ;;  %v7150_v38 = vsel %vm630_vm4, %v655_v30, %v7134_v31  ;;  %v6079_v13 = vld [vmem:[#allocation9 + $0xb70] ss:$24 sps:$4 sm:$0xff]   ;;  %v509_v24 = vld [vmem:[#allocation2 + $0x38] sm:$0x1] }
 0x195   : > { %v7144_v33 = vsel %vm595_vm2, %v604_v41, %v608_v27  ;;  %3782 = vmatpush1.bf16.msra.mxu0 %v6034_v15  ;;  %3903 = vmatprep.subr.bf16.mxu1 %v6039_v18  ;;  %v6046_v41 = vld [vmem:[#allocation9 + $0x4e0] ss:$24 sps:$4 sm:$0xff]   ;;  %v549_v15 = vrot.slane %v547_v3, 1  ;;  %v517_v18 = vor.u32 %v516_v6, %v512_v10  ;;  %v545_v27 = vor.u32 %v657_v2, %v7096_v28  ;;  %v6090_v30 = vld [vmem:[#allocation9 + $0x3c] ss:$24 sps:$4 sm:$0xff]  }
 0x196   : > { %3880 = vmatprep.mubr.bf16.mxu1 %v7144_v33  ;;  %3783 = vmatprep.subr.bf16.mxu0 %v6042_v26  ;;  %v632_v26 = vshrl.u32 %v622_v8, 16  ;;  %v6088_v28 = vld [vmem:[#allocation9 + $0x38] ss:$24 sps:$4 sm:$0xff]   ;;  %v6093_v2 = vld [vmem:[#allocation9 + $0xbd4] ss:$24 sps:$4 sm:$0xff]  }
 0x197   : > { %3881 = vmatmul.mubr.bf16.gmra.mrb[8].mxu1 %v7139_v32 }
 0x198   : > { %3923 = vmatprep.mubr.bf16.mxu1 %v7150_v38  ;;  %3904 = vmatpush1.bf16.msra.mxu1 %v6037_v9  ;;  %v535_v9 = vshrl.u32 %v7065_v53, 16 }
 0x199   : > { %3784 = vmatpush1.bf16.msra.mxu0 %v6040_v34  ;;  %3905 = vmatprep.subr.bf16.mxu1 %v6045_v37  ;;  %v539_v34 = vshll.u32 %v7091_v25, 16  ;;  %v635_v37 = vshll.u32 %v622_v8, 16 }
 0x19a   : > { %3785 = vmatprep.subr.bf16.mxu0 %v6048_v39  ;;  %v7163_v39 = vsel %vm510_vm3, %v517_v18, %v521_v11 }
 0x19c   : > { %3906 = vmatpush1.bf16.msra.mxu1 %v6043_v40  ;;  %v559_v40 = vshrl.u32 %v7098_v29, 16 }
 0x19d   : > { %3786 = vmatpush1.bf16.msra.mxu0 %v6046_v41  ;;  %3907 = vmatprep.subr.bf16.mxu1 %v6051_v42  ;;  %v7168_v41 = vsel %vm510_vm3, %v545_v27, %v549_v15  ;;  %v6085_v42 = vld [vmem:[#allocation9 + $0xba0] ss:$24 sps:$4 sm:$0xff]  }
 0x19e   : > { %3787 = vmatprep.subr.bf16.mxu0 %v6054_v43  ;;  %v563_v43 = vshll.u32 %v509_v24, 16 }
 0x1a0   : > { %3908 = vmatpush1.bf16.msra.mxu1 %v6049_v44  ;;  %v634_v44 = vrot.slane %v632_v26, 1  ;;  %v671_v26 = vrot.slane %v539_v34, 2 }
 0x1a1   : > { %3788 = vmatpush1.bf16.msra.mxu0 %v6052_v45  ;;  %3909 = vmatprep.subr.bf16.mxu1 %v6057_v47  ;;  %v541_v45 = vrot.slane %v539_v34, 1  ;;  %v6096_v47 = vld [vmem:[#allocation9 + $0x6c] ss:$24 sps:$4 sm:$0xff]  }
 0x1a2   : > { %3789 = vmatprep.subr.bf16.mxu0 %v6060_v48  ;;  %v637_v48 = vrot.slane %v635_v37, 2  ;;  %v6111_v34 = vld [vmem:[#allocation9 + $0xc64] ss:$24 sps:$4 sm:$0xff]  }
 0x1a4   : > { %3910 = vmatpush1.bf16.msra.mxu1 %v6055_v49  ;;  %v642_v49 = vrot.slane %v535_v9, 1 }
 0x1a5   : > { %3790 = vmatpush1.bf16.msra.mxu0 %v6058_v21  ;;  %3911 = vmatprep.subr.bf16.mxu1 %v6063_v51  ;;  %v645_v21 = vrot.slane %v519_v63, 2  ;;  %v6091_v51 = vld [vmem:[#allocation9 + $0xbd0] ss:$24 sps:$4 sm:$0xff]   ;;  %v6102_v63 = vld [vmem:[#allocation9 + $0x9c] ss:$24 sps:$4 sm:$0xff]  }
 0x1a6   : > { %3791 = vmatprep.subr.bf16.mxu0 %v6066_v52  ;;  %v677_v52 = vrot.slane %v559_v40, 1 }
 0x1a8   : > { %3912 = vmatpush1.bf16.msra.mxu1 %v6061_v54  ;;  %v680_v54 = vrot.slane %v547_v3, 2 }
 0x1a9   : > { %3792 = vmatpush1.bf16.msra.mxu0 %v6064_v56  ;;  %3913 = vmatprep.subr.bf16.mxu1 %v6069_v57  ;;  %v537_v56 = vor.u32 %v535_v9, %v521_v11  ;;  %v561_v57 = vor.u32 %v559_v40, %v549_v15  ;;  %v6097_v11 = vld [vmem:[#allocation9 + $0xc00] ss:$24 sps:$4 sm:$0xff]   ;;  %v628_v40 = vld [vmem:[#allocation2 + $0x30] sm:$0x3] }
 0x1aa   : > { %3793 = vmatprep.subr.bf16.mxu0 %v6072_v58  ;;  %v565_v58 = vrot.slane %v563_v43, 1  ;;  %v681_v3 = vor.u32 %v680_v54, %v677_v52  ;;  %v6106_v43 = vld [vmem:[#allocation9 + $0xc8] ss:$24 sps:$4 sm:$0xff]   ;;  %v6120_v52 = vld [vmem:[#allocation9 + $0x12c] ss:$24 sps:$4 sm:$0xff]  }
 0x1ab   : > { %v7172_v62 = vsel %vm510_vm3, %v537_v56, %v541_v45 }
 0x1ac   : > { %3914 = vmatpush1.bf16.msra.mxu1 %v6067_v59  ;;  %v508_v59 = vld [vmem:[#allocation2 + $0x30] sm:$0x1]  ;;  %v7177_v10 = vsel %vm510_vm3, %v561_v57, %v565_v58  ;;  %v7186_v27 = vsel %vm630_vm4, %v7134_v31, %v681_v3  ;;  %v6115_v58 = vld [vmem:[#allocation9 + $0xc90] ss:$24 sps:$4 sm:$0xff]  }
 0x1ad   : > { %3794 = vmatpush1.bf16.msra.mxu0 %v6070_v60  ;;  %3915 = vmatprep.subr.bf16.mxu1 %v6075_v61  ;;  %v629_v60 = vld [vmem:[#allocation2 + $0x38] sm:$0x3]  ;;  %v6094_v61 = vld [vmem:[#allocation9 + $0x68] ss:$24 sps:$4 sm:$0xff]   ;;  %v555_v6 = vshll.u32 %v508_v59, 16 }
 0x1ae   : > { %3795 = vmatprep.subr.bf16.mxu0 %v6078_v0  ;;  %v638_v0 = vor.u32 %v637_v48, %v634_v44  ;;  %v696_v8 = vshll.u32 %v629_v60, 16  ;;  %v684_v44 = vshrl.u32 %v628_v40, 16  ;;  %v6109_v48 = vld [vmem:[#allocation9 + $0xc60] ss:$24 sps:$4 sm:$0xff]   ;;  %v714_v59 = vld [vmem:[#allocation2 + $0x8] sm:$0xfc] }
 0x1b0   : > { %3916 = vmatpush1.bf16.msra.mxu1 %v6073_v1  ;;  %v646_v1 = vor.u32 %v645_v21, %v642_v49  ;;  %v698_v37 = vrot.slane %v696_v8, 2  ;;  %v6112_v49 = vld [vmem:[#allocation9 + $0xf8] ss:$24 sps:$4 sm:$0xff]   ;;  %v6117_v21 = vld [vmem:[#allocation9 + $0xc94] ss:$24 sps:$4 sm:$0xff]   ;;  %v686_v54 = vrot.slane %v684_v44, 1 }
 0x1b1   : > { %3796 = vmatpush1.bf16.msra.mxu0 %v6076_v4  ;;  %3917 = vmatprep.subr.bf16.mxu1 %v6081_v5  ;;  %v6099_v4 = vld [vmem:[#allocation9 + $0xc04] ss:$24 sps:$4 sm:$0xff]   ;;  %v551_v5 = vshrl.u32 %v7091_v25, 16 }
 0x1b2   : > { %4017 = vmatprep.subr.bf16.mxu0 %v6084_v7  ;;  %v693_v7 = vshrl.u32 %v629_v60, 16  ;;  %v7181_v15 = vsel %vm630_vm4, %v638_v0, %v646_v1  ;;  %v6118_v60 = vld [vmem:[#allocation9 + $0x128] ss:$24 sps:$4 sm:$0xff]   ;;  %v6132_v8 = vld [vmem:[#allocation9 + $0x18c] ss:$24 sps:$4 sm:$0xff]  }
 0x1b3   : > { %v553_v18 = vor.u32 %v551_v5, %v541_v45  ;;  %v668_v24 = vrot.slane %v551_v5, 1  ;;  %v687_v45 = vshll.u32 %v628_v40, 16  ;;  %v6121_v5 = vld [vmem:[#allocation9 + $0xcc0] ss:$24 sps:$4 sm:$0xff]   ;;  %v6156_v44 = vld [vmem:[#allocation9 + $0x24c] ss:$24 sps:$4 sm:$0xff]  }
 0x1b4   : > { %3798 = vmatmul.mubr.bf16.vlgmr.msra.gmra.mrb[16].mxu0 %v7163_v39  ;;  %3918 = vmatpush1.bf16.msra.mxu1 %v6079_v13  ;;  %v6100_v13 = vld [vmem:[#allocation9 + $0x98] ss:$24 sps:$4 sm:$0xff]   ;;  %v695_v9 = vrot.slane %v693_v7, 1  ;;  %v6142_v40 = vld [vmem:[#allocation9 + $0x1e8] ss:$24 sps:$4 sm:$0xff]  }
 0x1b5   : > { %3807 = vmatprep.mubr.bf16.mxu0 %v7168_v41  ;;  %4018 = vmatpush1.bf16.msra.mxu0 %v6082_v14  ;;  %v6105_v14 = vld [vmem:[#allocation9 + $0xc34] ss:$24 sps:$4 sm:$0xff]   ;;  %v689_v56 = vrot.slane %v687_v45, 2  ;;  %v6151_v45 = vld [vmem:[#allocation9 + $0xdb0] ss:$24 sps:$4 sm:$0xff]  }
 0x1b6   : > { %3919 = vmatprep.subr.bf16.mxu1 %v6087_v23  ;;  %4019 = vmatprep.subr.bf16.mxu0 %v6090_v30  ;;  %v6108_v23 = vld [vmem:[#allocation9 + $0xcc] ss:$24 sps:$4 sm:$0xff]   ;;  %v557_v30 = vrot.slane %v555_v6, 1 }
 0x1b7   : > { %v690_v0 = vor.u32 %v689_v56, %v686_v54  ;;  %v6129_v6 = vld [vmem:[#allocation9 + $0xcf4] ss:$24 sps:$4 sm:$0xff]  }
 0x1b8   : > { %3920 = vmatpush1.bf16.msra.mxu1 %v6085_v42  ;;  %v6103_v42 = vld [vmem:[#allocation9 + $0xc30] ss:$24 sps:$4 sm:$0xff]   ;;  %v7190_v31 = vsel %vm510_vm3, %v553_v18, %v557_v30  ;;  %v6135_v18 = vld [vmem:[#allocation9 + $0xd24] ss:$24 sps:$4 sm:$0xff]   ;;  %v6141_v30 = vld [vmem:[#allocation9 + $0xd54] ss:$24 sps:$4 sm:$0xff]  }
 0x1b9   : > { %4020 = vmatpush1.bf16.msra.mxu0 %v6088_v28  ;;  %3921 = vmatprep.subr.bf16.mxu1 %v6093_v2  ;;  %v672_v28 = vor.u32 %v671_v26, %v668_v24  ;;  %v6114_v2 = vld [vmem:[#allocation9 + $0xfc] ss:$24 sps:$4 sm:$0xff]   ;;  %v6133_v24 = vld [vmem:[#allocation9 + $0xd20] ss:$24 sps:$4 sm:$0xff]   ;;  %v6168_v56 = vld [vmem:[#allocation9 + $0x2ac] ss:$24 sps:$4 sm:$0xff]  }
 0x1ba   : > { %4021 = vmatprep.subr.bf16.mxu0 %v6096_v47  ;;  %v699_v47 = vor.u32 %v698_v37, %v695_v9  ;;  %v6136_v26 = vld [vmem:[#allocation9 + $0x1b8] ss:$24 sps:$4 sm:$0xff]   ;;  %v6144_v9 = vld [vmem:[#allocation9 + $0x1ec] ss:$24 sps:$4 sm:$0xff]  }
 0x1bb   : > { %v7204_v7 = vsel %vm630_vm4, %v672_v28, %v690_v0  ;;  %v6139_v37 = vld [vmem:[#allocation9 + $0xd50] ss:$24 sps:$4 sm:$0xff]   ;;  %v6165_v54 = vld [vmem:[#allocation9 + $0xe14] ss:$24 sps:$4 sm:$0xff]   ;;  %v6169_v0 = vld [vmem:[#allocation9 + $0xe40] ss:$24 sps:$4 sm:$0xff]  }
 0x1bc   : > { %3808 = vmatmul.mubr.bf16.gmra.mrb[20].mxu0 %v7172_v62  ;;  %3922 = vmatpush1.bf16.msra.mxu1 %v6091_v51  ;;  %v7195_v51 = vsel %vm630_vm4, %v646_v1, %v672_v28  ;;  %v7199_v57 = vsel %vm630_vm4, %v681_v3, %v699_v47  ;;  %v6126_v1 = vld [vmem:[#allocation9 + $0x15c] ss:$24 sps:$4 sm:$0xff]   ;;  %v6124_v3 = vld [vmem:[#allocation9 + $0x158] ss:$24 sps:$4 sm:$0xff]   ;;  %v6154_v47 = vld [vmem:[#allocation9 + $0x248] ss:$24 sps:$4 sm:$0xff]  }
 0x1bd   : > { %3817 = vmatprep.mubr.bf16.mxu0 %v7177_v10  ;;  %4022 = vmatpush1.bf16.msra.mxu0 %v6094_v61  ;;  %v6123_v61 = vld [vmem:[#allocation9 + $0xcc4] ss:$24 sps:$4 sm:$0xff]   ;;  %v6145_v28 = vld [vmem:[#allocation9 + $0xd80] ss:$24 sps:$4 sm:$0xff]  }
 0x1be   : > { %3954 = vmatprep.subr.bf16.mxu1 %v6099_v4  ;;  %4023 = vmatprep.subr.bf16.mxu0 %v6102_v63  ;;  %v733_v4 = vrot.slane %v714_v59, 2  ;;  %v734_v63 = vrot.slane %v7067_v55, 2  ;;  %v6166_v59 = vld [vmem:[#allocation9 + $0x2a8] ss:$24 sps:$4 sm:$0xff]  }
 0x1bf   : > { %3924 = vmatmul.mubr.bf16.vlgmr.msra.gmra.mrb[0].mxu1 %v7181_v15 }
 0x1c0   : > { %3933 = vmatprep.mubr.bf16.mxu1 %v7186_v27  ;;  %3955 = vmatpush1.bf16.msra.mxu1 %v6097_v11  ;;  %v7210_v11 = vsel %vm378_vm0, %v733_v4, %v734_v63  ;;  %v6177_v4 = vld [vmem:[#allocation9 + $0xe74] ss:$24 sps:$4 sm:$0xff]  }
 0x1c1   : > { %4024 = vmatpush1.bf16.msra.mxu0 %v6100_v13  ;;  %3956 = vmatprep.subr.bf16.mxu1 %v6105_v14  ;;  %v6127_v13 = vld [vmem:[#allocation9 + $0xcf0] ss:$24 sps:$4 sm:$0xff]  }
 0x1c2   : > { %4025 = vmatprep.subr.bf16.mxu0 %v6108_v23  ;;  %v6130_v14 = vld [vmem:[#allocation9 + $0x188] ss:$24 sps:$4 sm:$0xff]   ;;  %v6138_v23 = vld [vmem:[#allocation9 + $0x1bc] ss:$24 sps:$4 sm:$0xff]  }
 0x1c4   : > { %3818 = vmatmul.mubr.bf16.gmra.mrb[24].mxu0 %v7190_v31  ;;  %3957 = vmatpush1.bf16.msra.mxu1 %v6103_v42  ;;  %v6147_v42 = vld [vmem:[#allocation9 + $0xd84] ss:$24 sps:$4 sm:$0xff]  }
 0x1c5   : > { %4026 = vmatpush1.bf16.msra.mxu0 %v6106_v43  ;;  %4049 = vmatprep.mubr.bf16.mxu0 %v7055_v36  ;;  %v6150_v43 = vld [vmem:[#allocation9 + $0x21c] ss:$24 sps:$4 sm:$0xff]  }
 0x1c6   : > { %3958 = vmatprep.subr.bf16.mxu1 %v6111_v34  ;;  %4027 = vmatprep.subr.bf16.mxu0 %v6114_v2  ;;  %v6148_v34 = vld [vmem:[#allocation9 + $0x218] ss:$24 sps:$4 sm:$0xff]   ;;  %v6153_v2 = vld [vmem:[#allocation9 + $0xdb4] ss:$24 sps:$4 sm:$0xff]  }
 0x1c7   : > { %3934 = vmatmul.mubr.bf16.gmra.mrb[4].mxu1 %v7195_v51 }
 0x1c8   : > { %3943 = vmatprep.mubr.bf16.mxu1 %v7199_v57  ;;  %3959 = vmatpush1.bf16.msra.mxu1 %v6109_v48  ;;  %v6159_v48 = vld [vmem:[#allocation9 + $0xde4] ss:$24 sps:$4 sm:$0xff]  }
 0x1c9   : > { %4028 = vmatpush1.bf16.msra.mxu0 %v6112_v49  ;;  %3960 = vmatprep.subr.bf16.mxu1 %v6117_v21  ;;  %v6162_v49 = vld [vmem:[#allocation9 + $0x27c] ss:$24 sps:$4 sm:$0xff]   ;;  %v6157_v21 = vld [vmem:[#allocation9 + $0xde0] ss:$24 sps:$4 sm:$0xff]  }
 0x1ca   : > { %4029 = vmatprep.subr.bf16.mxu0 %v6120_v52  ;;  %v6160_v52 = vld [vmem:[#allocation9 + $0x278] ss:$24 sps:$4 sm:$0xff]  }
 0x1cc   : > { %3961 = vmatpush1.bf16.msra.mxu1 %v6115_v58  ;;  %v6163_v58 = vld [vmem:[#allocation9 + $0xe10] ss:$24 sps:$4 sm:$0xff]  }
 0x1cd   : > { %4030 = vmatpush1.bf16.msra.mxu0 %v6118_v60  ;;  %3962 = vmatprep.subr.bf16.mxu1 %v6123_v61  ;;  %v6171_v60 = vld [vmem:[#allocation9 + $0xe44] ss:$24 sps:$4 sm:$0xff]  }
 0x1ce   : > { %4031 = vmatprep.subr.bf16.mxu0 %v6126_v1  ;;  %v6174_v61 = vld [vmem:[#allocation9 + $0x2dc] ss:$24 sps:$4 sm:$0xff]   ;;  %v6172_v1 = vld [vmem:[#allocation9 + $0x2d8] ss:$24 sps:$4 sm:$0xff]  }
 0x1cf   : > { %3944 = vmatmul.mubr.bf16.gmra.mrb[8].mxu1 %v7204_v7 }
 0x1d0   : > { %3963 = vmatpush1.bf16.msra.mxu1 %v6121_v5  ;;  %3986 = vmatprep.mubr.bf16.mxu1 %v7210_v11  ;;  %v6180_v5 = vld [vmem:[#allocation9 + $0x30c] ss:$24 sps:$4 sm:$0xff]  }
 0x1d1   : > { %4032 = vmatpush1.bf16.msra.mxu0 %v6124_v3  ;;  %3964 = vmatprep.subr.bf16.mxu1 %v6129_v6  ;;  %v6175_v3 = vld [vmem:[#allocation9 + $0xe70] ss:$24 sps:$4 sm:$0xff]  }
 0x1d2   : > { %4033 = vmatprep.subr.bf16.mxu0 %v6132_v8  ;;  %v6178_v6 = vld [vmem:[#allocation9 + $0x308] ss:$24 sps:$4 sm:$0xff]   ;;  %v6183_v8 = vld [vmem:[#allocation9 + $0xea4] ss:$24 sps:$4 sm:$0xff]  }
 0x1d4   : > { %3965 = vmatpush1.bf16.msra.mxu1 %v6127_v13  ;;  %v6186_v13 = vld [vmem:[#allocation9 + $0x33c] ss:$24 sps:$4 sm:$0xff]  }
 0x1d5   : > { %4034 = vmatpush1.bf16.msra.mxu0 %v6130_v14  ;;  %3966 = vmatprep.subr.bf16.mxu1 %v6135_v18  ;;  %v6181_v14 = vld [vmem:[#allocation9 + $0xea0] ss:$24 sps:$4 sm:$0xff]  }
 0x1d6   : > { %4035 = vmatprep.subr.bf16.mxu0 %v6138_v23  ;;  %v6184_v18 = vld [vmem:[#allocation9 + $0x338] ss:$24 sps:$4 sm:$0xff]   ;;  %v6189_v23 = vld [vmem:[#allocation9 + $0xed4] ss:$24 sps:$4 sm:$0xff]  }
 0x1d8   : > { %3967 = vmatpush1.bf16.msra.mxu1 %v6133_v24  ;;  %v6192_v24 = vld [vmem:[#allocation9 + $0x36c] ss:$24 sps:$4 sm:$0xff]  }
 0x1d9   : > { %4036 = vmatpush1.bf16.msra.mxu0 %v6136_v26  ;;  %3968 = vmatprep.subr.bf16.mxu1 %v6141_v30  ;;  %v715_v26 = vld [vmem:[#allocation2 + $0x10] sm:$0xff] }
 0x1da   : > { %4037 = vmatprep.subr.bf16.mxu0 %v6144_v9  ;;  %v6187_v30 = vld [vmem:[#allocation9 + $0xed0] ss:$24 sps:$4 sm:$0xff]  }
 0x1db   : > { %v718_v9 = vld [vmem:[#allocation2 + $0x28] sm:$0xff] }
 0x1dc   : > { %3969 = vmatpush1.bf16.msra.mxu1 %v6139_v37  ;;  %v6190_v37 = vld [vmem:[#allocation9 + $0x368] ss:$24 sps:$4 sm:$0xff]  }
 0x1dd   : > { %4038 = vmatpush1.bf16.msra.mxu0 %v6142_v40  ;;  %3970 = vmatprep.subr.bf16.mxu1 %v6147_v42  ;;  %v713_v40 = vld [vmem:[#allocation2] sm:$0xfc]  ;;  %v731_v42 = vrot.slane %v715_v26, 2 }
 0x1de   : > { %4039 = vmatprep.subr.bf16.mxu0 %v6150_v43  ;;  %v6198_v43 = vld [vmem:[#allocation9 + $0x39c] ss:$24 sps:$4 sm:$0xff]   ;;  %v6223_v26 = vld [vmem:[#allocation9 + $0x100] ss:$24 sps:$4 sm:$0xff]  }
 0x1e0   : > { %3971 = vmatpush1.bf16.msra.mxu1 %v6145_v28  ;;  %v738_v28 = vrot.slane %v718_v9, 2  ;;  %v6231_v9 = vld [vmem:[#allocation9 + $0x134] ss:$24 sps:$4 sm:$0xff]  }
 0x1e1   : > { %4040 = vmatpush1.bf16.msra.mxu0 %v6148_v34  ;;  %3972 = vmatprep.subr.bf16.mxu1 %v6153_v2  ;;  %v730_v34 = vrot.slane %v713_v40, 2  ;;  %v6193_v2 = vld [vmem:[#allocation9 + $0x10] ss:$24 sps:$4 sm:$0xff]  }
 0x1e2   : > { %4041 = vmatprep.subr.bf16.mxu0 %v6156_v44  ;;  %v6196_v44 = vld [vmem:[#allocation9 + $0x398] ss:$24 sps:$4 sm:$0xff]  }
 0x1e3   : > { %v6229_v40 = vld [vmem:[#allocation9 + $0x130] ss:$24 sps:$4 sm:$0xff]  }
 0x1e4   : > { %3973 = vmatpush1.bf16.msra.mxu1 %v6151_v45  ;;  %v6201_v45 = vld [vmem:[#allocation9 + $0x44] ss:$24 sps:$4 sm:$0xff]  }
 0x1e5   : > { %4042 = vmatpush1.bf16.msra.mxu0 %v6154_v47  ;;  %3974 = vmatprep.subr.bf16.mxu1 %v6159_v48  ;;  %v7218_v47 = vsel %vm378_vm0, %v730_v34, %v731_v42  ;;  %v6204_v48 = vld [vmem:[#allocation9 + $0x3cc] ss:$24 sps:$4 sm:$0xff]  }
 0x1e6   : > { %4043 = vmatprep.subr.bf16.mxu0 %v6162_v49  ;;  %v7224_v49 = vsel %vm378_vm0, %v734_v63, %v738_v28  ;;  %v6208_v63 = vld [vmem:[#allocation9 + $0x3f8] ss:$24 sps:$4 sm:$0xff]   ;;  %v6243_v34 = vld [vmem:[#allocation9 + $0x194] ss:$24 sps:$4 sm:$0xff]  }
 0x1e8   : > { %3975 = vmatpush1.bf16.msra.mxu1 %v6157_v21  ;;  %v720_v21 = vld [vmem:[#allocation2 + $0x38] sm:$0x3] }
 0x1e9   : > { %4044 = vmatpush1.bf16.msra.mxu0 %v6160_v52  ;;  %3976 = vmatprep.subr.bf16.mxu1 %v6165_v54  ;;  %v6202_v52 = vld [vmem:[#allocation9 + $0x3c8] ss:$24 sps:$4 sm:$0xff]  }
 0x1ea   : > { %4045 = vmatprep.subr.bf16.mxu0 %v6168_v56  ;;  %v6207_v56 = vld [vmem:[#allocation9 + $0x74] ss:$24 sps:$4 sm:$0xff]  }
 0x1ec   : > { %3977 = vmatpush1.bf16.msra.mxu1 %v6163_v58  ;;  %v6210_v58 = vld [vmem:[#allocation9 + $0x3fc] ss:$24 sps:$4 sm:$0xff]  }
 0x1ed   : > { %4046 = vmatpush1.bf16.msra.mxu0 %v6166_v59  ;;  %3978 = vmatprep.subr.bf16.mxu1 %v6171_v60  ;;  %v742_v59 = vrot.slane %v720_v21, 2  ;;  %v6213_v60 = vld [vmem:[#allocation9 + $0xa4] ss:$24 sps:$4 sm:$0xff]   ;;  %v6250_v21 = vld [vmem:[#allocation9 + $0x548] ss:$24 sps:$4 sm:$0xff]  }
 0x1ee   : > { %4047 = vmatprep.subr.bf16.mxu0 %v6174_v61 }
 0x1f0   : > { %3979 = vmatpush1.bf16.msra.mxu1 %v6169_v0  ;;  %v6216_v0 = vld [vmem:[#allocation9 + $0x42c] ss:$24 sps:$4 sm:$0xff]  }
 0x1f1   : > { %4048 = vmatpush1.bf16.msra.mxu0 %v6172_v1  ;;  %3980 = vmatprep.subr.bf16.mxu1 %v6177_v4  ;;  %v7234_v1 = vsel %vm378_vm0, %v738_v28, %v742_v59  ;;  %v719_v4 = vld [vmem:[#allocation2 + $0x30] sm:$0x3]  ;;  %v6235_v28 = vld [vmem:[#allocation9 + $0x160] ss:$24 sps:$4 sm:$0xff]   ;;  %v6261_v59 = vld [vmem:[#allocation9 + $0x224] ss:$24 sps:$4 sm:$0xff]  }
 0x1f2   : > { %4080 = vmatprep.subr.bf16.mxu0 %v6180_v5  ;;  %v6214_v5 = vld [vmem:[#allocation9 + $0x428] ss:$24 sps:$4 sm:$0xff]  }
 0x1f4   : > { %3981 = vmatpush1.bf16.msra.mxu1 %v6175_v3  ;;  %4050 = vmatmul.mubr.bf16.vlgmr.msra.gmra.mrb[28].mxu0 %v7053_v35  ;;  %v6195_v35 = vld [vmem:[#allocation9 + $0x14] ss:$24 sps:$4 sm:$0xff]  }
 0x1f5   : > { %4059 = vmatprep.mubr.bf16.mxu0 %v7067_v55  ;;  %4081 = vmatpush1.bf16.msra.mxu0 %v6178_v6  ;;  %v6205_v55 = vld [vmem:[#allocation9 + $0x70] ss:$24 sps:$4 sm:$0xff]   ;;  %v6219_v3 = vld [vmem:[#allocation9 + $0xd4] ss:$24 sps:$4 sm:$0xff]   ;;  %v740_v6 = vrot.slane %v719_v4, 2 }
 0x1f6   : > { %3982 = vmatprep.subr.bf16.mxu1 %v6183_v8  ;;  %4082 = vmatprep.subr.bf16.mxu0 %v6186_v13  ;;  %v6222_v8 = vld [vmem:[#allocation9 + $0x45c] ss:$24 sps:$4 sm:$0xff]   ;;  %v6217_v13 = vld [vmem:[#allocation9 + $0xd0] ss:$24 sps:$4 sm:$0xff]  }
 0x1f7   : > { %v6270_v4 = vld [vmem:[#allocation9 + $0x5dc] ss:$24 sps:$4 sm:$0xff]  }
 0x1f8   : > { %3983 = vmatpush1.bf16.msra.mxu1 %v6181_v14  ;;  %v6220_v14 = vld [vmem:[#allocation9 + $0x458] ss:$24 sps:$4 sm:$0xff]  }
 0x1f9   : > { %4083 = vmatpush1.bf16.msra.mxu0 %v6184_v18  ;;  %3984 = vmatprep.subr.bf16.mxu1 %v6189_v23  ;;  %v6225_v18 = vld [vmem:[#allocation9 + $0x104] ss:$24 sps:$4 sm:$0xff]  }
 0x1fa   : > { %4084 = vmatprep.subr.bf16.mxu0 %v6192_v24  ;;  %v6228_v24 = vld [vmem:[#allocation9 + $0x48c] ss:$24 sps:$4 sm:$0xff]  }
 0x1fc   : > { %3985 = vmatpush1.bf16.msra.mxu1 %v6187_v30  ;;  %4060 = vmatmul.mubr.bf16.gmra.mrb[32].mxu0 %v7065_v53  ;;  %v717_v53 = vld [vmem:[#allocation2 + $0x20] sm:$0xff] }
 0x1fd   : > { %4069 = vmatprep.mubr.bf16.mxu0 %v7098_v29  ;;  %4085 = vmatpush1.bf16.msra.mxu0 %v6190_v37  ;;  %v6199_v29 = vld [vmem:[#allocation9 + $0x40] ss:$24 sps:$4 sm:$0xff]   ;;  %v736_v54 = vrot.slane %v717_v53, 2  ;;  %v6234_v37 = vld [vmem:[#allocation9 + $0x4bc] ss:$24 sps:$4 sm:$0xff]  }
 0x1fe   : > { %4332 = vmatprep.subr.bf16.mxu1 %v6195_v35  ;;  %4086 = vmatprep.subr.bf16.mxu0 %v6198_v43  ;;  %v6226_v30 = vld [vmem:[#allocation9 + $0x488] ss:$24 sps:$4 sm:$0xff]   ;;  %v6237_v35 = vld [vmem:[#allocation9 + $0x164] ss:$24 sps:$4 sm:$0xff]  }
 0x1ff   : > { %3987 = vmatmul.mubr.bf16.vlgmr.msra.gmra.mrb[0].mxu1 %v7218_v47  ;;  %v7230_v61 = vsel %vm378_vm0, %v731_v42, %v736_v54  ;;  %v7238_v23 = vsel %vm378_vm0, %v736_v54, %v740_v6  ;;  %v6232_v42 = vld [vmem:[#allocation9 + $0x4b8] ss:$24 sps:$4 sm:$0xff]   ;;  %v6240_v43 = vld [vmem:[#allocation9 + $0x4ec] ss:$24 sps:$4 sm:$0xff]   ;;  %v6258_v54 = vld [vmem:[#allocation9 + $0x57c] ss:$24 sps:$4 sm:$0xff]  }
 0x200   : > { %3996 = vmatprep.mubr.bf16.mxu1 %v7224_v49  ;;  %4333 = vmatpush1.bf16.msra.mxu1 %v6193_v2  ;;  %v6246_v2 = vld [vmem:[#allocation9 + $0x51c] ss:$24 sps:$4 sm:$0xff]   ;;  %v6252_v53 = vld [vmem:[#allocation9 + $0x54c] ss:$24 sps:$4 sm:$0xff]  }
 0x201   : > { %4087 = vmatpush1.bf16.msra.mxu0 %v6196_v44  ;;  %4334 = vmatprep.subr.bf16.mxu1 %v6201_v45  ;;  %v6241_v44 = vld [vmem:[#allocation9 + $0x190] ss:$24 sps:$4 sm:$0xff]   ;;  %v6276_v6 = vld [vmem:[#allocation9 + $0x60c] ss:$24 sps:$4 sm:$0xff]  }
 0x202   : > { %4088 = vmatprep.subr.bf16.mxu0 %v6204_v48  ;;  %v6244_v45 = vld [vmem:[#allocation9 + $0x518] ss:$24 sps:$4 sm:$0xff]   ;;  %v6249_v48 = vld [vmem:[#allocation9 + $0x1c4] ss:$24 sps:$4 sm:$0xff]  }
 0x204   : > { %4070 = vmatmul.mubr.bf16.gmra.mrb[36].mxu0 %v7091_v25  ;;  %4335 = vmatpush1.bf16.msra.mxu1 %v6199_v29  ;;  %v6211_v25 = vld [vmem:[#allocation9 + $0xa0] ss:$24 sps:$4 sm:$0xff]  }
 0x205   : > { %4089 = vmatpush1.bf16.msra.mxu0 %v6202_v52  ;;  %4112 = vmatprep.mubr.bf16.mxu0 %v7111_v46  ;;  %v6247_v29 = vld [vmem:[#allocation9 + $0x1c0] ss:$24 sps:$4 sm:$0xff]   ;;  %v6255_v52 = vld [vmem:[#allocation9 + $0x1f4] ss:$24 sps:$4 sm:$0xff]  }
 0x206   : > { %4336 = vmatprep.subr.bf16.mxu1 %v6207_v56  ;;  %4090 = vmatprep.subr.bf16.mxu0 %v6210_v58  ;;  %v6253_v56 = vld [vmem:[#allocation9 + $0x1f0] ss:$24 sps:$4 sm:$0xff]  }
 0x207   : > { %3997 = vmatmul.mubr.bf16.gmra.mrb[4].mxu1 %v7230_v61  ;;  %v6256_v58 = vld [vmem:[#allocation9 + $0x578] ss:$24 sps:$4 sm:$0xff]  }
 0x208   : > { %4006 = vmatprep.mubr.bf16.mxu1 %v7234_v1  ;;  %4337 = vmatpush1.bf16.msra.mxu1 %v6205_v55  ;;  %v6264_v55 = vld [vmem:[#allocation9 + $0x5ac] ss:$24 sps:$4 sm:$0xff]  }
 0x209   : > { %4091 = vmatpush1.bf16.msra.mxu0 %v6208_v63  ;;  %4338 = vmatprep.subr.bf16.mxu1 %v6213_v60  ;;  %v6259_v63 = vld [vmem:[#allocation9 + $0x220] ss:$24 sps:$4 sm:$0xff]  }
 0x20a   : > { %4092 = vmatprep.subr.bf16.mxu0 %v6216_v0  ;;  %v6262_v60 = vld [vmem:[#allocation9 + $0x5a8] ss:$24 sps:$4 sm:$0xff]   ;;  %v6267_v0 = vld [vmem:[#allocation9 + $0x254] ss:$24 sps:$4 sm:$0xff]  }
 0x20c   : > { %4339 = vmatpush1.bf16.msra.mxu1 %v6211_v25  ;;  %v6265_v25 = vld [vmem:[#allocation9 + $0x250] ss:$24 sps:$4 sm:$0xff]  }
 0x20d   : > { %4093 = vmatpush1.bf16.msra.mxu0 %v6214_v5  ;;  %4340 = vmatprep.subr.bf16.mxu1 %v6219_v3  ;;  %v6268_v5 = vld [vmem:[#allocation9 + $0x5d8] ss:$24 sps:$4 sm:$0xff]   ;;  %v6273_v3 = vld [vmem:[#allocation9 + $0x284] ss:$24 sps:$4 sm:$0xff]  }
 0x20e   : > { %4094 = vmatprep.subr.bf16.mxu0 %v6222_v8  ;;  %v6271_v8 = vld [vmem:[#allocation9 + $0x280] ss:$24 sps:$4 sm:$0xff]  }
 0x20f   : > { %4007 = vmatmul.mubr.bf16.gmra.mrb[8].mxu1 %v7238_v23 }
 0x210   : > { %4341 = vmatpush1.bf16.msra.mxu1 %v6217_v13  ;;  %4364 = vmatprep.mubr.bf16.mxu1 %v7055_v36  ;;  %v6238_v36 = vld [vmem:[#allocation9 + $0x4e8] ss:$24 sps:$4 sm:$0xff]  }
 0x211   : > { %4095 = vmatpush1.bf16.msra.mxu0 %v6220_v14  ;;  %4342 = vmatprep.subr.bf16.mxu1 %v6225_v18  ;;  %v6274_v13 = vld [vmem:[#allocation9 + $0x608] ss:$24 sps:$4 sm:$0xff]   ;;  %v6279_v14 = vld [vmem:[#allocation9 + $0x2b4] ss:$24 sps:$4 sm:$0xff]  }
 0x212   : > { %4096 = vmatprep.subr.bf16.mxu0 %v6228_v24  ;;  %v6282_v18 = vld [vmem:[#allocation9 + $0x63c] ss:$24 sps:$4 sm:$0xff]   ;;  %v6277_v24 = vld [vmem:[#allocation9 + $0x2b0] ss:$24 sps:$4 sm:$0xff]  }
 0x214   : > { %4343 = vmatpush1.bf16.msra.mxu1 %v6223_v26  ;;  %v6280_v26 = vld [vmem:[#allocation9 + $0x638] ss:$24 sps:$4 sm:$0xff]  }
 0x215   : > { %4097 = vmatpush1.bf16.msra.mxu0 %v6226_v30  ;;  %4344 = vmatprep.subr.bf16.mxu1 %v6231_v9  ;;  %v6285_v30 = vld [vmem:[#allocation9 + $0x2e4] ss:$24 sps:$4 sm:$0xff]  }
 0x216   : > { %4098 = vmatprep.subr.bf16.mxu0 %v6234_v37  ;;  %v6288_v9 = vld [vmem:[#allocation9 + $0x66c] ss:$24 sps:$4 sm:$0xff]   ;;  %v6283_v37 = vld [vmem:[#allocation9 + $0x2e0] ss:$24 sps:$4 sm:$0xff]  }
 0x218   : > { %4345 = vmatpush1.bf16.msra.mxu1 %v6229_v40  ;;  %v6286_v40 = vld [vmem:[#allocation9 + $0x668] ss:$24 sps:$4 sm:$0xff]  }
 0x219   : > { %4099 = vmatpush1.bf16.msra.mxu0 %v6232_v42  ;;  %4346 = vmatprep.subr.bf16.mxu1 %v6237_v35  ;;  %v6291_v42 = vld [vmem:[#allocation9 + $0x314] ss:$24 sps:$4 sm:$0xff]  }
 0x21a   : > { %4100 = vmatprep.subr.bf16.mxu0 %v6240_v43  ;;  %v6294_v35 = vld [vmem:[#allocation9 + $0x69c] ss:$24 sps:$4 sm:$0xff]   ;;  %v6289_v43 = vld [vmem:[#allocation9 + $0x310] ss:$24 sps:$4 sm:$0xff]  }
 0x21c   : > { %4347 = vmatpush1.bf16.msra.mxu1 %v6235_v28  ;;  %v6292_v28 = vld [vmem:[#allocation9 + $0x698] ss:$24 sps:$4 sm:$0xff]  }
 0x21d   : > { %4101 = vmatpush1.bf16.msra.mxu0 %v6238_v36  ;;  %4348 = vmatprep.subr.bf16.mxu1 %v6243_v34  ;;  %v6297_v36 = vld [vmem:[#allocation9 + $0x344] ss:$24 sps:$4 sm:$0xff]  }
 0x21e   : > { %4102 = vmatprep.subr.bf16.mxu0 %v6246_v2  ;;  %v6300_v34 = vld [vmem:[#allocation9 + $0x6cc] ss:$24 sps:$4 sm:$0xff]  }
 0x21f   : > { %v6616_v2 = vld [vmem:[#allocation2] sm:$0xff] }
 0x220   : > { %4349 = vmatpush1.bf16.msra.mxu1 %v6241_v44  ;;  %v6617_v44 = vld [vmem:[#allocation2 + $0x18] sm:$0xff] }
 0x221   : > { %4103 = vmatpush1.bf16.msra.mxu0 %v6244_v45  ;;  %4350 = vmatprep.subr.bf16.mxu1 %v6249_v48  ;;  %v6295_v45 = vld [vmem:[#allocation9 + $0x340] ss:$24 sps:$4 sm:$0xff]  }
 0x222   : > { %4104 = vmatprep.subr.bf16.mxu0 %v6252_v53  ;;  %v6298_v48 = vld [vmem:[#allocation9 + $0x6c8] ss:$24 sps:$4 sm:$0xff]   ;;  %v6303_v53 = vld [vmem:[#allocation9 + $0x374] ss:$24 sps:$4 sm:$0xff]  }
 0x224   : > { %4351 = vmatpush1.bf16.msra.mxu1 %v6247_v29  ;;  %v6306_v29 = vld [vmem:[#allocation9 + $0x6fc] ss:$24 sps:$4 sm:$0xff]  }
 0x225   : > { %4105 = vmatpush1.bf16.msra.mxu0 %v6250_v21  ;;  %4352 = vmatprep.subr.bf16.mxu1 %v6255_v52  ;;  %v6301_v21 = vld [vmem:[#allocation9 + $0x370] ss:$24 sps:$4 sm:$0xff]  }
 0x226   : > { %4106 = vmatprep.subr.bf16.mxu0 %v6258_v54  ;;  %v6304_v52 = vld [vmem:[#allocation9 + $0x6f8] ss:$24 sps:$4 sm:$0xff]   ;;  %v6309_v54 = vld [vmem:[#allocation9 + $0x3a4] ss:$24 sps:$4 sm:$0xff]  }
 0x228   : > { %4353 = vmatpush1.bf16.msra.mxu1 %v6253_v56  ;;  %v6312_v56 = vld [vmem:[#allocation9 + $0x72c] ss:$24 sps:$4 sm:$0xff]  }
 0x229   : > { %4107 = vmatpush1.bf16.msra.mxu0 %v6256_v58  ;;  %4354 = vmatprep.subr.bf16.mxu1 %v6261_v59  ;;  %v6618_v58 = vld [vmem:[#allocation2 + $0x10] sm:$0xff]  ;;  %v6619_v59 = vld [vmem:[#allocation2 + $0x28] sm:$0xff] }
 0x22a   : > { %4108 = vmatprep.subr.bf16.mxu0 %v6264_v55  ;;  %v6307_v55 = vld [vmem:[#allocation9 + $0x3a0] ss:$24 sps:$4 sm:$0xff]  }
 0x22c   : > { %4355 = vmatpush1.bf16.msra.mxu1 %v6259_v63  ;;  %v6310_v63 = vld [vmem:[#allocation9 + $0x728] ss:$24 sps:$4 sm:$0xff]  }
 0x22d   : > { %4109 = vmatpush1.bf16.msra.mxu0 %v6262_v60  ;;  %4356 = vmatprep.subr.bf16.mxu1 %v6267_v0  ;;  %v6315_v60 = vld [vmem:[#allocation9 + $0x3d4] ss:$24 sps:$4 sm:$0xff]  }
 0x22e   : > { %4110 = vmatprep.subr.bf16.mxu0 %v6270_v4  ;;  %v6318_v0 = vld [vmem:[#allocation9 + $0x75c] ss:$24 sps:$4 sm:$0xff]   ;;  %v6313_v4 = vld [vmem:[#allocation9 + $0x3d0] ss:$24 sps:$4 sm:$0xff]  }
 0x230   : > { %4357 = vmatpush1.bf16.msra.mxu1 %v6265_v25  ;;  %v6316_v25 = vld [vmem:[#allocation9 + $0x758] ss:$24 sps:$4 sm:$0xff]  }
 0x231   : > { %4111 = vmatpush1.bf16.msra.mxu0 %v6268_v5  ;;  %4358 = vmatprep.subr.bf16.mxu1 %v6273_v3  ;;  %v6321_v5 = vld [vmem:[#allocation9 + $0x404] ss:$24 sps:$4 sm:$0xff]  }
 0x232   : > { %4143 = vmatprep.subr.bf16.mxu0 %v6276_v6  ;;  %v6324_v3 = vld [vmem:[#allocation9 + $0x78c] ss:$24 sps:$4 sm:$0xff]  }
 0x233   : > { %v6620_v6 = vld [vmem:[#allocation2 + $0x20] sm:$0xff] }
 0x234   : > { %4113 = vmatmul.mubr.bf16.vlgmr.msra.gmra.mrb[28].mxu0 %v7163_v39  ;;  %4359 = vmatpush1.bf16.msra.mxu1 %v6271_v8  ;;  %v6319_v8 = vld [vmem:[#allocation9 + $0x400] ss:$24 sps:$4 sm:$0xff]  }
 0x235   : > { %4122 = vmatprep.mubr.bf16.mxu0 %v7168_v41  ;;  %4144 = vmatpush1.bf16.msra.mxu0 %v6274_v13  ;;  %v6322_v13 = vld [vmem:[#allocation9 + $0x788] ss:$24 sps:$4 sm:$0xff]  }
 0x236   : > { %4360 = vmatprep.subr.bf16.mxu1 %v6279_v14  ;;  %4145 = vmatprep.subr.bf16.mxu0 %v6282_v18  ;;  %v6327_v14 = vld [vmem:[#allocation9 + $0x434] ss:$24 sps:$4 sm:$0xff]  }
 0x237   : > { %v6330_v18 = vld [vmem:[#allocation9 + $0x7bc] ss:$24 sps:$4 sm:$0xff]  }
 0x238   : > { %4361 = vmatpush1.bf16.msra.mxu1 %v6277_v24  ;;  %v6325_v24 = vld [vmem:[#allocation9 + $0x430] ss:$24 sps:$4 sm:$0xff]  }
 0x239   : > { %4146 = vmatpush1.bf16.msra.mxu0 %v6280_v26  ;;  %4362 = vmatprep.subr.bf16.mxu1 %v6285_v30  ;;  %v6328_v26 = vld [vmem:[#allocation9 + $0x7b8] ss:$24 sps:$4 sm:$0xff]   ;;  %v6333_v30 = vld [vmem:[#allocation9 + $0x464] ss:$24 sps:$4 sm:$0xff]  }
 0x23a   : > { %4147 = vmatprep.subr.bf16.mxu0 %v6288_v9  ;;  %v6336_v9 = vld [vmem:[#allocation9 + $0x7ec] ss:$24 sps:$4 sm:$0xff]  }
 0x23c   : > { %4123 = vmatmul.mubr.bf16.gmra.mrb[32].mxu0 %v7172_v62  ;;  %4363 = vmatpush1.bf16.msra.mxu1 %v6283_v37  ;;  %v6331_v37 = vld [vmem:[#allocation9 + $0x460] ss:$24 sps:$4 sm:$0xff]  }
 0x23d   : > { %4132 = vmatprep.mubr.bf16.mxu0 %v7177_v10  ;;  %4148 = vmatpush1.bf16.msra.mxu0 %v6286_v40  ;;  %v6339_v40 = vld [vmem:[#allocation9 + $0x494] ss:$24 sps:$4 sm:$0xff]  }
 0x23e   : > { %4395 = vmatprep.subr.bf16.mxu1 %v6291_v42  ;;  %4149 = vmatprep.subr.bf16.mxu0 %v6294_v35  ;;  %v6342_v42 = vld [vmem:[#allocation9 + $0x81c] ss:$24 sps:$4 sm:$0xff]   ;;  %v6337_v35 = vld [vmem:[#allocation9 + $0x490] ss:$24 sps:$4 sm:$0xff]  }
 0x23f   : > { %4365 = vmatmul.mubr.bf16.vlgmr.msra.gmra.mrb[12].mxu1 %v6616_v2  ;;  %v6346_v2 = vld [vmem:[#allocation9 + $0x848] ss:$24 sps:$4 sm:$0xff]  }
 0x240   : > { %4374 = vmatprep.mubr.bf16.mxu1 %v6617_v44  ;;  %4396 = vmatpush1.bf16.msra.mxu1 %v6289_v43  ;;  %v6340_v43 = vld [vmem:[#allocation9 + $0x818] ss:$24 sps:$4 sm:$0xff]   ;;  %v6351_v44 = vld [vmem:[#allocation9 + $0x4f4] ss:$24 sps:$4 sm:$0xff]  }
 0x241   : > { %4150 = vmatpush1.bf16.msra.mxu0 %v6292_v28  ;;  %4397 = vmatprep.subr.bf16.mxu1 %v6297_v36  ;;  %v6345_v28 = vld [vmem:[#allocation9 + $0x4c4] ss:$24 sps:$4 sm:$0xff]  }
 0x242   : > { %4151 = vmatprep.subr.bf16.mxu0 %v6300_v34  ;;  %v6348_v36 = vld [vmem:[#allocation9 + $0x84c] ss:$24 sps:$4 sm:$0xff]   ;;  %v6343_v34 = vld [vmem:[#allocation9 + $0x4c0] ss:$24 sps:$4 sm:$0xff]  }
 0x244   : > { %4133 = vmatmul.mubr.bf16.gmra.mrb[36].mxu0 %v7190_v31  ;;  %4398 = vmatpush1.bf16.msra.mxu1 %v6295_v45  ;;  %v6354_v45 = vld [vmem:[#allocation9 + $0x87c] ss:$24 sps:$4 sm:$0xff]  }
 0x245   : > { %4152 = vmatpush1.bf16.msra.mxu0 %v6298_v48  ;;  %4175 = vmatprep.mubr.bf16.mxu0 %v7082_v12  ;;  %v6349_v48 = vld [vmem:[#allocation9 + $0x4f0] ss:$24 sps:$4 sm:$0xff]  }
 0x246   : > { %4399 = vmatprep.subr.bf16.mxu1 %v6303_v53  ;;  %4153 = vmatprep.subr.bf16.mxu0 %v6306_v29  ;;  %v6352_v53 = vld [vmem:[#allocation9 + $0x878] ss:$24 sps:$4 sm:$0xff]   ;;  %v6357_v29 = vld [vmem:[#allocation9 + $0x524] ss:$24 sps:$4 sm:$0xff]  }
 0x247   : > { %4375 = vmatmul.mubr.bf16.gmra.mrb[16].mxu1 %v6618_v58  ;;  %v6366_v58 = vld [vmem:[#allocation9 + $0x8dc] ss:$24 sps:$4 sm:$0xff]  }
 0x248   : > { %4384 = vmatprep.mubr.bf16.mxu1 %v6619_v59  ;;  %4400 = vmatpush1.bf16.msra.mxu1 %v6301_v21  ;;  %v6360_v21 = vld [vmem:[#allocation9 + $0x8ac] ss:$24 sps:$4 sm:$0xff]   ;;  %v6361_v59 = vld [vmem:[#allocation9 + $0x550] ss:$24 sps:$4 sm:$0xff]  }
 0x249   : > { %4154 = vmatpush1.bf16.msra.mxu0 %v6304_v52  ;;  %4401 = vmatprep.subr.bf16.mxu1 %v6309_v54  ;;  %v6355_v52 = vld [vmem:[#allocation9 + $0x520] ss:$24 sps:$4 sm:$0xff]  }
 0x24a   : > { %4155 = vmatprep.subr.bf16.mxu0 %v6312_v56  ;;  %v6358_v54 = vld [vmem:[#allocation9 + $0x8a8] ss:$24 sps:$4 sm:$0xff]   ;;  %v6363_v56 = vld [vmem:[#allocation9 + $0x554] ss:$24 sps:$4 sm:$0xff]  }
 0x24c   : > { %4402 = vmatpush1.bf16.msra.mxu1 %v6307_v55  ;;  %v6364_v55 = vld [vmem:[#allocation9 + $0x8d8] ss:$24 sps:$4 sm:$0xff]  }
 0x24d   : > { %4156 = vmatpush1.bf16.msra.mxu0 %v6310_v63  ;;  %4403 = vmatprep.subr.bf16.mxu1 %v6315_v60  ;;  %v6369_v63 = vld [vmem:[#allocation9 + $0x584] ss:$24 sps:$4 sm:$0xff]  }
 0x24e   : > { %4157 = vmatprep.subr.bf16.mxu0 %v6318_v0  ;;  %v6372_v60 = vld [vmem:[#allocation9 + $0x90c] ss:$24 sps:$4 sm:$0xff]   ;;  %v6367_v0 = vld [vmem:[#allocation9 + $0x580] ss:$24 sps:$4 sm:$0xff]  }
 0x24f   : > { %4385 = vmatmul.mubr.bf16.gmra.mrb[20].mxu1 %v6620_v6  ;;  %v6376_v6 = vld [vmem:[#allocation9 + $0x938] ss:$24 sps:$4 sm:$0xff]  }
 0x250   : > { %4404 = vmatpush1.bf16.msra.mxu1 %v6313_v4  ;;  %4427 = vmatprep.mubr.bf16.mxu1 %v7111_v46  ;;  %v6334_v46 = vld [vmem:[#allocation9 + $0x7e8] ss:$24 sps:$4 sm:$0xff]  }
 0x251   : > { %4158 = vmatpush1.bf16.msra.mxu0 %v6316_v25  ;;  %4405 = vmatprep.subr.bf16.mxu1 %v6321_v5  ;;  %v6370_v4 = vld [vmem:[#allocation9 + $0x908] ss:$24 sps:$4 sm:$0xff]   ;;  %v6375_v25 = vld [vmem:[#allocation9 + $0x5b4] ss:$24 sps:$4 sm:$0xff]  }
 0x252   : > { %4159 = vmatprep.subr.bf16.mxu0 %v6324_v3  ;;  %v6378_v5 = vld [vmem:[#allocation9 + $0x93c] ss:$24 sps:$4 sm:$0xff]   ;;  %v6373_v3 = vld [vmem:[#allocation9 + $0x5b0] ss:$24 sps:$4 sm:$0xff]  }
 0x254   : > { %4406 = vmatpush1.bf16.msra.mxu1 %v6319_v8  ;;  %v6381_v8 = vld [vmem:[#allocation9 + $0x5e4] ss:$24 sps:$4 sm:$0xff]  }
 0x255   : > { %4160 = vmatpush1.bf16.msra.mxu0 %v6322_v13  ;;  %4407 = vmatprep.subr.bf16.mxu1 %v6327_v14  ;;  %v6384_v13 = vld [vmem:[#allocation9 + $0x96c] ss:$24 sps:$4 sm:$0xff]   ;;  %v6379_v14 = vld [vmem:[#allocation9 + $0x5e0] ss:$24 sps:$4 sm:$0xff]  }
 0x256   : > { %4161 = vmatprep.subr.bf16.mxu0 %v6330_v18  ;;  %v6382_v18 = vld [vmem:[#allocation9 + $0x968] ss:$24 sps:$4 sm:$0xff]  }
 0x258   : > { %4408 = vmatpush1.bf16.msra.mxu1 %v6325_v24  ;;  %v6387_v24 = vld [vmem:[#allocation9 + $0x614] ss:$24 sps:$4 sm:$0xff]  }
 0x259   : > { %4162 = vmatpush1.bf16.msra.mxu0 %v6328_v26  ;;  %4409 = vmatprep.subr.bf16.mxu1 %v6333_v30  ;;  %v6390_v26 = vld [vmem:[#allocation9 + $0x99c] ss:$24 sps:$4 sm:$0xff]   ;;  %v6385_v30 = vld [vmem:[#allocation9 + $0x610] ss:$24 sps:$4 sm:$0xff]  }
 0x25a   : > { %4163 = vmatprep.subr.bf16.mxu0 %v6336_v9  ;;  %v6388_v9 = vld [vmem:[#allocation9 + $0x998] ss:$24 sps:$4 sm:$0xff]  }
 0x25c   : > { %4410 = vmatpush1.bf16.msra.mxu1 %v6331_v37  ;;  %v6393_v37 = vld [vmem:[#allocation9 + $0x644] ss:$24 sps:$4 sm:$0xff]  }
 0x25d   : > { %4164 = vmatpush1.bf16.msra.mxu0 %v6334_v46  ;;  %4411 = vmatprep.subr.bf16.mxu1 %v6339_v40  ;;  %v6396_v46 = vld [vmem:[#allocation9 + $0x9cc] ss:$24 sps:$4 sm:$0xff]   ;;  %v6391_v40 = vld [vmem:[#allocation9 + $0x640] ss:$24 sps:$4 sm:$0xff]  }
 0x25e   : > { %4165 = vmatprep.subr.bf16.mxu0 %v6342_v42  ;;  %v6394_v42 = vld [vmem:[#allocation9 + $0x9c8] ss:$24 sps:$4 sm:$0xff]  }
 0x260   : > { %4412 = vmatpush1.bf16.msra.mxu1 %v6337_v35  ;;  %v6399_v35 = vld [vmem:[#allocation9 + $0x674] ss:$24 sps:$4 sm:$0xff]  }
 0x261   : > { %4166 = vmatpush1.bf16.msra.mxu0 %v6340_v43  ;;  %4413 = vmatprep.subr.bf16.mxu1 %v6345_v28  ;;  %v6402_v43 = vld [vmem:[#allocation9 + $0x9fc] ss:$24 sps:$4 sm:$0xff]   ;;  %v6397_v28 = vld [vmem:[#allocation9 + $0x670] ss:$24 sps:$4 sm:$0xff]  }
 0x262   : > { %4167 = vmatprep.subr.bf16.mxu0 %v6348_v36  ;;  %v6400_v36 = vld [vmem:[#allocation9 + $0x9f8] ss:$24 sps:$4 sm:$0xff]  }
 0x264   : > { %4414 = vmatpush1.bf16.msra.mxu1 %v6343_v34  ;;  %v6405_v34 = vld [vmem:[#allocation9 + $0x6a4] ss:$24 sps:$4 sm:$0xff]  }
 0x265   : > { %4168 = vmatpush1.bf16.msra.mxu0 %v6346_v2  ;;  %4415 = vmatprep.subr.bf16.mxu1 %v6351_v44  ;;  %v6403_v44 = vld [vmem:[#allocation9 + $0x6a0] ss:$24 sps:$4 sm:$0xff]  }
 0x266   : > { %4169 = vmatprep.subr.bf16.mxu0 %v6354_v45 }
 0x268   : > { %4416 = vmatpush1.bf16.msra.mxu1 %v6349_v48  ;;  %v6406_v48 = vld [vmem:[#allocation9 + $0xa28] ss:$24 sps:$4 sm:$0xff]  }
 0x269   : > { %4170 = vmatpush1.bf16.msra.mxu0 %v6352_v53  ;;  %4417 = vmatprep.subr.bf16.mxu1 %v6357_v29  ;;  %v6411_v53 = vld [vmem:[#allocation9 + $0x6d4] ss:$24 sps:$4 sm:$0xff]  }
 0x26a   : > { %4171 = vmatprep.subr.bf16.mxu0 %v6360_v21  ;;  %v6414_v21 = vld [vmem:[#allocation9 + $0xa5c] ss:$24 sps:$4 sm:$0xff]  }
 0x26c   : > { %4418 = vmatpush1.bf16.msra.mxu1 %v6355_v52  ;;  %v6409_v52 = vld [vmem:[#allocation9 + $0x6d0] ss:$24 sps:$4 sm:$0xff]  }
 0x26d   : > { %4172 = vmatpush1.bf16.msra.mxu0 %v6358_v54  ;;  %4419 = vmatprep.subr.bf16.mxu1 %v6363_v56  ;;  %v6417_v54 = vld [vmem:[#allocation9 + $0x704] ss:$24 sps:$4 sm:$0xff]  }
 0x26e   : > { %4173 = vmatprep.subr.bf16.mxu0 %v6366_v58 }
 0x270   : > { %4420 = vmatpush1.bf16.msra.mxu1 %v6361_v59  ;;  %v6415_v59 = vld [vmem:[#allocation9 + $0x700] ss:$24 sps:$4 sm:$0xff]  }
 0x271   : > { %4174 = vmatpush1.bf16.msra.mxu0 %v6364_v55  ;;  %4421 = vmatprep.subr.bf16.mxu1 %v6369_v63  ;;  %v6418_v63 = vld [vmem:[#allocation9 + $0xa88] ss:$24 sps:$4 sm:$0xff]  }
 0x272   : > { %4206 = vmatprep.subr.bf16.mxu0 %v6372_v60  ;;  %v6423_v60 = vld [vmem:[#allocation9 + $0x734] ss:$24 sps:$4 sm:$0xff]  }
 0x274   : > { %4176 = vmatmul.mubr.bf16.vlgmr.msra.gmra.mrb[28].mxu0 %v7088_v16  ;;  %4422 = vmatpush1.bf16.msra.mxu1 %v6367_v0 }
 0x275   : > { %4185 = vmatprep.mubr.bf16.mxu0 %v7118_v50  ;;  %4207 = vmatpush1.bf16.msra.mxu0 %v6370_v4  ;;  %v6426_v4 = vld [vmem:[#allocation9 + $0xabc] ss:$24 sps:$4 sm:$0xff]  }
 0x276   : > { %4423 = vmatprep.subr.bf16.mxu1 %v6375_v25  ;;  %4208 = vmatprep.subr.bf16.mxu0 %v6378_v5  ;;  %v6421_v25 = vld [vmem:[#allocation9 + $0x730] ss:$24 sps:$4 sm:$0xff]   ;;  %v6429_v5 = vld [vmem:[#allocation9 + $0x764] ss:$24 sps:$4 sm:$0xff]  }
 0x278   : > { %4424 = vmatpush1.bf16.msra.mxu1 %v6373_v3  ;;  %v6432_v3 = vld [vmem:[#allocation9 + $0xaec] ss:$24 sps:$4 sm:$0xff]  }
 0x279   : > { %4209 = vmatpush1.bf16.msra.mxu0 %v6376_v6  ;;  %4425 = vmatprep.subr.bf16.mxu1 %v6381_v8  ;;  %v6427_v8 = vld [vmem:[#allocation9 + $0x760] ss:$24 sps:$4 sm:$0xff]  }
 0x27a   : > { %4210 = vmatprep.subr.bf16.mxu0 %v6384_v13 }
 0x27c   : > { %4186 = vmatmul.mubr.bf16.gmra.mrb[32].mxu0 %v7126_v22  ;;  %4426 = vmatpush1.bf16.msra.mxu1 %v6379_v14  ;;  %v6430_v14 = vld [vmem:[#allocation9 + $0xae8] ss:$24 sps:$4 sm:$0xff]  }
 0x27d   : > { %4195 = vmatprep.mubr.bf16.mxu0 %v7144_v33  ;;  %4211 = vmatpush1.bf16.msra.mxu0 %v6382_v18  ;;  %v6435_v18 = vld [vmem:[#allocation9 + $0x794] ss:$24 sps:$4 sm:$0xff]  }
 0x27e   : > { %4458 = vmatprep.subr.bf16.mxu1 %v6387_v24  ;;  %4212 = vmatprep.subr.bf16.mxu0 %v6390_v26  ;;  %v6438_v26 = vld [vmem:[#allocation9 + $0xb1c] ss:$24 sps:$4 sm:$0xff]  }
 0x27f   : > { %4428 = vmatmul.mubr.bf16.vlgmr.msra.gmra.mrb[12].mxu1 %v7163_v39  ;;  %v6408_v39 = vld [vmem:[#allocation9 + $0xa2c] ss:$24 sps:$4 sm:$0xff]  }
 0x280   : > { %4437 = vmatprep.mubr.bf16.mxu1 %v7168_v41  ;;  %4459 = vmatpush1.bf16.msra.mxu1 %v6385_v30  ;;  %v6433_v30 = vld [vmem:[#allocation9 + $0x790] ss:$24 sps:$4 sm:$0xff]  }
 0x281   : > { %4213 = vmatpush1.bf16.msra.mxu0 %v6388_v9  ;;  %4460 = vmatprep.subr.bf16.mxu1 %v6393_v37  ;;  %v6436_v9 = vld [vmem:[#allocation9 + $0xb18] ss:$24 sps:$4 sm:$0xff]   ;;  %v6441_v37 = vld [vmem:[#allocation9 + $0x7c4] ss:$24 sps:$4 sm:$0xff]  }
 0x282   : > { %4214 = vmatprep.subr.bf16.mxu0 %v6396_v46  ;;  %v6444_v46 = vld [vmem:[#allocation9 + $0xb4c] ss:$24 sps:$4 sm:$0xff]  }
 0x284   : > { %4196 = vmatmul.mubr.bf16.gmra.mrb[36].mxu0 %v7139_v32  ;;  %4461 = vmatpush1.bf16.msra.mxu1 %v6391_v40  ;;  %v6439_v40 = vld [vmem:[#allocation9 + $0x7c0] ss:$24 sps:$4 sm:$0xff]  }
 0x285   : > { %4215 = vmatpush1.bf16.msra.mxu0 %v6394_v42  ;;  %4238 = vmatprep.mubr.bf16.mxu0 %v7150_v38  ;;  %v6442_v42 = vld [vmem:[#allocation9 + $0xb48] ss:$24 sps:$4 sm:$0xff]  }
 0x286   : > { %4462 = vmatprep.subr.bf16.mxu1 %v6399_v35  ;;  %4216 = vmatprep.subr.bf16.mxu0 %v6402_v43  ;;  %v6447_v35 = vld [vmem:[#allocation9 + $0x7f4] ss:$24 sps:$4 sm:$0xff]  }
 0x287   : > { %v7257_v41 = vpop.f32.mrb[16].mxu0  ;;  %4438 = vmatmul.mubr.bf16.gmra.mrb[16].mxu1 %v7172_v62  ;;  %v6412_v62 = vld [vmem:[#allocation9 + $0xa58] ss:$24 sps:$4 sm:$0xff]   ;;  %v6450_v43 = vld [vmem:[#allocation9 + $0xb7c] ss:$24 sps:$4 sm:$0xff]  }
 0x288   : > { %v7260_v2 = vpop.f32.mrb[17].mxu0  ;;  %4447 = vmatprep.mubr.bf16.mxu1 %v7177_v10  ;;  %4463 = vmatpush1.bf16.msra.mxu1 %v6397_v28  ;;  %v6420_v10 = vld [vmem:[#allocation9 + $0xa8c] ss:$24 sps:$4 sm:$0xff]   ;;  %v6445_v28 = vld [vmem:[#allocation9 + $0x7f0] ss:$24 sps:$4 sm:$0xff]  }
 0x289   : > { %v7263_v45 = vpop.f32.mrb[18].mxu0  ;;  %4217 = vmatpush1.bf16.msra.mxu0 %v6400_v36  ;;  %4464 = vmatprep.subr.bf16.mxu1 %v6405_v34  ;;  %v6448_v36 = vld [vmem:[#allocation9 + $0xb78] ss:$24 sps:$4 sm:$0xff]   ;;  %v6453_v34 = vld [vmem:[#allocation9 + $0x824] ss:$24 sps:$4 sm:$0xff]  }
 0x28a   : > { %v7265_v29 = vpop.f32.mrb[19].mxu0  ;;  %4218 = vmatprep.subr.bf16.mxu0 %v6408_v39  ;;  %v6456_v39 = vld [vmem:[#allocation9 + $0xbac] ss:$24 sps:$4 sm:$0xff]  }
 0x28c   : > { %4465 = vmatpush1.bf16.msra.mxu1 %v6403_v44  ;;  %v6451_v44 = vld [vmem:[#allocation9 + $0x820] ss:$24 sps:$4 sm:$0xff]  }
 0x28d   : > { %4219 = vmatpush1.bf16.msra.mxu0 %v6406_v48  ;;  %4466 = vmatprep.subr.bf16.mxu1 %v6411_v53  ;;  %v6454_v48 = vld [vmem:[#allocation9 + $0xba8] ss:$24 sps:$4 sm:$0xff]   ;;  %v6459_v53 = vld [vmem:[#allocation9 + $0x854] ss:$24 sps:$4 sm:$0xff]  }
 0x28e   : > { %4220 = vmatprep.subr.bf16.mxu0 %v6414_v21  ;;  %v6462_v21 = vld [vmem:[#allocation9 + $0xbdc] ss:$24 sps:$4 sm:$0xff]  }
 0x28f   : > { %v7267_v56 = vpop.f32.mrb[20].mxu0  ;;  %4448 = vmatmul.mubr.bf16.gmra.mrb[20].mxu1 %v7190_v31  ;;  %v6424_v31 = vld [vmem:[#allocation9 + $0xab8] ss:$24 sps:$4 sm:$0xff]  }
 0x290   : > { %v7270_v58 = vpop.f32.mrb[21].mxu0  ;;  %4467 = vmatpush1.bf16.msra.mxu1 %v6409_v52  ;;  %4490 = vmatprep.mubr.bf16.mxu1 %v7082_v12  ;;  %v6457_v52 = vld [vmem:[#allocation9 + $0x850] ss:$24 sps:$4 sm:$0xff]  }
 0x291   : > { %v7273_v55 = vpop.f32.mrb[22].mxu0  ;;  %4221 = vmatpush1.bf16.msra.mxu0 %v6412_v62  ;;  %4468 = vmatprep.subr.bf16.mxu1 %v6417_v54  ;;  %v6460_v62 = vld [vmem:[#allocation9 + $0xbd8] ss:$24 sps:$4 sm:$0xff]   ;;  %v6465_v54 = vld [vmem:[#allocation9 + $0x884] ss:$24 sps:$4 sm:$0xff]  }
 0x292   : > { %v7275_v0 = vpop.f32.mrb[23].mxu0  ;;  %4222 = vmatprep.subr.bf16.mxu0 %v6420_v10  ;;  %v6468_v10 = vld [vmem:[#allocation9 + $0xc0c] ss:$24 sps:$4 sm:$0xff]  }
 0x294   : > { %4469 = vmatpush1.bf16.msra.mxu1 %v6415_v59  ;;  %v6463_v59 = vld [vmem:[#allocation9 + $0x880] ss:$24 sps:$4 sm:$0xff]  }
 0x295   : > { %4223 = vmatpush1.bf16.msra.mxu0 %v6418_v63  ;;  %4470 = vmatprep.subr.bf16.mxu1 %v6423_v60  ;;  %v6466_v63 = vld [vmem:[#allocation9 + $0xc08] ss:$24 sps:$4 sm:$0xff]   ;;  %v6471_v60 = vld [vmem:[#allocation9 + $0x8b4] ss:$24 sps:$4 sm:$0xff]  }
 0x296   : > { %4224 = vmatprep.subr.bf16.mxu0 %v6426_v4  ;;  %v6474_v4 = vld [vmem:[#allocation9 + $0xc3c] ss:$24 sps:$4 sm:$0xff]  }
 0x297   : > { %v7277_v12 = vpop.f32.mrb[24].mxu0 }
 0x298   : > { %v7279_v6 = vpop.f32.mrb[25].mxu0  ;;  %4471 = vmatpush1.bf16.msra.mxu1 %v6421_v25  ;;  %v6469_v25 = vld [vmem:[#allocation9 + $0x8b0] ss:$24 sps:$4 sm:$0xff]  }
 0x299   : > { %v7281_v13 = vpop.f32.mrb[26].mxu0  ;;  %4225 = vmatpush1.bf16.msra.mxu0 %v6424_v31  ;;  %4472 = vmatprep.subr.bf16.mxu1 %v6429_v5  ;;  %v6472_v31 = vld [vmem:[#allocation9 + $0xc38] ss:$24 sps:$4 sm:$0xff]   ;;  %v6477_v5 = vld [vmem:[#allocation9 + $0x8e4] ss:$24 sps:$4 sm:$0xff]  }
 0x29a   : > { %v7283_v24 = vpop.f32.mrb[27].mxu0  ;;  %4226 = vmatprep.subr.bf16.mxu0 %v6432_v3  ;;  %v6480_v3 = vld [vmem:[#allocation9 + $0xc6c] ss:$24 sps:$4 sm:$0xff]  }
 0x29c   : > { %4473 = vmatpush1.bf16.msra.mxu1 %v6427_v8  ;;  %v6475_v8 = vld [vmem:[#allocation9 + $0x8e0] ss:$24 sps:$4 sm:$0xff]  }
 0x29d   : > { %4227 = vmatpush1.bf16.msra.mxu0 %v6430_v14  ;;  %4474 = vmatprep.subr.bf16.mxu1 %v6435_v18  ;;  %v6478_v14 = vld [vmem:[#allocation9 + $0xc68] ss:$24 sps:$4 sm:$0xff]   ;;  %v6483_v18 = vld [vmem:[#allocation9 + $0x914] ss:$24 sps:$4 sm:$0xff]  }
 0x29e   : > { %4228 = vmatprep.subr.bf16.mxu0 %v6438_v26  ;;  %v6486_v26 = vld [vmem:[#allocation9 + $0xc9c] ss:$24 sps:$4 sm:$0xff]  }
 0x2a0   : > { %4475 = vmatpush1.bf16.msra.mxu1 %v6433_v30  ;;  %v6481_v30 = vld [vmem:[#allocation9 + $0x910] ss:$24 sps:$4 sm:$0xff]  }
 0x2a1   : > { %4229 = vmatpush1.bf16.msra.mxu0 %v6436_v9  ;;  %4476 = vmatprep.subr.bf16.mxu1 %v6441_v37  ;;  %v6484_v9 = vld [vmem:[#allocation9 + $0xc98] ss:$24 sps:$4 sm:$0xff]   ;;  %v6489_v37 = vld [vmem:[#allocation9 + $0x944] ss:$24 sps:$4 sm:$0xff]  }
 0x2a2   : > { %4230 = vmatprep.subr.bf16.mxu0 %v6444_v46  ;;  %v6492_v46 = vld [vmem:[#allocation9 + $0xccc] ss:$24 sps:$4 sm:$0xff]  }
 0x2a4   : > { %4477 = vmatpush1.bf16.msra.mxu1 %v6439_v40  ;;  %v6487_v40 = vld [vmem:[#allocation9 + $0x940] ss:$24 sps:$4 sm:$0xff]  }
 0x2a5   : > { %4231 = vmatpush1.bf16.msra.mxu0 %v6442_v42  ;;  %4478 = vmatprep.subr.bf16.mxu1 %v6447_v35  ;;  %v6490_v42 = vld [vmem:[#allocation9 + $0xcc8] ss:$24 sps:$4 sm:$0xff]   ;;  %v6495_v35 = vld [vmem:[#allocation9 + $0x974] ss:$24 sps:$4 sm:$0xff]  }
 0x2a6   : > { %4232 = vmatprep.subr.bf16.mxu0 %v6450_v43  ;;  %v6498_v43 = vld [vmem:[#allocation9 + $0xcfc] ss:$24 sps:$4 sm:$0xff]  }
 0x2a8   : > { %4479 = vmatpush1.bf16.msra.mxu1 %v6445_v28  ;;  %v6493_v28 = vld [vmem:[#allocation9 + $0x970] ss:$24 sps:$4 sm:$0xff]  }
 0x2a9   : > { %4233 = vmatpush1.bf16.msra.mxu0 %v6448_v36  ;;  %4480 = vmatprep.subr.bf16.mxu1 %v6453_v34  ;;  %v6496_v36 = vld [vmem:[#allocation9 + $0xcf8] ss:$24 sps:$4 sm:$0xff]   ;;  %v6501_v34 = vld [vmem:[#allocation9 + $0x9a4] ss:$24 sps:$4 sm:$0xff]  }
 0x2aa   : > { %4234 = vmatprep.subr.bf16.mxu0 %v6456_v39  ;;  %v6502_v39 = vld [vmem:[#allocation9 + $0xd28] ss:$24 sps:$4 sm:$0xff]  }
 0x2ac   : > { %4481 = vmatpush1.bf16.msra.mxu1 %v6451_v44  ;;  %v6507_v44 = vld [vmem:[#allocation9 + $0x9d4] ss:$24 sps:$4 sm:$0xff]  }
 0x2ad   : > { %4235 = vmatpush1.bf16.msra.mxu0 %v6454_v48  ;;  %4482 = vmatprep.subr.bf16.mxu1 %v6459_v53  ;;  %v7295_v48 = vld [vmem:[#allocation10] ss:$4 sm:$0x3f] }
 0x2ae   : > { %4236 = vmatprep.subr.bf16.mxu0 %v6462_v21  ;;  %v6510_v53 = vld [vmem:[#allocation9 + $0xd5c] ss:$24 sps:$4 sm:$0xff]   ;;  %v6505_v21 = vld [vmem:[#allocation9 + $0x9d0] ss:$24 sps:$4 sm:$0xff]  }
 0x2b0   : > { %4483 = vmatpush1.bf16.msra.mxu1 %v6457_v52  ;;  %v7299_v52 = vrot.slane %v7295_v48, %v7038_v19 }
 0x2b1   : > { %4237 = vmatpush1.bf16.msra.mxu0 %v6460_v62  ;;  %4484 = vmatprep.subr.bf16.mxu1 %v6465_v54  ;;  %v7303_v62 = vrot.slane %v7295_v48, %v7041_v20  ;;  %v6516_v54 = vld [vmem:[#allocation9 + $0xd8c] ss:$24 sps:$4 sm:$0xff]  }
 0x2b2   : > { %4269 = vmatprep.subr.bf16.mxu0 %v6468_v10  ;;  %v7307_v10 = vld [vmem:[#allocation10 + $0x1] ss:$4 sm:$0x3f] }
 0x2b4   : > { %4239 = vmatmul.mubr.bf16.vlgmr.msra.gmra.mrb[28].mxu0 %v7181_v15  ;;  %4485 = vmatpush1.bf16.msra.mxu1 %v6463_v59  ;;  %v6511_v59 = vld [vmem:[#allocation9 + $0xa00] ss:$24 sps:$4 sm:$0xff]  }
 0x2b5   : > { %4248 = vmatprep.mubr.bf16.mxu0 %v7186_v27  ;;  %4270 = vmatpush1.bf16.msra.mxu0 %v6466_v63  ;;  %v5611_v63 = vadd.f32 %v7257_v41, %v7299_v52 }
 0x2b6   : > { %4486 = vmatprep.subr.bf16.mxu1 %v6471_v60  ;;  %4271 = vmatprep.subr.bf16.mxu0 %v6474_v4  ;;  %v6514_v60 = vld [vmem:[#allocation9 + $0xd88] ss:$24 sps:$4 sm:$0xff]   ;;  %v6519_v4 = vld [vmem:[#allocation9 + $0xa34] ss:$24 sps:$4 sm:$0xff]  }
 0x2b8   : > { %4487 = vmatpush1.bf16.msra.mxu1 %v6469_v25  ;;  %v5613_v25 = vadd.f32 %v7260_v2, %v7303_v62  ;;  %v7326_v2 = vrot.slane %v7307_v10, %v7041_v20 }
 0x2b9   : > { %4272 = vmatpush1.bf16.msra.mxu0 %v6472_v31  ;;  %4488 = vmatprep.subr.bf16.mxu1 %v6477_v5  ;;  %v7313_v31 = vld [vmem:[#allocation10 + $0x2] ss:$4 sm:$0x3f] }
 0x2ba   : > { %4273 = vmatprep.subr.bf16.mxu0 %v6480_v3  ;;  %v6522_v5 = vld [vmem:[#allocation9 + $0xdbc] ss:$24 sps:$4 sm:$0xff]  }
 0x2bc   : > { %4249 = vmatmul.mubr.bf16.gmra.mrb[32].mxu0 %v7195_v51  ;;  %4489 = vmatpush1.bf16.msra.mxu1 %v6475_v8  ;;  %v7319_v8 = vrot.slane %v7307_v10, %v7038_v19 }
 0x2bd   : > { %4258 = vmatprep.mubr.bf16.mxu0 %v7199_v57  ;;  %4274 = vmatpush1.bf16.msra.mxu0 %v6478_v14  ;;  %v5617_v14 = vadd.f32 %v7265_v29, %v7303_v62  ;;  %v6520_v29 = vld [vmem:[#allocation9 + $0xdb8] ss:$24 sps:$4 sm:$0xff]  }
 0x2be   : > { %4521 = vmatprep.subr.bf16.mxu1 %v6483_v18  ;;  %4275 = vmatprep.subr.bf16.mxu0 %v6486_v26 }
 0x2bf   : > { %4491 = vmatmul.mubr.bf16.vlgmr.msra.gmra.mrb[12].mxu1 %v7088_v16  ;;  %v6504_v16 = vld [vmem:[#allocation9 + $0xd2c] ss:$24 sps:$4 sm:$0xff]  }
 0x2c0   : > { %4500 = vmatprep.mubr.bf16.mxu1 %v7118_v50  ;;  %4522 = vmatpush1.bf16.msra.mxu1 %v6481_v30  ;;  %v6499_v50 = vld [vmem:[#allocation9 + $0x9a0] ss:$24 sps:$4 sm:$0xff]   ;;  %v6517_v30 = vld [vmem:[#allocation9 + $0xa30] ss:$24 sps:$4 sm:$0xff]  }
 0x2c1   : > { %4276 = vmatpush1.bf16.msra.mxu0 %v6484_v9  ;;  %4523 = vmatprep.subr.bf16.mxu1 %v6489_v37  ;;  %v7330_v9 = vrot.slane %v7313_v31, %v7038_v19 }
 0x2c2   : > { %4277 = vmatprep.subr.bf16.mxu0 %v6492_v46 }
 0x2c4   : > { %4259 = vmatmul.mubr.bf16.gmra.mrb[36].mxu0 %v7204_v7  ;;  %4524 = vmatpush1.bf16.msra.mxu1 %v6487_v40  ;;  %v6525_v40 = vld [vmem:[#allocation9 + $0xa64] ss:$24 sps:$4 sm:$0xff]  }
 0x2c5   : > { %4278 = vmatpush1.bf16.msra.mxu0 %v6490_v42  ;;  %4301 = vmatprep.mubr.bf16.mxu0 %v7210_v11 }
 0x2c6   : > { %4525 = vmatprep.subr.bf16.mxu1 %v6495_v35  ;;  %4279 = vmatprep.subr.bf16.mxu0 %v6498_v43  ;;  %v7334_v35 = vrot.slane %v7313_v31, %v7041_v20 }
 0x2c7   : > { %4501 = vmatmul.mubr.bf16.gmra.mrb[16].mxu1 %v7126_v22  ;;  %v6508_v22 = vld [vmem:[#allocation9 + $0xd58] ss:$24 sps:$4 sm:$0xff]  }
 0x2c8   : > { %4510 = vmatprep.mubr.bf16.mxu1 %v7144_v33  ;;  %4526 = vmatpush1.bf16.msra.mxu1 %v6493_v28  ;;  %v6513_v33 = vld [vmem:[#allocation9 + $0xa04] ss:$24 sps:$4 sm:$0xff]  }
 0x2c9   : > { %4280 = vmatpush1.bf16.msra.mxu0 %v6496_v36  ;;  %4527 = vmatprep.subr.bf16.mxu1 %v6501_v34  ;;  %v6528_v28 = vld [vmem:[#allocation9 + $0xdec] ss:$24 sps:$4 sm:$0xff]  }
 0x2ca   : > { %4281 = vmatprep.subr.bf16.mxu0 %v6504_v16 }
 0x2cc   : > { %4528 = vmatpush1.bf16.msra.mxu1 %v6499_v50  ;;  %v6523_v50 = vld [vmem:[#allocation9 + $0xa60] ss:$24 sps:$4 sm:$0xff]  }
 0x2cd   : > { %4282 = vmatpush1.bf16.msra.mxu0 %v6502_v39  ;;  %4529 = vmatprep.subr.bf16.mxu1 %v6507_v44  ;;  %v5619_v39 = vadd.f32 %v7267_v56, %v7299_v52  ;;  %v5623_v56 = vadd.f32 %v7273_v55, %v7299_v52  ;;  %v6532_v55 = vld [vmem:[#allocation9 + $0xe18] ss:$24 sps:$4 sm:$0xff]  }
 0x2ce   : > { %4283 = vmatprep.subr.bf16.mxu0 %v6510_v53  ;;  %v6526_v53 = vld [vmem:[#allocation9 + $0xde8] ss:$24 sps:$4 sm:$0xff]  }
 0x2cf   : > { %4511 = vmatmul.mubr.bf16.gmra.mrb[20].mxu1 %v7139_v32 }
 0x2d0   : > { %4530 = vmatpush1.bf16.msra.mxu1 %v6505_v21  ;;  %4553 = vmatprep.mubr.bf16.mxu1 %v7150_v38  ;;  %v5615_v38 = vadd.f32 %v7263_v45, %v7299_v52  ;;  %v6531_v21 = vld [vmem:[#allocation9 + $0xa94] ss:$24 sps:$4 sm:$0xff]  }
 0x2d1   : > { %4284 = vmatpush1.bf16.msra.mxu0 %v6508_v22  ;;  %4531 = vmatprep.subr.bf16.mxu1 %v6513_v33  ;;  %v5621_v22 = vadd.f32 %v7270_v58, %v7303_v62 }
 0x2d2   : > { %v3988_v32 = vpop.f32.mrb[0].mxu1  ;;  %4285 = vmatprep.subr.bf16.mxu0 %v6516_v54 }
 0x2d3   : > { %v5612_v3 = vadd.f32 %v5611_v63, %v3988_v32  ;;  %v3990_v41 = vpop.f32.mrb[1].mxu1  ;;  %v6534_v63 = vld [vmem:[#allocation9 + $0xe1c] ss:$24 sps:$4 sm:$0xff]   ;;  %v5625_v32 = vadd.f32 %v7275_v0, %v7303_v62 }
 0x2d4   : > { %v5614_v18 = vadd.f32 %v5613_v25, %v3990_v41  ;;  %v3992_v26 = vpop.f32.mrb[2].mxu1  ;;  %4532 = vmatpush1.bf16.msra.mxu1 %v6511_v59  ;;  %v6529_v41 = vld [vmem:[#allocation9 + $0xa90] ss:$24 sps:$4 sm:$0xff]  }
 0x2d5   : > { %v4647_v45 = vmax.f32 %v5612_v3, 0.0  ;;  %v5616_v37 = vadd.f32 %v5615_v38, %v3992_v26  ;;  %v3994_v46 = vpop.f32.mrb[3].mxu1  ;;  %4286 = vmatpush1.bf16.msra.mxu0 %v6514_v60  ;;  %4533 = vmatprep.subr.bf16.mxu1 %v6519_v4 }
 0x2d6   : > { %v4648_v42 = vmax.f32 %v5614_v18, 0.0  ;;  %v5618_v43 = vadd.f32 %v5617_v14, %v3994_v46  ;;  %4287 = vmatprep.subr.bf16.mxu0 %v6522_v5  ;;  %v6540_v46 = vld [vmem:[#allocation9 + $0xe4c] ss:$24 sps:$4 sm:$0xff]  }
 0x2d7   : > { %v4714_v36 = vmul.f32 %v7319_v8, %v4647_v45  ;;  %v4653_v19 = vmax.f32 %v5616_v37, 0.0 }
 0x2d8   : > { %v4715_v34 = vmul.f32 %v7326_v2, %v4648_v42  ;;  %v4654_v16 = vmax.f32 %v5618_v43, 0.0  ;;  %4534 = vmatpush1.bf16.msra.mxu1 %v6517_v30  ;;  %v6537_v30 = vld [vmem:[#allocation9 + $0xac4] ss:$24 sps:$4 sm:$0xff]  }
 0x2d9   : > { %v4781_v20 = vadd.f32 %v7330_v9, %v4714_v36  ;;  %v4720_v44 = vmul.f32 %v7319_v8, %v4653_v19  ;;  %4288 = vmatpush1.bf16.msra.mxu0 %v6520_v29  ;;  %4535 = vmatprep.subr.bf16.mxu1 %v6525_v40  ;;  %v5627_v36 = vadd.f32 %v7277_v12, %v7299_v52 }
 0x2da   : > { %v4782_v33 = vadd.f32 %v7334_v35, %v4715_v34  ;;  %v4721_v54 = vmul.f32 %v7326_v2, %v4654_v16  ;;  %v3998_v59 = vpop.f32.mrb[4].mxu1  ;;  %4289 = vmatprep.subr.bf16.mxu0 %v6528_v28  ;;  %v6535_v28 = vld [vmem:[#allocation9 + $0xac0] ss:$24 sps:$4 sm:$0xff]   ;;  %v5631_v12 = vadd.f32 %v7281_v13, %v7299_v52  ;;  %v6549_v52 = vld [vmem:[#allocation9 + $0xb24] ss:$24 sps:$4 sm:$0xff]  }
 0x2db   : > { %v4787_v60 = vadd.f32 %v7330_v9, %v4720_v44  ;;  %v5620_v4 = vadd.f32 %v5619_v39, %v3998_v59  ;;  %v4000_v25 = vpop.f32.mrb[5].mxu1  ;;  %v6538_v16 = vld [vmem:[#allocation9 + $0xe48] ss:$24 sps:$4 sm:$0xff]   ;;  %v5629_v39 = vadd.f32 %v7279_v6, %v7303_v62  ;;  %v5633_v59 = vadd.f32 %v7283_v24, %v7303_v62  ;;  %v6544_v13 = vld [vmem:[#allocation9 + $0xe78] ss:$24 sps:$4 sm:$0xff]  }
 0x2dc   : > { %v5593_v5 = vpack.c.bf16 %v4782_v33, %v4781_v20  ;;  %v4788_v58 = vadd.f32 %v7334_v35, %v4721_v54  ;;  %v5622_v38 = vadd.f32 %v5621_v22, %v4000_v25  ;;  %v4002_v3 = vpop.f32.mrb[6].mxu1  ;;  %4536 = vmatpush1.bf16.msra.mxu1 %v6523_v50  ;;  %v6543_v50 = vld [vmem:[#allocation9 + $0xaf4] ss:$24 sps:$4 sm:$0xff]  }
 0x2dd   : > { %v4659_v14 = vmax.f32 %v5620_v4, 0.0  ;;  %v5624_v18 = vadd.f32 %v5623_v56, %v4002_v3  ;;  %v4004_v26 = vpop.f32.mrb[7].mxu1  ;;  %4290 = vmatpush1.bf16.msra.mxu0 %v6526_v53  ;;  %4537 = vmatprep.subr.bf16.mxu1 %v6531_v21  ;;  %v6546_v21 = vld [vmem:[#allocation9 + $0xe7c] ss:$24 sps:$4 sm:$0xff]   ;;  %v6541_v4 = vld [vmem:[#allocation9 + $0xaf0] ss:$24 sps:$4 sm:$0xff]  }
 0x2de   : > { %4925 = vst [vmem:[%s7357_s15] sm:$0xff] %v5593_v5  ;;  %v5596_v0 = vpack.c.bf16 %v4788_v58, %v4787_v60  ;;  %v4660_v45 = vmax.f32 %v5622_v38, 0.0  ;;  %v5626_v37 = vadd.f32 %v5625_v32, %v4004_v26  ;;  %4291 = vmatprep.subr.bf16.mxu0 %v6534_v63  ;;  %v6552_v24 = vld [vmem:[#allocation9 + $0xeac] ss:$24 sps:$4 sm:$0xff]   ;;  %v6547_v26 = vld [vmem:[#allocation9 + $0xb20] ss:$24 sps:$4 sm:$0xff]  }
 0x2df   : > { %v4726_v29 = vmul.f32 %v7319_v8, %v4659_v14  ;;  %v4665_v40 = vmax.f32 %v5624_v18, 0.0 }
 0x2e0   : > { %4928 = vst [vmem:[%s7357_s15 + $0x18] sm:$0xff] %v5596_v0  ;;  %v4727_v42 = vmul.f32 %v7326_v2, %v4660_v45  ;;  %v4666_v43 = vmax.f32 %v5626_v37, 0.0  ;;  %4538 = vmatpush1.bf16.msra.mxu1 %v6529_v41  ;;  %v6550_v0 = vld [vmem:[#allocation9 + $0xea8] ss:$24 sps:$4 sm:$0xff]   ;;  %v6555_v45 = vld [vmem:[#allocation9 + $0xb54] ss:$24 sps:$4 sm:$0xff]  }
 0x2e1   : > { %v4793_v19 = vadd.f32 %v7330_v9, %v4726_v29  ;;  %v4732_v34 = vmul.f32 %v7319_v8, %v4665_v40  ;;  %4292 = vmatpush1.bf16.msra.mxu0 %v6532_v55  ;;  %4539 = vmatprep.subr.bf16.mxu1 %v6537_v30  ;;  %v6558_v29 = vld [vmem:[#allocation9 + $0xedc] ss:$24 sps:$4 sm:$0xff]  }
 0x2e2   : > { %v4794_v20 = vadd.f32 %v7334_v35, %v4727_v42  ;;  %v4733_v44 = vmul.f32 %v7326_v2, %v4666_v43  ;;  %v4008_v53 = vpop.f32.mrb[8].mxu1  ;;  %4293 = vmatprep.subr.bf16.mxu0 %v6540_v46 }
 0x2e3   : > { %v4799_v22 = vadd.f32 %v7330_v9, %v4732_v34  ;;  %v5628_v33 = vadd.f32 %v5627_v36, %v4008_v53  ;;  %v4010_v54 = vpop.f32.mrb[9].mxu1  ;;  %v6561_v36 = vld [vmem:[#allocation9 + $0xb84] ss:$24 sps:$4 sm:$0xff]   ;;  %v6559_v34 = vld [vmem:[#allocation9 + $0xb80] ss:$24 sps:$4 sm:$0xff]  }
 0x2e4   : > { %v5599_v63 = vpack.c.bf16 %v4794_v20, %v4793_v19  ;;  %v4800_v6 = vadd.f32 %v7334_v35, %v4733_v44  ;;  %v5630_v56 = vadd.f32 %v5629_v39, %v4010_v54  ;;  %v4012_v60 = vpop.f32.mrb[10].mxu1  ;;  %4540 = vmatpush1.bf16.msra.mxu1 %v6535_v28  ;;  %v6553_v28 = vld [vmem:[#allocation9 + $0xb50] ss:$24 sps:$4 sm:$0xff]   ;;  %v6573_v20 = vld [vmem:[#allocation9 + $0xc44] ss:$24 sps:$4 sm:$0xff]  }
 0x2e5   : > { %v4671_v25 = vmax.f32 %v5628_v33, 0.0  ;;  %v5632_v32 = vadd.f32 %v5631_v12, %v4012_v60  ;;  %v4014_v5 = vpop.f32.mrb[11].mxu1  ;;  %4294 = vmatpush1.bf16.msra.mxu0 %v6538_v16  ;;  %4541 = vmatprep.subr.bf16.mxu1 %v6543_v50  ;;  %v6565_v16 = vld [vmem:[#allocation9 + $0xbe0] ss:$24 sps:$4 sm:$0xff]   ;;  %v6570_v50 = vld [vmem:[#allocation9 + $0xc14] ss:$24 sps:$4 sm:$0xff]  }
 0x2e6   : > { %4931 = vst [vmem:[%s7357_s15 + $0x30] sm:$0xff] %v5599_v63  ;;  %v5602_v58 = vpack.c.bf16 %v4800_v6, %v4799_v22  ;;  %v4672_v38 = vmax.f32 %v5630_v56, 0.0  ;;  %v5634_v3 = vadd.f32 %v5633_v59, %v4014_v5  ;;  %4295 = vmatprep.subr.bf16.mxu0 %v6546_v21  ;;  %v6568_v39 = vld [vmem:[#allocation9 + $0xc10] ss:$24 sps:$4 sm:$0xff]   ;;  %v6571_v44 = vld [vmem:[#allocation9 + $0xc40] ss:$24 sps:$4 sm:$0xff]  }
 0x2e7   : > { %v4738_v62 = vmul.f32 %v7319_v8, %v4671_v25  ;;  %v4677_v41 = vmax.f32 %v5632_v32, 0.0  ;;  %v6576_v53 = vld [vmem:[#allocation9 + $0xc74] ss:$24 sps:$4 sm:$0xff]   ;;  %v6574_v21 = vld [vmem:[#allocation9 + $0xc70] ss:$24 sps:$4 sm:$0xff]  }
 0x2e8   : > { %4934 = vst [vmem:[%s7357_s15 + $0x48] sm:$0xff] %v5602_v58  ;;  %v4739_v14 = vmul.f32 %v7326_v2, %v4672_v38  ;;  %v4678_v18 = vmax.f32 %v5634_v3, 0.0  ;;  %4542 = vmatpush1.bf16.msra.mxu1 %v6541_v4  ;;  %v6579_v12 = vld [vmem:[#allocation9 + $0xca4] ss:$24 sps:$4 sm:$0xff]   ;;  %v6577_v22 = vld [vmem:[#allocation9 + $0xca0] ss:$24 sps:$4 sm:$0xff]  }
 0x2e9   : > { %v4805_v55 = vadd.f32 %v7330_v9, %v4738_v62  ;;  %v4744_v30 = vmul.f32 %v7319_v8, %v4677_v41  ;;  %4296 = vmatpush1.bf16.msra.mxu0 %v6544_v13  ;;  %4543 = vmatprep.subr.bf16.mxu1 %v6549_v52  ;;  %v6556_v8 = vld [vmem:[#allocation9 + $0xed8] ss:$24 sps:$4 sm:$0xff]   ;;  %v6585_v33 = vld [vmem:[#allocation9 + $0xd04] ss:$24 sps:$4 sm:$0xff]   ;;  %v6588_v59 = vld [vmem:[#allocation9 + $0xd34] ss:$24 sps:$4 sm:$0xff]  }
 0x2ea   : > { %v4806_v37 = vadd.f32 %v7334_v35, %v4739_v14  ;;  %v4745_v46 = vmul.f32 %v7326_v2, %v4678_v18  ;;  %4297 = vmatprep.subr.bf16.mxu0 %v6552_v24  ;;  %v6564_v2 = vld [vmem:[#allocation9 + $0xbb4] ss:$24 sps:$4 sm:$0xff]   ;;  %v6583_v54 = vld [vmem:[#allocation9 + $0xd00] ss:$24 sps:$4 sm:$0xff]   ;;  %v6592_v56 = vld [vmem:[#allocation9 + $0xd90] ss:$24 sps:$4 sm:$0xff]  }
 0x2eb   : > { %v4811_v40 = vadd.f32 %v7330_v9, %v4744_v30  ;;  %v6562_v9 = vld [vmem:[#allocation9 + $0xbb0] ss:$24 sps:$4 sm:$0xff]   ;;  %v6589_v63 = vld [vmem:[#allocation9 + $0xd60] ss:$24 sps:$4 sm:$0xff]   ;;  %v6594_v6 = vld [vmem:[#allocation9 + $0xd94] ss:$24 sps:$4 sm:$0xff]  }
 0x2ec   : > { %v5605_v42 = vpack.c.bf16 %v4806_v37, %v4805_v55  ;;  %v4812_v43 = vadd.f32 %v7334_v35, %v4745_v46  ;;  %4544 = vmatpush1.bf16.msra.mxu1 %v6547_v26  ;;  %v6567_v35 = vld [vmem:[#allocation9 + $0xbe4] ss:$24 sps:$4 sm:$0xff]   ;;  %v6600_v4 = vld [vmem:[#allocation9 + $0xdf4] ss:$24 sps:$4 sm:$0xff]   ;;  %v6601_v32 = vld [vmem:[#allocation9 + $0xe20] ss:$24 sps:$4 sm:$0xff]  }
 0x2ed   : > { %4298 = vmatpush1.bf16.msra.mxu0 %v6550_v0  ;;  %4545 = vmatprep.subr.bf16.mxu1 %v6555_v45  ;;  %v6597_v60 = vld [vmem:[#allocation9 + $0xdc4] ss:$24 sps:$4 sm:$0xff]   ;;  %v6606_v5 = vld [vmem:[#allocation9 + $0xe54] ss:$24 sps:$4 sm:$0xff]   ;;  %v6604_v13 = vld [vmem:[#allocation9 + $0xe50] ss:$24 sps:$4 sm:$0xff]  }
 0x2ee   : > { %4937 = vst [vmem:[%s7357_s15 + $0x60] sm:$0xff] %v5605_v42  ;;  %v5608_v19 = vpack.c.bf16 %v4812_v43, %v4811_v40  ;;  %4299 = vmatprep.subr.bf16.mxu0 %v6558_v29  ;;  %v6603_v25 = vld [vmem:[#allocation9 + $0xe24] ss:$24 sps:$4 sm:$0xff]   ;;  %v6607_v58 = vld [vmem:[#allocation9 + $0xe80] ss:$24 sps:$4 sm:$0xff]   ;;  %v1282_v41 = vsub.s32 2, %v7035_v17 }
 0x2ef   : > { %v6609_v52 = vld [vmem:[#allocation9 + $0xe84] ss:$24 sps:$4 sm:$0xff]   ;;  %v6612_v38 = vld [vmem:[#allocation9 + $0xeb4] ss:$24 sps:$4 sm:$0xff]   ;;  %v6610_v3 = vld [vmem:[#allocation9 + $0xeb0] ss:$24 sps:$4 sm:$0xff]  }
 0x2f0   : > { %4940 = vst [vmem:[%s7357_s15 + $0x78] sm:$0xff] %v5608_v19  ;;  %4546 = vmatpush1.bf16.msra.mxu1 %v6553_v28  ;;  %v6615_v24 = vld [vmem:[#allocation9 + $0xee4] ss:$24 sps:$4 sm:$0xff]   ;;  %v6613_v62 = vld [vmem:[#allocation9 + $0xee0] ss:$24 sps:$4 sm:$0xff]   ;;  %v1286_v14 = vsub.s32 3, %v7035_v17  ;;  %v1283_v18 = vrot.slane %v7295_v48, %v1282_v41  ;;  %v4762_v45 = vrot.slane %v7313_v31, %v1282_v41 }
 0x2f1   : > { %4300 = vmatpush1.bf16.msra.mxu0 %v6556_v8  ;;  %4547 = vmatprep.subr.bf16.mxu1 %v6561_v36 }
 0x2f2   : > { %v1287_v26 = vrot.slane %v7295_v48, %v1286_v14  ;;  %v4766_v40 = vrot.slane %v7313_v31, %v1286_v14 }
 0x2f4   : > { %4302 = vmatmul.mubr.bf16.vlgmr.msra.gmra.mrb[28].mxu0 %v7218_v47  ;;  %4548 = vmatpush1.bf16.msra.mxu1 %v6559_v34 }
 0x2f5   : > { %4311 = vmatprep.mubr.bf16.mxu0 %v7224_v49  ;;  %4549 = vmatprep.subr.bf16.mxu1 %v6564_v2 }
 0x2f8   : > { %4550 = vmatpush1.bf16.msra.mxu1 %v6562_v9 }
 0x2f9   : > { %4551 = vmatprep.subr.bf16.mxu1 %v6567_v35 }
 0x2fc   : > { %4312 = vmatmul.mubr.bf16.gmra.mrb[32].mxu0 %v7230_v61  ;;  %4552 = vmatpush1.bf16.msra.mxu1 %v6565_v16 }
 0x2fd   : > { %4321 = vmatprep.mubr.bf16.mxu0 %v7234_v1  ;;  %4584 = vmatprep.subr.bf16.mxu1 %v6570_v50 }
 0x2ff   : > { %4554 = vmatmul.mubr.bf16.vlgmr.msra.gmra.mrb[12].mxu1 %v7181_v15  ;;  %v6582_v15 = vld [vmem:[#allocation9 + $0xcd4] ss:$24 sps:$4 sm:$0xff]  }
 0x300   : > { %4563 = vmatprep.mubr.bf16.mxu1 %v7186_v27  ;;  %4585 = vmatpush1.bf16.msra.mxu1 %v6568_v39  ;;  %v6580_v27 = vld [vmem:[#allocation9 + $0xcd0] ss:$24 sps:$4 sm:$0xff]  }
 0x301   : > { %4586 = vmatprep.subr.bf16.mxu1 %v6573_v20 }
 0x304   : > { %4322 = vmatmul.mubr.bf16.gmra.mrb[36].mxu0 %v7238_v23  ;;  %4587 = vmatpush1.bf16.msra.mxu1 %v6571_v44 }
 0x305   : > { %4588 = vmatprep.subr.bf16.mxu1 %v6576_v53 }
 0x307   : > { %4564 = vmatmul.mubr.bf16.gmra.mrb[16].mxu1 %v7195_v51  ;;  %v6586_v51 = vld [vmem:[#allocation9 + $0xd30] ss:$24 sps:$4 sm:$0xff]  }
 0x308   : > { %4573 = vmatprep.mubr.bf16.mxu1 %v7199_v57  ;;  %4589 = vmatpush1.bf16.msra.mxu1 %v6574_v21  ;;  %v6591_v57 = vld [vmem:[#allocation9 + $0xd64] ss:$24 sps:$4 sm:$0xff]  }
 0x309   : > { %4590 = vmatprep.subr.bf16.mxu1 %v6579_v12 }
 0x30c   : > { %4591 = vmatpush1.bf16.msra.mxu1 %v6577_v22 }
 0x30d   : > { %4592 = vmatprep.subr.bf16.mxu1 %v6582_v15 }
 0x30f   : > { %4574 = vmatmul.mubr.bf16.gmra.mrb[20].mxu1 %v7204_v7  ;;  %v6595_v7 = vld [vmem:[#allocation9 + $0xdc0] ss:$24 sps:$4 sm:$0xff]  }
 0x310   : > { %4593 = vmatpush1.bf16.msra.mxu1 %v6580_v27  ;;  %4616 = vmatprep.mubr.bf16.mxu1 %v7210_v11  ;;  %v6598_v11 = vld [vmem:[#allocation9 + $0xdf0] ss:$24 sps:$4 sm:$0xff]  }
 0x311   : > { %4594 = vmatprep.subr.bf16.mxu1 %v6585_v33 }
 0x314   : > { %4595 = vmatpush1.bf16.msra.mxu1 %v6583_v54 }
 0x315   : > { %4596 = vmatprep.subr.bf16.mxu1 %v6588_v59 }
 0x318   : > { %4597 = vmatpush1.bf16.msra.mxu1 %v6586_v51 }
 0x319   : > { %4598 = vmatprep.subr.bf16.mxu1 %v6591_v57 }
 0x31c   : > { %4599 = vmatpush1.bf16.msra.mxu1 %v6589_v63 }
 0x31d   : > { %4600 = vmatprep.subr.bf16.mxu1 %v6594_v6 }
 0x320   : > { %4601 = vmatpush1.bf16.msra.mxu1 %v6592_v56 }
 0x321   : > { %4602 = vmatprep.subr.bf16.mxu1 %v6597_v60 }
 0x324   : > { %4603 = vmatpush1.bf16.msra.mxu1 %v6595_v7 }
 0x325   : > { %4604 = vmatprep.subr.bf16.mxu1 %v6600_v4 }
 0x328   : > { %4605 = vmatpush1.bf16.msra.mxu1 %v6598_v11 }
 0x329   : > { %4606 = vmatprep.subr.bf16.mxu1 %v6603_v25 }
 0x32c   : > { %4607 = vmatpush1.bf16.msra.mxu1 %v6601_v32 }
 0x32d   : > { %4608 = vmatprep.subr.bf16.mxu1 %v6606_v5 }
 0x330   : > { %4609 = vmatpush1.bf16.msra.mxu1 %v6604_v13 }
 0x331   : > { %4610 = vmatprep.subr.bf16.mxu1 %v6609_v52 }
 0x334   : > { %4611 = vmatpush1.bf16.msra.mxu1 %v6607_v58 }
 0x335   : > { %4612 = vmatprep.subr.bf16.mxu1 %v6612_v38 }
 0x338   : > { %4613 = vmatpush1.bf16.msra.mxu1 %v6610_v3 }
 0x339   : > { %4614 = vmatprep.subr.bf16.mxu1 %v6615_v24 }
 0x33c   : > { %4615 = vmatpush1.bf16.msra.mxu1 %v6613_v62 }
 0x33f   : > { %4617 = vmatmul.mubr.bf16.vlgmr.msra.gmra.mrb[12].mxu1 %v7218_v47  ;;  %v7410_v47 = vrot.slane %v7307_v10, %v1282_v41 }
 0x340   : > { %4626 = vmatprep.mubr.bf16.mxu1 %v7224_v49 }
 0x347   : > { %4627 = vmatmul.mubr.bf16.gmra.mrb[16].mxu1 %v7230_v61  ;;  %v7413_v61 = vrot.slane %v7307_v10, %v1286_v14 }
 0x348   : > { %4636 = vmatprep.mubr.bf16.mxu1 %v7234_v1 }
 0x34f   : > { %4637 = vmatmul.mubr.bf16.gmra.mrb[20].mxu1 %v7238_v23 }
 0x3c7   : > { %v4303_v55 = vpop.f32.mrb[28].mxu0 }
 0x3c8   : > { %v5635_v30 = vadd.f32 %v4303_v55, %v1283_v18  ;;  %v4305_v49 = vpop.f32.mrb[29].mxu0 }
 0x3c9   : > { %v5636_v0 = vadd.f32 %v4305_v49, %v1287_v26  ;;  %v4307_v1 = vpop.f32.mrb[30].mxu0 }
 0x3ca   : > { %v4649_v23 = vmax.f32 %v5635_v30, 0.0  ;;  %v5637_v37 = vadd.f32 %v4307_v1, %v1283_v18  ;;  %v4309_v46 = vpop.f32.mrb[31].mxu0 }
 0x3cb   : > { %v4650_v29 = vmax.f32 %v5636_v0, 0.0  ;;  %v5638_v42 = vadd.f32 %v4309_v46, %v1287_v26 }
 0x3cc   : > { %v4716_v43 = vmul.f32 %v7410_v47, %v4649_v23  ;;  %v4655_v28 = vmax.f32 %v5637_v37, 0.0 }
 0x3cd   : > { %v4717_v8 = vmul.f32 %v7413_v61, %v4650_v29  ;;  %v4656_v36 = vmax.f32 %v5638_v42, 0.0 }
 0x3ce   : > { %v4783_v19 = vadd.f32 %v4762_v45, %v4716_v43  ;;  %v4722_v34 = vmul.f32 %v7410_v47, %v4655_v28  ;;  %v1294_v28 = vsub.s32 5, %v7035_v17 }
 0x3cf   : > { %v4784_v2 = vadd.f32 %v4766_v40, %v4717_v8  ;;  %v4723_v9 = vmul.f32 %v7413_v61, %v4656_v36  ;;  %v4313_v35 = vpop.f32.mrb[32].mxu0 }
 0x3d0   : > { %v4789_v16 = vadd.f32 %v4762_v45, %v4722_v34  ;;  %v5639_v50 = vadd.f32 %v4313_v35, %v1283_v18  ;;  %v4315_v39 = vpop.f32.mrb[33].mxu0  ;;  %v1295_v36 = vrot.slane %v7295_v48, %v1294_v28 }
 0x3d1   : > { %v5594_v20 = vpack.c.bf16 %v4784_v2, %v4783_v19  ;;  %v4790_v44 = vadd.f32 %v4766_v40, %v4723_v9  ;;  %v5640_v53 = vadd.f32 %v4315_v39, %v1287_v26  ;;  %v4317_v21 = vpop.f32.mrb[34].mxu0 }
 0x3d2   : > { %v4661_v12 = vmax.f32 %v5639_v50, 0.0  ;;  %v5641_v22 = vadd.f32 %v4317_v21, %v1283_v18  ;;  %v4319_v15 = vpop.f32.mrb[35].mxu0 }
 0x3d3   : > { %4926 = vst [vmem:[%s7357_s15 + $0x8] sm:$0xff] %v5594_v20  ;;  %v5597_v27 = vpack.c.bf16 %v4790_v44, %v4789_v16  ;;  %v4662_v33 = vmax.f32 %v5640_v53, 0.0  ;;  %v5642_v54 = vadd.f32 %v4319_v15, %v1287_v26 }
 0x3d4   : > { %v4728_v59 = vmul.f32 %v7410_v47, %v4661_v12  ;;  %v4667_v51 = vmax.f32 %v5641_v22, 0.0 }
 0x3d5   : > { %4929 = vst [vmem:[%s7357_s15 + $0x20] sm:$0xff] %v5597_v27  ;;  %v4729_v57 = vmul.f32 %v7413_v61, %v4662_v33  ;;  %v4668_v63 = vmax.f32 %v5642_v54, 0.0 }
 0x3d6   : > { %v4795_v6 = vadd.f32 %v4762_v45, %v4728_v59  ;;  %v4734_v56 = vmul.f32 %v7410_v47, %v4667_v51 }
 0x3d7   : > { %v4796_v60 = vadd.f32 %v4766_v40, %v4729_v57  ;;  %v4735_v7 = vmul.f32 %v7413_v61, %v4668_v63  ;;  %v4323_v4 = vpop.f32.mrb[36].mxu0 }
 0x3d8   : > { %v4801_v11 = vadd.f32 %v4762_v45, %v4734_v56  ;;  %v5643_v25 = vadd.f32 %v4323_v4, %v1283_v18  ;;  %v4325_v32 = vpop.f32.mrb[37].mxu0 }
 0x3d9   : > { %v5600_v5 = vpack.c.bf16 %v4796_v60, %v4795_v6  ;;  %v4802_v13 = vadd.f32 %v4766_v40, %v4735_v7  ;;  %v5644_v52 = vadd.f32 %v4325_v32, %v1287_v26  ;;  %v4327_v58 = vpop.f32.mrb[38].mxu0 }
 0x3da   : > { %v4673_v38 = vmax.f32 %v5643_v25, 0.0  ;;  %v5645_v3 = vadd.f32 %v4327_v58, %v1283_v18  ;;  %v4329_v24 = vpop.f32.mrb[39].mxu0 }
 0x3db   : > { %4932 = vst [vmem:[%s7357_s15 + $0x38] sm:$0xff] %v5600_v5  ;;  %v5603_v62 = vpack.c.bf16 %v4802_v13, %v4801_v11  ;;  %v4674_v41 = vmax.f32 %v5644_v52, 0.0  ;;  %v5646_v14 = vadd.f32 %v4329_v24, %v1287_v26  ;;  %v1290_v26 = vsub.s32 4, %v7035_v17 }
 0x3dc   : > { %v4740_v55 = vmul.f32 %v7410_v47, %v4673_v38  ;;  %v4679_v30 = vmax.f32 %v5645_v3, 0.0 }
 0x3dd   : > { %4935 = vst [vmem:[%s7357_s15 + $0x50] sm:$0xff] %v5603_v62  ;;  %v4741_v49 = vmul.f32 %v7413_v61, %v4674_v41  ;;  %v4680_v0 = vmax.f32 %v5646_v14, 0.0  ;;  %v1291_v8 = vrot.slane %v7295_v48, %v1290_v26  ;;  %v7446_v35 = vrot.slane %v7313_v31, %v1290_v26 }
 0x3de   : > { %v4807_v1 = vadd.f32 %v4762_v45, %v4740_v55  ;;  %v4746_v23 = vmul.f32 %v7410_v47, %v4679_v30  ;;  %v7440_v47 = vrot.slane %v7307_v10, %v1290_v26  ;;  %v4774_v48 = vrot.slane %v7313_v31, %v1294_v28 }
 0x3df   : > { %v4808_v37 = vadd.f32 %v4766_v40, %v4741_v49  ;;  %v4747_v18 = vmul.f32 %v7413_v61, %v4680_v0 }
 0x3e0   : > { %v4813_v46 = vadd.f32 %v4762_v45, %v4746_v23 }
 0x3e1   : > { %v5606_v29 = vpack.c.bf16 %v4808_v37, %v4807_v1  ;;  %v4814_v42 = vadd.f32 %v4766_v40, %v4747_v18  ;;  %v7443_v40 = vrot.slane %v7307_v10, %v1294_v28 }
 0x3e3   : > { %4938 = vst [vmem:[%s7357_s15 + $0x68] sm:$0xff] %v5606_v29  ;;  %v5609_v43 = vpack.c.bf16 %v4814_v42, %v4813_v46 }
 0x3e5   : > { %4941 = vst [vmem:[%s7357_s15 + $0x80] sm:$0xff] %v5609_v43 }
 0x412   : > { %v4618_v19 = vpop.f32.mrb[12].mxu1 }
 0x413   : > { %v5647_v34 = vadd.f32 %v4618_v19, %v1291_v8  ;;  %v4620_v61 = vpop.f32.mrb[13].mxu1 }
 0x414   : > { %v5648_v45 = vadd.f32 %v4620_v61, %v1295_v36  ;;  %v4622_v2 = vpop.f32.mrb[14].mxu1 }
 0x415   : > { %v4651_v9 = vmax.f32 %v5647_v34, 0.0  ;;  %v5649_v17 = vadd.f32 %v4622_v2, %v1291_v8  ;;  %v4624_v16 = vpop.f32.mrb[15].mxu1 }
 0x416   : > { %v4652_v50 = vmax.f32 %v5648_v45, 0.0  ;;  %v5650_v39 = vadd.f32 %v4624_v16, %v1295_v36 }
 0x417   : > { %v4718_v20 = vmul.f32 %v7440_v47, %v4651_v9  ;;  %v4657_v44 = vmax.f32 %v5649_v17, 0.0 }
 0x418   : > { %v4719_v53 = vmul.f32 %v7443_v40, %v4652_v50  ;;  %v4658_v21 = vmax.f32 %v5650_v39, 0.0 }
 0x419   : > { %v4785_v10 = vadd.f32 %v7446_v35, %v4718_v20  ;;  %v4724_v12 = vmul.f32 %v7440_v47, %v4657_v44 }
 0x41a   : > { %v4786_v22 = vadd.f32 %v4774_v48, %v4719_v53  ;;  %v4725_v15 = vmul.f32 %v7443_v40, %v4658_v21  ;;  %v4628_v27 = vpop.f32.mrb[16].mxu1 }
 0x41b   : > { %v4791_v33 = vadd.f32 %v7446_v35, %v4724_v12  ;;  %v5651_v31 = vadd.f32 %v4628_v27, %v1291_v8  ;;  %v4630_v54 = vpop.f32.mrb[17].mxu1 }
 0x41c   : > { %v5595_v59 = vpack.c.bf16 %v4786_v22, %v4785_v10  ;;  %v4792_v51 = vadd.f32 %v4774_v48, %v4725_v15  ;;  %v5652_v57 = vadd.f32 %v4630_v54, %v1295_v36  ;;  %v4632_v63 = vpop.f32.mrb[18].mxu1 }
 0x41d   : > { %v4663_v6 = vmax.f32 %v5651_v31, 0.0  ;;  %v5653_v56 = vadd.f32 %v4632_v63, %v1291_v8  ;;  %v4634_v60 = vpop.f32.mrb[19].mxu1 }
 0x41e   : > { %4927 = vst [vmem:[%s7357_s15 + $0x10] sm:$0xff] %v5595_v59  ;;  %v5598_v7 = vpack.c.bf16 %v4792_v51, %v4791_v33  ;;  %v4664_v4 = vmax.f32 %v5652_v57, 0.0  ;;  %v5654_v11 = vadd.f32 %v4634_v60, %v1295_v36 }
 0x41f   : > { %v4730_v25 = vmul.f32 %v7440_v47, %v4663_v6  ;;  %v4669_v32 = vmax.f32 %v5653_v56, 0.0 }
 0x420   : > { %4930 = vst [vmem:[%s7357_s15 + $0x28] sm:$0xff] %v5598_v7  ;;  %v4731_v5 = vmul.f32 %v7443_v40, %v4664_v4  ;;  %v4670_v13 = vmax.f32 %v5654_v11, 0.0 }
 0x421   : > { %v4797_v52 = vadd.f32 %v7446_v35, %v4730_v25  ;;  %v4736_v58 = vmul.f32 %v7440_v47, %v4669_v32 }
 0x422   : > { %v4798_v38 = vadd.f32 %v4774_v48, %v4731_v5  ;;  %v4737_v3 = vmul.f32 %v7443_v40, %v4670_v13  ;;  %v4638_v24 = vpop.f32.mrb[20].mxu1 }
 0x423   : > { %v4803_v62 = vadd.f32 %v7446_v35, %v4736_v58  ;;  %v5655_v41 = vadd.f32 %v4638_v24, %v1291_v8  ;;  %v4640_v14 = vpop.f32.mrb[21].mxu1 }
 0x424   : > { %v5601_v55 = vpack.c.bf16 %v4798_v38, %v4797_v52  ;;  %v4804_v30 = vadd.f32 %v4774_v48, %v4737_v3  ;;  %v5656_v49 = vadd.f32 %v4640_v14, %v1295_v36  ;;  %v4642_v0 = vpop.f32.mrb[22].mxu1 }
 0x425   : > { %v4675_v1 = vmax.f32 %v5655_v41, 0.0  ;;  %v5657_v23 = vadd.f32 %v4642_v0, %v1291_v8  ;;  %v4644_v37 = vpop.f32.mrb[23].mxu1 }
 0x426   : > { %4933 = vst [vmem:[%s7357_s15 + $0x40] sm:$0xff] %v5601_v55  ;;  %v5604_v18 = vpack.c.bf16 %v4804_v30, %v4803_v62  ;;  %v4676_v46 = vmax.f32 %v5656_v49, 0.0  ;;  %v5658_v29 = vadd.f32 %v4644_v37, %v1295_v36 }
 0x427   : > { %v4742_v42 = vmul.f32 %v7440_v47, %v4675_v1  ;;  %v4681_v43 = vmax.f32 %v5657_v23, 0.0 }
 0x428   : > { %4936 = vst [vmem:[%s7357_s15 + $0x58] sm:$0xff] %v5604_v18  ;;  %v4743_v26 = vmul.f32 %v7443_v40, %v4676_v46  ;;  %v4682_v28 = vmax.f32 %v5658_v29, 0.0 }
 0x429   : > { %v4809_v19 = vadd.f32 %v7446_v35, %v4742_v42  ;;  %v4748_v8 = vmul.f32 %v7440_v47, %v4681_v43 }
 0x42a   : > { %v4810_v34 = vadd.f32 %v4774_v48, %v4743_v26  ;;  %v4749_v61 = vmul.f32 %v7443_v40, %v4682_v28 }
 0x42b   : > { %v4815_v36 = vadd.f32 %v7446_v35, %v4748_v8 }
 0x42c   : > { %v5607_v45 = vpack.c.bf16 %v4810_v34, %v4809_v19  ;;  %v4816_v2 = vadd.f32 %v4774_v48, %v4749_v61 }
 0x42e   : > { %4939 = vst [vmem:[%s7357_s15 + $0x70] sm:$0xff] %v5607_v45  ;;  %v5610_v9 = vpack.c.bf16 %v4816_v2, %v4815_v36 }
 0x430   : > { %4942 = vst [vmem:[%s7357_s15 + $0x88] sm:$0xff] %v5610_v9 }
 0x431   : > { %6746 = shalt.err (!%p6743_p1)
}
 0x432   : > { %s6747_s1 = scalar_lea.hbm %s7479_s7, 2304  ;;  %s6751_s23 = scalar_lea.hbm %s7530_s5, 4608 }
 0x433   : > { %p6748_p0 = scmp.ne.s32.totalorder %s7479_s7, %s6747_s1  ;;  %p6752_p9 = scmp.lt.u32.totalorder %s7479_s7, %s7530_s5 }
 0x434   : > { %p6753_p12 = scmp.lt.u32.totalorder %s6751_s23, %s6747_s1  ;;  %p6755_p2 = scmp.lt.u32.totalorder %s6747_s1, %s7479_s7 }
 0x435   : > { %p6749_p6 = pnand %p6748_p0, %p7548_p3 }
 0x436   : > { %p6754_p10 = por %p6753_p12, %p6752_p9 }
 0x437   : > { %p6750_p5 = pneg %p6749_p6 }
 0x438   : > { %p6756_p4 = por %p6755_p2, %p6754_p10 }
 0x43a   : > { %p6757_p7 = pnand %p6756_p4, %p6750_p5 }
 0x43c   : > { %6760 = shalt.err (!%p6757_p7)
}
 0x43d   : > { %s6819_s14 = smov 384   ;;  %s6820_s15 = smov 24  }
 0x43e   : > { %5809 = dma.vmem_to_hbm [thread:$0]  (%p7548_p3), %s7473_s17, 2304, %s7479_s7, %s7484_s22, %s6819_s14, %s6819_s14, %s6820_s15  }
 0x43f PF: > { %p5836_p8 = scmp.ge.s32.totalorder %s6807_s21, 2  ;;  %s4972_s16 = sand.u32 1, %s6795_s18  }
 0x440   : > { %p7549_p11 = scmp.ne.s32.totalorder %s7536_s29, 0  ;;  %s4973_s25 = scalar_lea.sflag [#allocation6], %s4972_s16 }
 0x442   : > { %p5825_p13 = pnand %p5836_p8, %p7549_p11 }
 0x444   : > { %6790 = dma.done.wait (!%p5825_p13), %s4973_s25, 2304  }
 0x445   : > { %6792 = vsyncadd (!%p5825_p13), %s4973_s25, 4294964992  ;;  %p18_p1 = scmp.ge.s32.totalorder %s6876_s24, 4   ;;  %s7550_s18 = smov %s6799_s19 }
 0x446   : > { %s7551_s19 = smov %s6803_s20  ;;  %s7552_s20 = smov %s6887_s27 }
 0x447   : > { %s7553_s21 = smov %s6876_s24  ;;  %20 = sbr.rel (!%p18_p1) target bundleno = 8 (0x8), region = 94 }
 0x44e   :  { %4978 = vsyncpa [#allocation5], 1 }
 0x44f   :  { %4980 = vsyncpa [#allocation5 + $0x1], 1 }
 0x450   :  { %4981 = vsyncpa [#allocation8], 1 }
 0x451   :  { %4982 = vsyncpa [#allocation11], 1 }
 0x452   :  { %4983 = vsyncpa [#allocation6], 1 }
 0x453   :  { %4985 = vsyncpa [#allocation6 + $0x1], 1 }

</bundles_post_ra>
